<compile_context>
chip_gen: v6e
topology: v6e:2x2x1
jax: 0.10.0
libtpu: 0.0.40
codegen_flags: <defaults>
</compile_context>

<pallas_src>
import jax
import jax.numpy as jnp
from jax.experimental import pallas as pl
from jax.experimental.pallas import tpu as pltpu

# ---------------- hyperparameters (from the PyTorch script) ----------------
INPUT_DIM = 3
HIDDEN_DIM = 30
HIDDEN_NUMS = 3
OUTPUT_DIM = 15
BLOCK_LAYER_NUMS = 3

NUM_BLOCKS = HIDDEN_NUMS - 1              # 2 ResNetBlocks
LAYERS_PER_BLOCK = BLOCK_LAYER_NUMS - 1   # 2 Linear+LN+ReLU per block
NUM_BLOCK_LAYERS = NUM_BLOCKS * LAYERS_PER_BLOCK
LN_EPS = 1e-5

TILE_CAP = 4096      # max batch rows per grid step (lane-dense, multiple of 512)
TILE_QUANT = 512     # batch tiles are rounded up to a multiple of this


def _round_up(n, m):
    return ((n + m - 1) // m) * m


# ---------------- Pallas kernel: whole forward pass for one batch tile ----------------
# Activations are (features, batch): features on the sublane axis, batch on the
# 128-lane axis.  All weights are in the original PyTorch (out, in) orientation so
# every matmul is a plain W @ X feeding the MXU directly.
def resnn_kernel(x_ref, w0_ref, b0_ref, wblk_ref, bblk_ref, gblk_ref, beblk_ref,
                 wf_ref, bf_ref, out_ref):
    # ---- first layer: Linear(3,30) + ReLU ----
    h = jnp.dot(w0_ref[...], x_ref[...], preferred_element_type=jnp.float32) + b0_ref[...]
    h = jnp.maximum(h, 0.0)                                    # (HIDDEN_DIM, tile_b)

    # ---- ResNet blocks (statically unrolled) ----
    for bi in range(NUM_BLOCKS):
        out = h
        for li in range(LAYERS_PER_BLOCK):
            l = bi * LAYERS_PER_BLOCK + li
            # LayerNorm mean-centering is folded into W/b in pack_params:
            #   d = (I - J/H) @ (W @ out + b) = W_c @ out + b_c   (already centered)
            d = (jnp.dot(wblk_ref[l], out, preferred_element_type=jnp.float32)
                 + bblk_ref[l])                                # (HIDDEN_DIM, tile_b)
            # biased variance over features (sublane-axis reduce) — matches torch LN
            var = jnp.mean(d * d, axis=0, keepdims=True)       # (1, tile_b)
            out = d * jax.lax.rsqrt(var + LN_EPS) * gblk_ref[l] + beblk_ref[l]
            out = jnp.maximum(out, 0.0)
        h = h + out                                            # residual add

    # ---- final layer: Linear(30,15); batch (last dim) is lane-dense, unmasked store ----
    out_ref[...] = (jnp.dot(wf_ref[...], h, preferred_element_type=jnp.float32)
                    + bf_ref[...])


# ---------------- wrapper ----------------
def custom_resnn_forward(x, packed_params, tile_cap=TILE_CAP):
    (w0, b0, wblk_c, bblk_c, gblk, beblk, wf, bf) = packed_params
    B = x.shape[0]

    # adaptive batch tile: big enough to amortize per-step overhead, small batches
    # don't pay for a huge padded tile.  Always a multiple of 512 (=> lane-aligned).
    tile_b = min(tile_cap, _round_up(max(B, 1), TILE_QUANT))
    n_tiles = pl.cdiv(B, tile_b)
    B_pad = n_tiles * tile_b

    xt = x.T                                                   # (INPUT_DIM, B)
    if B_pad != B:
        # zero columns flow through LayerNorm harmlessly (eps > 0) and are dropped below
        xt = jnp.pad(xt, ((0, 0), (0, B_pad - B)))

    # resident-weight specs: constant block index across all grid steps
    w_spec = lambda shape: pl.BlockSpec(shape, lambda i: (0,) * len(shape))

    flops_per_row = (
        2 * INPUT_DIM * HIDDEN_DIM + 2 * HIDDEN_DIM                          # first linear + relu
        + NUM_BLOCK_LAYERS * (2 * HIDDEN_DIM * HIDDEN_DIM + 7 * HIDDEN_DIM)  # block linears + LN + relu
        + NUM_BLOCKS * HIDDEN_DIM                                            # residual adds
        + 2 * HIDDEN_DIM * OUTPUT_DIM + OUTPUT_DIM                           # final linear
    )
    weight_bytes = 4 * (w0.size + b0.size + wblk_c.size + bblk_c.size
                        + gblk.size + beblk.size + wf.size + bf.size)
    cost = pl.CostEstimate(
        flops=int(flops_per_row) * int(B_pad),
        transcendentals=NUM_BLOCK_LAYERS * int(B_pad),
        bytes_accessed=int(4 * B_pad * (INPUT_DIM + OUTPUT_DIM) + weight_bytes),
    )

    yt = pl.pallas_call(
        resnn_kernel,
        out_shape=jax.ShapeDtypeStruct((OUTPUT_DIM, B_pad), jnp.float32),
        grid=(n_tiles,),
        in_specs=[
            pl.BlockSpec((INPUT_DIM, tile_b), lambda i: (0, i)),       # x^T: batch-tiled, lane-dense
            w_spec((HIDDEN_DIM, INPUT_DIM)),                           # w0 (out, in)
            w_spec((HIDDEN_DIM, 1)),                                   # b0
            w_spec((NUM_BLOCK_LAYERS, HIDDEN_DIM, HIDDEN_DIM)),        # centered block weights
            w_spec((NUM_BLOCK_LAYERS, HIDDEN_DIM, 1)),                 # centered block biases
            w_spec((NUM_BLOCK_LAYERS, HIDDEN_DIM, 1)),                 # LN gamma
            w_spec((NUM_BLOCK_LAYERS, HIDDEN_DIM, 1)),                 # LN beta
            w_spec((OUTPUT_DIM, HIDDEN_DIM)),                          # wf (out, in)
            w_spec((OUTPUT_DIM, 1)),                                   # bf
        ],
        out_specs=pl.BlockSpec((OUTPUT_DIM, tile_b), lambda i: (0, i)),  # lane-dense output
        compiler_params=pltpu.CompilerParams(
            dimension_semantics=("parallel",),
            vmem_limit_bytes=48 * 1024 * 1024,     # safe on v7x (64 MiB phys); ample on v5e/v6e
        ),
        cost_estimate=cost,
    )(xt, w0, b0, wblk_c, bblk_c, gblk, beblk, wf, bf)

    return yt[:, :B].T                                               # (B, OUTPUT_DIM)


# ---------------- pack PyTorch-style params into kernel layout ----------------
def pack_params(params):
    (w0, b0, wblk, bblk, gblk, betablk, wf, bf) = params
    H = HIDDEN_DIM
    # centering matrix C = I - J/H ; fold LN mean-centering into weight & bias
    C = jnp.eye(H, dtype=jnp.float32) - jnp.full((H, H), 1.0 / H, jnp.float32)

    wblk_f = wblk.reshape(NUM_BLOCK_LAYERS, H, H)                    # (4, 30, 30), (out, in)
    bblk_f = bblk.reshape(NUM_BLOCK_LAYERS, H)                       # (4, 30)
    wblk_c = jnp.einsum("fo,loi->lfi", C, wblk_f)                    # C @ W per layer
    bblk_c = (bblk_f - jnp.mean(bblk_f, axis=-1, keepdims=True))[..., None]   # (4, 30, 1)

    gblk_k = gblk.reshape(NUM_BLOCK_LAYERS, H)[..., None]            # (4, 30, 1)
    beblk_k = betablk.reshape(NUM_BLOCK_LAYERS, H)[..., None]        # (4, 30, 1)

    return (w0,                                                      # (30, 3)
            b0.reshape(H, 1),                                        # (30, 1)
            wblk_c, bblk_c, gblk_k, beblk_k,
            wf,                                                      # (15, 30)
            bf.reshape(OUTPUT_DIM, 1))                               # (15, 1)


# ---------------- deterministic parameter init (PyTorch-style bounds) ----------------
def init_params(key):
    ks = list(jax.random.split(key, 16))
    kit = iter(ks)

    def lin(k, fan_out, fan_in):
        kw, kb = jax.random.split(k)
        bound = 1.0 / jnp.sqrt(fan_in)
        w = jax.random.uniform(kw, (fan_out, fan_in), jnp.float32, -bound, bound)
        b = jax.random.uniform(kb, (fan_out,), jnp.float32, -bound, bound)
        return w, b

    w0, b0 = lin(next(kit), HIDDEN_DIM, INPUT_DIM)
    b0 = b0.reshape(1, HIDDEN_DIM)

    wblk, bblk = [], []
    for _ in range(NUM_BLOCKS):
        ws, bs = [], []
        for _ in range(LAYERS_PER_BLOCK):
            w, b = lin(next(kit), HIDDEN_DIM, HIDDEN_DIM)
            ws.append(w)
            bs.append(b.reshape(1, HIDDEN_DIM))
        wblk.append(jnp.stack(ws))
        bblk.append(jnp.stack(bs))
    wblk = jnp.stack(wblk)                                          # (2, 2, 30, 30)
    bblk = jnp.stack(bblk)                                          # (2, 2, 1, 30)
    gblk = jnp.ones((NUM_BLOCKS, LAYERS_PER_BLOCK, 1, HIDDEN_DIM), jnp.float32)
    betablk = jnp.zeros((NUM_BLOCKS, LAYERS_PER_BLOCK, 1, HIDDEN_DIM), jnp.float32)

    wf, bf = lin(next(kit), OUTPUT_DIM, HIDDEN_DIM)
    bf = bf.reshape(1, OUTPUT_DIM)

    return (w0, b0, wblk, bblk, gblk, betablk, wf, bf)


# ---------------- pure-JAX reference for correctness check ----------------
def reference_forward(x, params):
    (w0, b0, wblk, bblk, gblk, betablk, wf, bf) = params
    h = jnp.maximum(x @ w0.T + b0, 0.0)
    for bi in range(NUM_BLOCKS):
        out = h
        for li in range(LAYERS_PER_BLOCK):
            out = out @ wblk[bi, li].T + bblk[bi, li]
            mu = jnp.mean(out, axis=-1, keepdims=True)
            var = jnp.mean((out - mu) ** 2, axis=-1, keepdims=True)
            out = (out - mu) / jnp.sqrt(var + LN_EPS) * gblk[bi, li] + betablk[bi, li]
            out = jnp.maximum(out, 0.0)
        h = h + out
    return h @ wf.T + bf


if __name__ == "__main__":
    key = jax.random.PRNGKey(0)
    k_params, k_x = jax.random.split(key)

    params = init_params(k_params)
    packed = pack_params(params)

    batch = 600  # not a multiple of the tile quantum: exercises batch padding
    x = jax.random.normal(k_x, (batch, INPUT_DIM), jnp.float32)
    y_ref = reference_forward(x, params)

    # default path: adaptive tile (600 -> one 1024-row tile)
    y = custom_resnn_forward(x, packed)
    y = jax.block_until_ready(y)
    assert y.shape == (batch, OUTPUT_DIM), y.shape
    assert jnp.allclose(y, y_ref, atol=1e-4, rtol=1e-4), "mismatch vs reference"

    # small tile cap: exercises the multi-tile grid + index maps (2 tiles of 512)
    y2 = custom_resnn_forward(x, packed, tile_cap=512)
    y2 = jax.block_until_ready(y2)
    assert jnp.allclose(y2, y_ref, atol=1e-4, rtol=1e-4), "mismatch vs reference (multi-tile)"

    print("KERNEL_OK")
</pallas_src>

<mosaic_0001>
module attributes {stable_mosaic.version = 11 : i64} {
  func.func @resnn_kernel(%arg0: i32, %arg1: memref<3x1024xf32, #tpu.memory_space<vmem>>, %arg2: memref<30x3xf32, #tpu.memory_space<vmem>>, %arg3: memref<30x1xf32, #tpu.memory_space<vmem>>, %arg4: memref<4x30x30xf32, #tpu.memory_space<vmem>>, %arg5: memref<4x30x1xf32, #tpu.memory_space<vmem>>, %arg6: memref<4x30x1xf32, #tpu.memory_space<vmem>>, %arg7: memref<4x30x1xf32, #tpu.memory_space<vmem>>, %arg8: memref<15x30xf32, #tpu.memory_space<vmem>>, %arg9: memref<15x1xf32, #tpu.memory_space<vmem>>, %arg10: memref<15x1024xf32, #tpu.memory_space<vmem>>) attributes {dimension_semantics = [#tpu.dimension_semantics<parallel>], iteration_bounds = array<i64: 1>, scalar_prefetch = 0 : i64, scratch_operands = 0 : i64, tpu.core_type = #tpu.core_type<tc>, window_params = [{transform_indices = @transform_0, window_bounds = array<i64: 3, 1024>}, {pipeline_mode = #tpu.pipeline_mode<synchronous>, transform_indices = @transform_1, window_bounds = array<i64: 30, 3>}, {pipeline_mode = #tpu.pipeline_mode<synchronous>, transform_indices = @transform_2, window_bounds = array<i64: 30, 1>}, {pipeline_mode = #tpu.pipeline_mode<synchronous>, transform_indices = @transform_3, window_bounds = array<i64: 4, 30, 30>}, {pipeline_mode = #tpu.pipeline_mode<synchronous>, transform_indices = @transform_4, window_bounds = array<i64: 4, 30, 1>}, {pipeline_mode = #tpu.pipeline_mode<synchronous>, transform_indices = @transform_5, window_bounds = array<i64: 4, 30, 1>}, {pipeline_mode = #tpu.pipeline_mode<synchronous>, transform_indices = @transform_6, window_bounds = array<i64: 4, 30, 1>}, {pipeline_mode = #tpu.pipeline_mode<synchronous>, transform_indices = @transform_7, window_bounds = array<i64: 15, 30>}, {pipeline_mode = #tpu.pipeline_mode<synchronous>, transform_indices = @transform_8, window_bounds = array<i64: 15, 1>}, {transform_indices = @transform_9, window_bounds = array<i64: 15, 1024>}]} {
    %c0 = arith.constant 0 : index
    %c0_0 = arith.constant 0 : index
    %0 = vector.load %arg2[%c0, %c0_0] : memref<30x3xf32, #tpu.memory_space<vmem>>, vector<30x3xf32>
    %c0_1 = arith.constant 0 : index
    %c0_2 = arith.constant 0 : index
    %1 = vector.load %arg1[%c0_1, %c0_2] : memref<3x1024xf32, #tpu.memory_space<vmem>>, vector<3x1024xf32>
    %cst = arith.constant dense<0.000000e+00> : vector<30x1024xf32>
    %2 = tpu.matmul %0, %1, %cst {dimension_numbers = #tpu.dot_dimension_numbers<[1], [0], [0], [1], [0, 0, 1, 1], [], []>} : vector<30x3xf32>, vector<3x1024xf32>, vector<30x1024xf32> -> vector<30x1024xf32>
    %c0_3 = arith.constant 0 : index
    %c0_4 = arith.constant 0 : index
    %3 = vector.load %arg3[%c0_3, %c0_4] : memref<30x1xf32, #tpu.memory_space<vmem>>, vector<30x1xf32>
    %4 = vector.broadcast %3 : vector<30x1xf32> to vector<30x1024xf32>
    %5 = arith.addf %2, %4 : vector<30x1024xf32>
    %cst_5 = arith.constant 0.000000e+00 : f32
    %6 = vector.broadcast %cst_5 : f32 to vector<30x1024xf32>
    %7 = arith.maximumf %5, %6 : vector<30x1024xf32>
    %c0_6 = arith.constant 0 : index
    %c0_7 = arith.constant 0 : index
    %c0_8 = arith.constant 0 : index
    %8 = vector.load %arg4[%c0_6, %c0_7, %c0_8] : memref<4x30x30xf32, #tpu.memory_space<vmem>>, vector<1x30x30xf32>
    %9 = vector.shape_cast %8 : vector<1x30x30xf32> to vector<30x30xf32>
    %cst_9 = arith.constant dense<0.000000e+00> : vector<30x1024xf32>
    %10 = tpu.matmul %9, %7, %cst_9 {dimension_numbers = #tpu.dot_dimension_numbers<[1], [0], [0], [1], [0, 0, 1, 1], [], []>} : vector<30x30xf32>, vector<30x1024xf32>, vector<30x1024xf32> -> vector<30x1024xf32>
    %c0_10 = arith.constant 0 : index
    %c0_11 = arith.constant 0 : index
    %c0_12 = arith.constant 0 : index
    %11 = vector.load %arg5[%c0_10, %c0_11, %c0_12] : memref<4x30x1xf32, #tpu.memory_space<vmem>>, vector<1x30x1xf32>
    %12 = vector.shape_cast %11 : vector<1x30x1xf32> to vector<30x1xf32>
    %13 = vector.broadcast %12 : vector<30x1xf32> to vector<30x1024xf32>
    %14 = arith.addf %10, %13 : vector<30x1024xf32>
    %15 = arith.mulf %14, %14 : vector<30x1024xf32>
    %cst_13 = arith.constant dense<0.000000e+00> : vector<1024xf32>
    %16 = vector.multi_reduction <add>, %15, %cst_13 [0] : vector<30x1024xf32> to vector<1024xf32>
    %17 = vector.shape_cast %16 : vector<1024xf32> to vector<1x1024xf32>
    %cst_14 = arith.constant 3.000000e+01 : f32
    %18 = vector.broadcast %cst_14 : f32 to vector<1x1024xf32>
    %19 = arith.divf %17, %18 : vector<1x1024xf32>
    %cst_15 = arith.constant 9.99999974E-6 : f32
    %20 = vector.broadcast %cst_15 : f32 to vector<1x1024xf32>
    %21 = arith.addf %19, %20 : vector<1x1024xf32>
    %22 = math.rsqrt %21 : vector<1x1024xf32>
    %23 = vector.broadcast %22 : vector<1x1024xf32> to vector<30x1024xf32>
    %24 = arith.mulf %14, %23 : vector<30x1024xf32>
    %c0_16 = arith.constant 0 : index
    %c0_17 = arith.constant 0 : index
    %c0_18 = arith.constant 0 : index
    %25 = vector.load %arg6[%c0_16, %c0_17, %c0_18] : memref<4x30x1xf32, #tpu.memory_space<vmem>>, vector<1x30x1xf32>
    %26 = vector.shape_cast %25 : vector<1x30x1xf32> to vector<30x1xf32>
    %27 = vector.broadcast %26 : vector<30x1xf32> to vector<30x1024xf32>
    %28 = arith.mulf %24, %27 : vector<30x1024xf32>
    %c0_19 = arith.constant 0 : index
    %c0_20 = arith.constant 0 : index
    %c0_21 = arith.constant 0 : index
    %29 = vector.load %arg7[%c0_19, %c0_20, %c0_21] : memref<4x30x1xf32, #tpu.memory_space<vmem>>, vector<1x30x1xf32>
    %30 = vector.shape_cast %29 : vector<1x30x1xf32> to vector<30x1xf32>
    %31 = vector.broadcast %30 : vector<30x1xf32> to vector<30x1024xf32>
    %32 = arith.addf %28, %31 : vector<30x1024xf32>
    %cst_22 = arith.constant 0.000000e+00 : f32
    %33 = vector.broadcast %cst_22 : f32 to vector<30x1024xf32>
    %34 = arith.maximumf %32, %33 : vector<30x1024xf32>
    %c1 = arith.constant 1 : index
    %c0_23 = arith.constant 0 : index
    %c0_24 = arith.constant 0 : index
    %35 = vector.load %arg4[%c1, %c0_23, %c0_24] : memref<4x30x30xf32, #tpu.memory_space<vmem>>, vector<1x30x30xf32>
    %36 = vector.shape_cast %35 : vector<1x30x30xf32> to vector<30x30xf32>
    %cst_25 = arith.constant dense<0.000000e+00> : vector<30x1024xf32>
    %37 = tpu.matmul %36, %34, %cst_25 {dimension_numbers = #tpu.dot_dimension_numbers<[1], [0], [0], [1], [0, 0, 1, 1], [], []>} : vector<30x30xf32>, vector<30x1024xf32>, vector<30x1024xf32> -> vector<30x1024xf32>
    %c1_26 = arith.constant 1 : index
    %c0_27 = arith.constant 0 : index
    %c0_28 = arith.constant 0 : index
    %38 = vector.load %arg5[%c1_26, %c0_27, %c0_28] : memref<4x30x1xf32, #tpu.memory_space<vmem>>, vector<1x30x1xf32>
    %39 = vector.shape_cast %38 : vector<1x30x1xf32> to vector<30x1xf32>
    %40 = vector.broadcast %39 : vector<30x1xf32> to vector<30x1024xf32>
    %41 = arith.addf %37, %40 : vector<30x1024xf32>
    %42 = arith.mulf %41, %41 : vector<30x1024xf32>
    %cst_29 = arith.constant dense<0.000000e+00> : vector<1024xf32>
    %43 = vector.multi_reduction <add>, %42, %cst_29 [0] : vector<30x1024xf32> to vector<1024xf32>
    %44 = vector.shape_cast %43 : vector<1024xf32> to vector<1x1024xf32>
    %cst_30 = arith.constant 3.000000e+01 : f32
    %45 = vector.broadcast %cst_30 : f32 to vector<1x1024xf32>
    %46 = arith.divf %44, %45 : vector<1x1024xf32>
    %cst_31 = arith.constant 9.99999974E-6 : f32
    %47 = vector.broadcast %cst_31 : f32 to vector<1x1024xf32>
    %48 = arith.addf %46, %47 : vector<1x1024xf32>
    %49 = math.rsqrt %48 : vector<1x1024xf32>
    %50 = vector.broadcast %49 : vector<1x1024xf32> to vector<30x1024xf32>
    %51 = arith.mulf %41, %50 : vector<30x1024xf32>
    %c1_32 = arith.constant 1 : index
    %c0_33 = arith.constant 0 : index
    %c0_34 = arith.constant 0 : index
    %52 = vector.load %arg6[%c1_32, %c0_33, %c0_34] : memref<4x30x1xf32, #tpu.memory_space<vmem>>, vector<1x30x1xf32>
    %53 = vector.shape_cast %52 : vector<1x30x1xf32> to vector<30x1xf32>
    %54 = vector.broadcast %53 : vector<30x1xf32> to vector<30x1024xf32>
    %55 = arith.mulf %51, %54 : vector<30x1024xf32>
    %c1_35 = arith.constant 1 : index
    %c0_36 = arith.constant 0 : index
    %c0_37 = arith.constant 0 : index
    %56 = vector.load %arg7[%c1_35, %c0_36, %c0_37] : memref<4x30x1xf32, #tpu.memory_space<vmem>>, vector<1x30x1xf32>
    %57 = vector.shape_cast %56 : vector<1x30x1xf32> to vector<30x1xf32>
    %58 = vector.broadcast %57 : vector<30x1xf32> to vector<30x1024xf32>
    %59 = arith.addf %55, %58 : vector<30x1024xf32>
    %cst_38 = arith.constant 0.000000e+00 : f32
    %60 = vector.broadcast %cst_38 : f32 to vector<30x1024xf32>
    %61 = arith.maximumf %59, %60 : vector<30x1024xf32>
    %62 = arith.addf %7, %61 : vector<30x1024xf32>
    %c2 = arith.constant 2 : index
    %c0_39 = arith.constant 0 : index
    %c0_40 = arith.constant 0 : index
    %63 = vector.load %arg4[%c2, %c0_39, %c0_40] : memref<4x30x30xf32, #tpu.memory_space<vmem>>, vector<1x30x30xf32>
    %64 = vector.shape_cast %63 : vector<1x30x30xf32> to vector<30x30xf32>
    %cst_41 = arith.constant dense<0.000000e+00> : vector<30x1024xf32>
    %65 = tpu.matmul %64, %62, %cst_41 {dimension_numbers = #tpu.dot_dimension_numbers<[1], [0], [0], [1], [0, 0, 1, 1], [], []>} : vector<30x30xf32>, vector<30x1024xf32>, vector<30x1024xf32> -> vector<30x1024xf32>
    %c2_42 = arith.constant 2 : index
    %c0_43 = arith.constant 0 : index
    %c0_44 = arith.constant 0 : index
    %66 = vector.load %arg5[%c2_42, %c0_43, %c0_44] : memref<4x30x1xf32, #tpu.memory_space<vmem>>, vector<1x30x1xf32>
    %67 = vector.shape_cast %66 : vector<1x30x1xf32> to vector<30x1xf32>
    %68 = vector.broadcast %67 : vector<30x1xf32> to vector<30x1024xf32>
    %69 = arith.addf %65, %68 : vector<30x1024xf32>
    %70 = arith.mulf %69, %69 : vector<30x1024xf32>
    %cst_45 = arith.constant dense<0.000000e+00> : vector<1024xf32>
    %71 = vector.multi_reduction <add>, %70, %cst_45 [0] : vector<30x1024xf32> to vector<1024xf32>
    %72 = vector.shape_cast %71 : vector<1024xf32> to vector<1x1024xf32>
    %cst_46 = arith.constant 3.000000e+01 : f32
    %73 = vector.broadcast %cst_46 : f32 to vector<1x1024xf32>
    %74 = arith.divf %72, %73 : vector<1x1024xf32>
    %cst_47 = arith.constant 9.99999974E-6 : f32
    %75 = vector.broadcast %cst_47 : f32 to vector<1x1024xf32>
    %76 = arith.addf %74, %75 : vector<1x1024xf32>
    %77 = math.rsqrt %76 : vector<1x1024xf32>
    %78 = vector.broadcast %77 : vector<1x1024xf32> to vector<30x1024xf32>
    %79 = arith.mulf %69, %78 : vector<30x1024xf32>
    %c2_48 = arith.constant 2 : index
    %c0_49 = arith.constant 0 : index
    %c0_50 = arith.constant 0 : index
    %80 = vector.load %arg6[%c2_48, %c0_49, %c0_50] : memref<4x30x1xf32, #tpu.memory_space<vmem>>, vector<1x30x1xf32>
    %81 = vector.shape_cast %80 : vector<1x30x1xf32> to vector<30x1xf32>
    %82 = vector.broadcast %81 : vector<30x1xf32> to vector<30x1024xf32>
    %83 = arith.mulf %79, %82 : vector<30x1024xf32>
    %c2_51 = arith.constant 2 : index
    %c0_52 = arith.constant 0 : index
    %c0_53 = arith.constant 0 : index
    %84 = vector.load %arg7[%c2_51, %c0_52, %c0_53] : memref<4x30x1xf32, #tpu.memory_space<vmem>>, vector<1x30x1xf32>
    %85 = vector.shape_cast %84 : vector<1x30x1xf32> to vector<30x1xf32>
    %86 = vector.broadcast %85 : vector<30x1xf32> to vector<30x1024xf32>
    %87 = arith.addf %83, %86 : vector<30x1024xf32>
    %cst_54 = arith.constant 0.000000e+00 : f32
    %88 = vector.broadcast %cst_54 : f32 to vector<30x1024xf32>
    %89 = arith.maximumf %87, %88 : vector<30x1024xf32>
    %c3 = arith.constant 3 : index
    %c0_55 = arith.constant 0 : index
    %c0_56 = arith.constant 0 : index
    %90 = vector.load %arg4[%c3, %c0_55, %c0_56] : memref<4x30x30xf32, #tpu.memory_space<vmem>>, vector<1x30x30xf32>
    %91 = vector.shape_cast %90 : vector<1x30x30xf32> to vector<30x30xf32>
    %cst_57 = arith.constant dense<0.000000e+00> : vector<30x1024xf32>
    %92 = tpu.matmul %91, %89, %cst_57 {dimension_numbers = #tpu.dot_dimension_numbers<[1], [0], [0], [1], [0, 0, 1, 1], [], []>} : vector<30x30xf32>, vector<30x1024xf32>, vector<30x1024xf32> -> vector<30x1024xf32>
    %c3_58 = arith.constant 3 : index
    %c0_59 = arith.constant 0 : index
    %c0_60 = arith.constant 0 : index
    %93 = vector.load %arg5[%c3_58, %c0_59, %c0_60] : memref<4x30x1xf32, #tpu.memory_space<vmem>>, vector<1x30x1xf32>
    %94 = vector.shape_cast %93 : vector<1x30x1xf32> to vector<30x1xf32>
    %95 = vector.broadcast %94 : vector<30x1xf32> to vector<30x1024xf32>
    %96 = arith.addf %92, %95 : vector<30x1024xf32>
    %97 = arith.mulf %96, %96 : vector<30x1024xf32>
    %cst_61 = arith.constant dense<0.000000e+00> : vector<1024xf32>
    %98 = vector.multi_reduction <add>, %97, %cst_61 [0] : vector<30x1024xf32> to vector<1024xf32>
    %99 = vector.shape_cast %98 : vector<1024xf32> to vector<1x1024xf32>
    %cst_62 = arith.constant 3.000000e+01 : f32
    %100 = vector.broadcast %cst_62 : f32 to vector<1x1024xf32>
    %101 = arith.divf %99, %100 : vector<1x1024xf32>
    %cst_63 = arith.constant 9.99999974E-6 : f32
    %102 = vector.broadcast %cst_63 : f32 to vector<1x1024xf32>
    %103 = arith.addf %101, %102 : vector<1x1024xf32>
    %104 = math.rsqrt %103 : vector<1x1024xf32>
    %105 = vector.broadcast %104 : vector<1x1024xf32> to vector<30x1024xf32>
    %106 = arith.mulf %96, %105 : vector<30x1024xf32>
    %c3_64 = arith.constant 3 : index
    %c0_65 = arith.constant 0 : index
    %c0_66 = arith.constant 0 : index
    %107 = vector.load %arg6[%c3_64, %c0_65, %c0_66] : memref<4x30x1xf32, #tpu.memory_space<vmem>>, vector<1x30x1xf32>
    %108 = vector.shape_cast %107 : vector<1x30x1xf32> to vector<30x1xf32>
    %109 = vector.broadcast %108 : vector<30x1xf32> to vector<30x1024xf32>
    %110 = arith.mulf %106, %109 : vector<30x1024xf32>
    %c3_67 = arith.constant 3 : index
    %c0_68 = arith.constant 0 : index
    %c0_69 = arith.constant 0 : index
    %111 = vector.load %arg7[%c3_67, %c0_68, %c0_69] : memref<4x30x1xf32, #tpu.memory_space<vmem>>, vector<1x30x1xf32>
    %112 = vector.shape_cast %111 : vector<1x30x1xf32> to vector<30x1xf32>
    %113 = vector.broadcast %112 : vector<30x1xf32> to vector<30x1024xf32>
    %114 = arith.addf %110, %113 : vector<30x1024xf32>
    %cst_70 = arith.constant 0.000000e+00 : f32
    %115 = vector.broadcast %cst_70 : f32 to vector<30x1024xf32>
    %116 = arith.maximumf %114, %115 : vector<30x1024xf32>
    %117 = arith.addf %62, %116 : vector<30x1024xf32>
    %c0_71 = arith.constant 0 : index
    %c0_72 = arith.constant 0 : index
    %118 = vector.load %arg8[%c0_71, %c0_72] : memref<15x30xf32, #tpu.memory_space<vmem>>, vector<15x30xf32>
    %cst_73 = arith.constant dense<0.000000e+00> : vector<15x1024xf32>
    %119 = tpu.matmul %118, %117, %cst_73 {dimension_numbers = #tpu.dot_dimension_numbers<[1], [0], [0], [1], [0, 0, 1, 1], [], []>} : vector<15x30xf32>, vector<30x1024xf32>, vector<15x1024xf32> -> vector<15x1024xf32>
    %c0_74 = arith.constant 0 : index
    %c0_75 = arith.constant 0 : index
    %120 = vector.load %arg9[%c0_74, %c0_75] : memref<15x1xf32, #tpu.memory_space<vmem>>, vector<15x1xf32>
    %121 = vector.broadcast %120 : vector<15x1xf32> to vector<15x1024xf32>
    %122 = arith.addf %119, %121 : vector<15x1024xf32>
    %c0_76 = arith.constant 0 : index
    %c0_77 = arith.constant 0 : index
    %123 = vector.load %arg10[%c0_76, %c0_77] : memref<15x1024xf32, #tpu.memory_space<vmem>>, vector<15x1024xf32>
    tpu.vector_store %arg10[%c0_76, %c0_77], %122 {strides = array<i32>} : memref<15x1024xf32, #tpu.memory_space<vmem>>, vector<15x1024xf32>,
    return
  }
  func.func @transform_0(%arg0: i32) -> (i32, i32) {
    %c0_i32 = arith.constant 0 : i32
    %c0_i32_0 = arith.constant 0 : i32
    return %c0_i32, %arg0 : i32, i32
  }
  func.func @transform_1(%arg0: i32) -> (i32, i32) {
    %c0_i32 = arith.constant 0 : i32
    %c0_i32_0 = arith.constant 0 : i32
    %c0_i32_1 = arith.constant 0 : i32
    return %c0_i32, %c0_i32_0 : i32, i32
  }
  func.func @transform_2(%arg0: i32) -> (i32, i32) {
    %c0_i32 = arith.constant 0 : i32
    %c0_i32_0 = arith.constant 0 : i32
    %c0_i32_1 = arith.constant 0 : i32
    return %c0_i32, %c0_i32_0 : i32, i32
  }
  func.func @transform_3(%arg0: i32) -> (i32, i32, i32) {
    %c0_i32 = arith.constant 0 : i32
    %c0_i32_0 = arith.constant 0 : i32
    %c0_i32_1 = arith.constant 0 : i32
    %c0_i32_2 = arith.constant 0 : i32
    return %c0_i32, %c0_i32_0, %c0_i32_1 : i32, i32, i32
  }
  func.func @transform_4(%arg0: i32) -> (i32, i32, i32) {
    %c0_i32 = arith.constant 0 : i32
    %c0_i32_0 = arith.constant 0 : i32
    %c0_i32_1 = arith.constant 0 : i32
    %c0_i32_2 = arith.constant 0 : i32
    return %c0_i32, %c0_i32_0, %c0_i32_1 : i32, i32, i32
  }
  func.func @transform_5(%arg0: i32) -> (i32, i32, i32) {
    %c0_i32 = arith.constant 0 : i32
    %c0_i32_0 = arith.constant 0 : i32
    %c0_i32_1 = arith.constant 0 : i32
    %c0_i32_2 = arith.constant 0 : i32
    return %c0_i32, %c0_i32_0, %c0_i32_1 : i32, i32, i32
  }
  func.func @transform_6(%arg0: i32) -> (i32, i32, i32) {
    %c0_i32 = arith.constant 0 : i32
    %c0_i32_0 = arith.constant 0 : i32
    %c0_i32_1 = arith.constant 0 : i32
    %c0_i32_2 = arith.constant 0 : i32
    return %c0_i32, %c0_i32_0, %c0_i32_1 : i32, i32, i32
  }
  func.func @transform_7(%arg0: i32) -> (i32, i32) {
    %c0_i32 = arith.constant 0 : i32
    %c0_i32_0 = arith.constant 0 : i32
    %c0_i32_1 = arith.constant 0 : i32
    return %c0_i32, %c0_i32_0 : i32, i32
  }
  func.func @transform_8(%arg0: i32) -> (i32, i32) {
    %c0_i32 = arith.constant 0 : i32
    %c0_i32_0 = arith.constant 0 : i32
    %c0_i32_1 = arith.constant 0 : i32
    return %c0_i32, %c0_i32_0 : i32, i32
  }
  func.func @transform_9(%arg0: i32) -> (i32, i32) {
    %c0_i32 = arith.constant 0 : i32
    %c0_i32_0 = arith.constant 0 : i32
    return %c0_i32, %arg0 : i32, i32
  }
}

</mosaic_0001>

<bundles_post_ra>
// kernel: tpu_custom_call.1
= control target key start
LH: loop header
LB: loop body
LE: loop exit
PB: predicated region body
PF: predicated region fallthrough
CT: control target
= control target key end

     0   :  { %v4163_v3 = vmov 0   ;;  %vm86_vm0 = vcmask 1042432   ;;  %v6538_v7 = vmov 0.0   ;;  %vm73_vm1 = vcmask 23552   ;;  %s6496_s0 = inlined_call_operand.vmem [shape: f32[3,1024], index: 0, kind: input, shape index: {}]   ;;  %s6497_s1 = inlined_call_operand.vmem [shape: f32[30,3], index: 1, kind: input, shape index: {}]   ;;  %s6498_s2 = inlined_call_operand.vmem [shape: f32[30,1], index: 2, kind: input, shape index: {}]   ;;  %s6499_s3 = inlined_call_operand.vmem [shape: f32[4,30,30], index: 3, kind: input, shape index: {}]   ;;  %s6500_s4 = inlined_call_operand.vmem [shape: f32[4,30,1], index: 4, kind: input, shape index: {}]   ;;  %s6501_s5 = inlined_call_operand.vmem [shape: f32[4,30,1], index: 5, kind: input, shape index: {}]   ;;  %s6502_s6 = inlined_call_operand.vmem [shape: f32[4,30,1], index: 6, kind: input, shape index: {}]   ;;  %s6503_s7 = inlined_call_operand.vmem [shape: f32[15,30], index: 7, kind: input, shape index: {}]   ;;  %s6504_s8 = inlined_call_operand.vmem [shape: f32[15,1], index: 8, kind: input, shape index: {}]   ;;  %s6505_s9 = inlined_call_operand.hbm [shape: f32[15,1024], index: 9, kind: output, shape index: {}]  }
   0x1   :  { %v44_v0 = vld [vmem:[%s6498_s2 + $0x18] sm:$0x3f]  ;;  %v42_v1 = vld [vmem:[%s6498_s2 + $0x8] sm:$0xff]  ;;  %v37_v2 = vld [vmem:[%s6496_s0] sm:$0x77]  ;;  %4072 = vset.pattern.permute.xlu1 %v4163_v3  ;;  %4071 = vset.pattern.permute.xlu0 %v4163_v3 }
   0x2   :  { %v69_v4 = vcombine.high %v37_v2, %v37_v2  ;;  %v38_v5 = vld [vmem:[%s6496_s0 + $0x8] sm:$0x77]  ;;  %62 = vperm.xlu0 %4071, %v44_v0   ;;  %52 = vperm.xlu1 %4072, %v42_v1   ;;  %v33_v8 = vld [vmem:[%s6497_s1] sm:$0xff]  ;;  %v43_v9 = vld [vmem:[%s6498_s2 + $0x10] sm:$0xff] }
   0x3   :  { %v70_v6 = vcombine.high %v38_v5, %v38_v5  ;;  %167 = vmatprep.mubr.f32.mxu0 %v6538_v7  ;;  %v41_v10 = vld [vmem:[%s6498_s2] sm:$0xff]  ;;  %v39_v11 = vld [vmem:[%s6496_s0 + $0x10] sm:$0x77]  ;;  %v40_v12 = vld [vmem:[%s6496_s0 + $0x18] sm:$0x77]  ;;  %256 = vmatprep.mubr.f32.mxu1 %v6538_v7 }
   0x4   :  { %3882 = vmatprep.subr.msk.mxu0 %vm86_vm0, %v69_v4  ;;  %v71_v13 = vcombine.high %v39_v11, %v39_v11  ;;  %v72_v14 = vcombine.high %v40_v12, %v40_v12  ;;  %v34_v15 = vld [vmem:[%s6497_s1 + $0x8] sm:$0xff]  ;;  %v495_v16 = vld [vmem:[%s6500_s4] sm:$0xff]  ;;  %v35_v18 = vld [vmem:[%s6497_s1 + $0x10] sm:$0xff] }
   0x5   :  { %3888 = vmatprep.subr.msk.mxu1 %vm86_vm0, %v70_v6  ;;  %3883 = vmatpush1.msk.msra.mxu0 %vm86_vm0, %v37_v2  ;;  %v496_v17 = vld [vmem:[%s6500_s4 + $0x8] sm:$0xff]  ;;  %v497_v19 = vld [vmem:[%s6500_s4 + $0x10] sm:$0xff]  ;;  %v498_v20 = vld [vmem:[%s6500_s4 + $0x18] sm:$0x3f] }
   0x6   :  { %3889 = vmatpush1.msk.msra.mxu1 %vm86_vm0, %v38_v5  ;;  %3884 = vmatmul.mubr.msk.f32.vlgmr.msra.gmra.mxu0 %vm73_vm1, %v33_v8  ;;  %v36_v21 = vld [vmem:[%s6497_s1 + $0x18] sm:$0x3f]  ;;  %v1084_v23 = vld [vmem:[%s6501_s5 + $0x10] sm:$0xff]  ;;  %v1083_v25 = vld [vmem:[%s6501_s5 + $0x8] sm:$0xff] }
   0x7   :  { %3890 = vmatmul.mubr.msk.f32.vlgmr.msra.gmra.mxu1 %vm73_vm1, %v33_v8  ;;  %57 = vperm.xlu0 %4071, %v43_v9   ;;  %v1085_v22 = vld [vmem:[%s6501_s5 + $0x18] sm:$0x3f] }
   0x8   :  { %47 = vperm.xlu1 %4072, %v41_v10   ;;  %173 = vmatprep.mubr.f32.mxu0 %v6538_v7  ;;  %v1141_v24 = vld [vmem:[%s6502_s6 + $0x18] sm:$0x3f] }
   0x9   :  { %262 = vmatprep.mubr.f32.mxu1 %v6538_v7  ;;  %3894 = vmatprep.subr.msk.mxu0 %vm86_vm0, %v71_v13 }
   0xa   :  { %3900 = vmatprep.subr.msk.mxu1 %vm86_vm0, %v72_v14  ;;  %3885 = vmatmul.mubr.msk.f32.gmra.mxu0 %vm73_vm1, %v34_v15 }
   0xb   :  { %3891 = vmatmul.mubr.msk.f32.gmra.mxu1 %vm73_vm1, %v34_v15  ;;  %501 = vperm.xlu0 %4071, %v495_v16  }
   0xc   :  { %506 = vperm.xlu1 %4072, %v496_v17   ;;  %179 = vmatprep.mubr.f32.mxu0 %v6538_v7 }
   0xd   :  { %268 = vmatprep.mubr.f32.mxu1 %v6538_v7  ;;  %3895 = vmatpush1.msk.msra.mxu0 %vm86_vm0, %v39_v11 }
   0xe   :  { %3901 = vmatpush1.msk.msra.mxu1 %vm86_vm0, %v40_v12  ;;  %3886 = vmatmul.mubr.msk.f32.gmra.mxu0 %vm73_vm1, %v35_v18 }
   0xf   :  { %3892 = vmatmul.mubr.msk.f32.gmra.mxu1 %vm73_vm1, %v35_v18  ;;  %511 = vperm.xlu0 %4071, %v497_v19  }
  0x10   :  { %516 = vperm.xlu1 %4072, %v498_v20   ;;  %185 = vmatprep.mubr.f32.mxu0 %v6538_v7 }
  0x11   :  { %274 = vmatprep.mubr.f32.mxu1 %v6538_v7 }
  0x12   :  { %3887 = vmatmul.mubr.msk.f32.gmra.mxu0 %vm73_vm1, %v36_v21 }
  0x13   :  { %3893 = vmatmul.mubr.msk.f32.gmra.mxu1 %vm73_vm1, %v36_v21  ;;  %1103 = vperm.xlu0 %4071, %v1085_v22  }
  0x14   :  { %1098 = vperm.xlu1 %4072, %v1084_v23   ;;  %345 = vmatprep.mubr.f32.mxu0 %v6538_v7 }
  0x15   :  { %434 = vmatprep.mubr.f32.mxu1 %v6538_v7 }
  0x16   :  { %14 = vsyncpa [#allocation3], 0  ;;  %3896 = vmatmul.mubr.msk.f32.vlgmr.msra.gmra.mxu0 %vm73_vm1, %v33_v8  ;;  %v1140_v26 = vld [vmem:[%s6502_s6 + $0x10] sm:$0xff]  ;;  %v1082_v27 = vld [vmem:[%s6501_s5] sm:$0xff]  ;;  %vm532_vm2 = vcmask 1045504   ;;  %vm519_vm3 = vcmask 244736  }
  0x17   :  { %3902 = vmatmul.mubr.msk.f32.vlgmr.msra.gmra.mxu1 %vm73_vm1, %v33_v8  ;;  %1159 = vperm.xlu0 %4071, %v1141_v24   ;;  %v1139_v28 = vld [vmem:[%s6502_s6 + $0x8] sm:$0xff]  ;;  %v1138_v29 = vld [vmem:[%s6502_s6] sm:$0xff]  ;;  %v3936_v32 = vld [vmem:[%s6500_s4 + $0x30] sm:$0xff] }
  0x18   :  { %1093 = vperm.xlu1 %4072, %v1083_v25   ;;  %351 = vmatprep.mubr.f32.mxu0 %v6538_v7  ;;  %v3934_v30 = vld [vmem:[%s6500_s4 + $0x20] sm:$0xff]  ;;  %v3935_v31 = vld [vmem:[%s6500_s4 + $0x28] sm:$0xff]  ;;  %v3937_v33 = vld [vmem:[%s6500_s4 + $0x38] sm:$0x3f] }
  0x19   :  { %440 = vmatprep.mubr.f32.mxu1 %v6538_v7  ;;  %v3965_v34 = vld [vmem:[%s6501_s5 + $0x38] sm:$0x3f]  ;;  %v3964_v35 = vld [vmem:[%s6501_s5 + $0x30] sm:$0xff]  ;;  %v3963_v37 = vld [vmem:[%s6501_s5 + $0x28] sm:$0xff] }
  0x1a   :  { %3897 = vmatmul.mubr.msk.f32.gmra.mxu0 %vm73_vm1, %v34_v15  ;;  %v3969_v36 = vld [vmem:[%s6502_s6 + $0x38] sm:$0x3f]  ;;  %v3968_v38 = vld [vmem:[%s6502_s6 + $0x30] sm:$0xff]  ;;  %v3962_v39 = vld [vmem:[%s6501_s5 + $0x20] sm:$0xff] }
  0x1b   :  { %3903 = vmatmul.mubr.msk.f32.gmra.mxu1 %vm73_vm1, %v34_v15  ;;  %1154 = vperm.xlu0 %4071, %v1140_v26   ;;  %v3967_v40 = vld [vmem:[%s6502_s6 + $0x28] sm:$0xff]  ;;  %v3966_v41 = vld [vmem:[%s6502_s6 + $0x20] sm:$0xff]  ;;  %v3976_v44 = vld [vmem:[%s6500_s4 + $0x50] sm:$0xff] }
  0x1c   :  { %1088 = vperm.xlu1 %4072, %v1082_v27   ;;  %357 = vmatprep.mubr.f32.mxu0 %v6538_v7  ;;  %v3974_v42 = vld [vmem:[%s6500_s4 + $0x40] sm:$0xff]  ;;  %v3975_v43 = vld [vmem:[%s6500_s4 + $0x48] sm:$0xff]  ;;  %v3977_v45 = vld [vmem:[%s6500_s4 + $0x58] sm:$0x3f] }
  0x1d   :  { %446 = vmatprep.mubr.f32.mxu1 %v6538_v7  ;;  %v4005_v46 = vld [vmem:[%s6501_s5 + $0x58] sm:$0x3f]  ;;  %v4004_v47 = vld [vmem:[%s6501_s5 + $0x50] sm:$0xff]  ;;  %v4003_v49 = vld [vmem:[%s6501_s5 + $0x48] sm:$0xff] }
  0x1e   :  { %3898 = vmatmul.mubr.msk.f32.gmra.mxu0 %vm73_vm1, %v35_v18  ;;  %v4009_v48 = vld [vmem:[%s6502_s6 + $0x58] sm:$0x3f]  ;;  %v4008_v50 = vld [vmem:[%s6502_s6 + $0x50] sm:$0xff]  ;;  %v4002_v51 = vld [vmem:[%s6501_s5 + $0x40] sm:$0xff] }
  0x1f   :  { %3904 = vmatmul.mubr.msk.f32.gmra.mxu1 %vm73_vm1, %v35_v18  ;;  %1149 = vperm.xlu0 %4071, %v1139_v28   ;;  %v4007_v52 = vld [vmem:[%s6502_s6 + $0x48] sm:$0xff]  ;;  %v4006_v53 = vld [vmem:[%s6502_s6 + $0x40] sm:$0xff]  ;;  %v4016_v56 = vld [vmem:[%s6500_s4 + $0x70] sm:$0xff] }
  0x20   :  { %1144 = vperm.xlu1 %4072, %v1138_v29   ;;  %363 = vmatprep.mubr.f32.mxu0 %v6538_v7  ;;  %v4014_v54 = vld [vmem:[%s6500_s4 + $0x60] sm:$0xff]  ;;  %v4015_v55 = vld [vmem:[%s6500_s4 + $0x68] sm:$0xff]  ;;  %v4017_v57 = vld [vmem:[%s6500_s4 + $0x78] sm:$0x3f] }
  0x21   :  { %452 = vmatprep.mubr.f32.mxu1 %v6538_v7  ;;  %v4045_v58 = vld [vmem:[%s6501_s5 + $0x78] sm:$0x3f]  ;;  %v4044_v59 = vld [vmem:[%s6501_s5 + $0x70] sm:$0xff]  ;;  %v4043_v61 = vld [vmem:[%s6501_s5 + $0x68] sm:$0xff] }
  0x22   :  { %3899 = vmatmul.mubr.msk.f32.gmra.mxu0 %vm73_vm1, %v36_v21  ;;  %v4049_v60 = vld [vmem:[%s6502_s6 + $0x78] sm:$0x3f]  ;;  %v4048_v62 = vld [vmem:[%s6502_s6 + $0x70] sm:$0xff]  ;;  %v4042_v63 = vld [vmem:[%s6501_s5 + $0x60] sm:$0xff] }
  0x23   :  { %3905 = vmatmul.mubr.msk.f32.gmra.mxu1 %vm73_vm1, %v36_v21  ;;  %1238 = vperm.xlu0 %4071, %v3934_v30   ;;  %v4047_v0 = vld [vmem:[%s6502_s6 + $0x68] sm:$0xff]  ;;  %v4046_v1 = vld [vmem:[%s6502_s6 + $0x60] sm:$0xff] }
  0x24   :  { %1243 = vperm.xlu1 %4072, %v3935_v31   ;;  %621 = vmatprep.mubr.f32.mxu0 %v6538_v7  ;;  %v3500_v2 = vld [vmem:[%s6504_s8] sm:$0xff]  ;;  %v3501_v3 = vld [vmem:[%s6504_s8 + $0x8] sm:$0x7f] }
  0x25   :  { %710 = vmatprep.mubr.f32.mxu1 %v6538_v7 }
  0x27   :  { %1248 = vperm.xlu0 %4071, %v3936_v32  }
  0x28   :  { %1253 = vperm.xlu1 %4072, %v3937_v33  }
  0x2b   :  { %1838 = vperm.xlu0 %4071, %v3965_v34  }
  0x2c   :  { %1833 = vperm.xlu1 %4072, %v3964_v35  }
  0x2f   :  { %1895 = vperm.xlu0 %4071, %v3969_v36  }
  0x30   :  { %1828 = vperm.xlu1 %4072, %v3963_v37  }
  0x33   :  { %1890 = vperm.xlu0 %4071, %v3968_v38  }
  0x34   :  { %1823 = vperm.xlu1 %4072, %v3962_v39  }
  0x37   :  { %1885 = vperm.xlu0 %4071, %v3967_v40  }
  0x38   :  { %1880 = vperm.xlu1 %4072, %v3966_v41  }
  0x3b   :  { %2006 = vperm.xlu0 %4071, %v3974_v42  }
  0x3c   :  { %2011 = vperm.xlu1 %4072, %v3975_v43  }
  0x3f   :  { %2016 = vperm.xlu0 %4071, %v3976_v44  }
  0x40   :  { %2021 = vperm.xlu1 %4072, %v3977_v45  }
  0x43   :  { %2606 = vperm.xlu0 %4071, %v4005_v46  }
  0x44   :  { %2601 = vperm.xlu1 %4072, %v4004_v47  }
  0x47   :  { %2663 = vperm.xlu0 %4071, %v4009_v48  }
  0x48   :  { %2596 = vperm.xlu1 %4072, %v4003_v49  }
  0x4b   :  { %2658 = vperm.xlu0 %4071, %v4008_v50  }
  0x4c   :  { %2591 = vperm.xlu1 %4072, %v4002_v51  }
  0x4f   :  { %2653 = vperm.xlu0 %4071, %v4007_v52  }
  0x50   :  { %2648 = vperm.xlu1 %4072, %v4006_v53  }
  0x53   :  { %2742 = vperm.xlu0 %4071, %v4014_v54  }
  0x54   :  { %2747 = vperm.xlu1 %4072, %v4015_v55  }
  0x57   :  { %2752 = vperm.xlu0 %4071, %v4016_v56  }
  0x58   :  { %2757 = vperm.xlu1 %4072, %v4017_v57  }
  0x5b   :  { %3342 = vperm.xlu0 %4071, %v4045_v58  }
  0x5c   :  { %3337 = vperm.xlu1 %4072, %v4044_v59  }
  0x5f   :  { %3399 = vperm.xlu0 %4071, %v4049_v60  }
  0x60   :  { %3332 = vperm.xlu1 %4072, %v4043_v61  }
  0x63   :  { %3394 = vperm.xlu0 %4071, %v4048_v62  }
  0x64   :  { %3327 = vperm.xlu1 %4072, %v4042_v63  }
  0x67   :  { %3389 = vperm.xlu0 %4071, %v4047_v0  }
  0x68   :  { %3384 = vperm.xlu1 %4072, %v4046_v1  }
  0x6b   :  { %3504 = vperm.xlu0 %4071, %v3500_v2  }
  0x6c   :  { %3509 = vperm.xlu1 %4072, %v3501_v3   ;;  %v4561_v3 = vld [vmem:[%s6499_s3] sm:$0xff] }
  0x7d   :  { %v4446_v13 = vpop.permute.xlu0 %62  ;;  %v4448_v18 = vpop.permute.xlu1 %52 }
  0x82   :  { %v4450_v21 = vpop.permute.xlu0 %57 }
  0x83   :  { %v4480_v34 = vpop.permute.xlu1 %47 }
  0xc6   :  { %v169_v4 = vpop.f32.mrf.mxu0 }
  0xc7   :  { %v258_v5 = vpop.f32.mrf.mxu1  ;;  %v4517_v49 = vadd.f32 %v169_v4, %v4480_v34 }
  0xc8   :  { %v171_v6 = vpop.f32.mrf.mxu0  ;;  %v4520_v50 = vadd.f32 %v258_v5, %v4480_v34 }
  0xc9   :  { %v260_v8 = vpop.f32.mrf.mxu1  ;;  %v4503_v45 = vadd.f32 %v171_v6, %v4480_v34  ;;  %6611 = vst [vmem:[#allocation16_spill] sm:$0xff] %v4517_v49  ;;  %v6523_v63 = vmax.f32 %v4517_v49, 0.0 }
  0xca   :  { %v175_v9 = vpop.f32.mrf.mxu0  ;;  %v4506_v46 = vadd.f32 %v260_v8, %v4480_v34  ;;  %6612 = vst [vmem:[#allocation17_spill] sm:$0xff] %v4520_v50  ;;  %v6521_v0 = vmax.f32 %v4520_v50, 0.0 }
  0xcb   :  { %v264_v10 = vpop.f32.mrf.mxu1  ;;  %v4491_v39 = vadd.f32 %v175_v9, %v4448_v18  ;;  %6609 = vst [vmem:[#allocation14_spill] sm:$0xff] %v4503_v45  ;;  %v6525_v61 = vmax.f32 %v4503_v45, 0.0  ;;  %v4580_v9 = vld [vmem:[%s6499_s3 + $0x8] sm:$0xff] }
  0xcc   :  { %v177_v11 = vpop.f32.mrf.mxu0  ;;  %v4494_v40 = vadd.f32 %v264_v10, %v4448_v18  ;;  %6610 = vst [vmem:[#allocation15_spill] sm:$0xff] %v4506_v46  ;;  %v6524_v62 = vmax.f32 %v4506_v46, 0.0 }
  0xcd   :  { %v266_v12 = vpop.f32.mrf.mxu1  ;;  %v4483_v35 = vadd.f32 %v177_v11, %v4448_v18  ;;  %6607 = vst [vmem:[#allocation12_spill] sm:$0xff] %v4491_v39  ;;  %v6528_v57 = vmax.f32 %v4491_v39, 0.0 }
  0xce   :  { %v181_v14 = vpop.f32.mrf.mxu0  ;;  %v4486_v36 = vadd.f32 %v266_v12, %v4448_v18  ;;  %6608 = vst [vmem:[#allocation13_spill] sm:$0xff] %v4494_v40  ;;  %v6526_v58 = vmax.f32 %v4494_v40, 0.0 }
  0xcf   :  { %v270_v15 = vpop.f32.mrf.mxu1  ;;  %v4471_v30 = vadd.f32 %v181_v14, %v4450_v21  ;;  %6605 = vst [vmem:[#allocation10_spill] sm:$0xff] %v4483_v35  ;;  %v6529_v55 = vmax.f32 %v4483_v35, 0.0 }
  0xd0   :  { %v183_v16 = vpop.f32.mrf.mxu0  ;;  %v4474_v31 = vadd.f32 %v270_v15, %v4450_v21  ;;  %6606 = vst [vmem:[#allocation11_spill] sm:$0xff] %v4486_v36  ;;  %v6527_v56 = vmax.f32 %v4486_v36, 0.0 }
  0xd1   :  { %v272_v17 = vpop.f32.mrf.mxu1  ;;  %v4459_v26 = vadd.f32 %v183_v16, %v4450_v21  ;;  %6603 = vst [vmem:[#allocation8_spill] sm:$0xff] %v4471_v30  ;;  %v6532_v51 = vmax.f32 %v4471_v30, 0.0 }
  0xd2   :  { %v187_v19 = vpop.f32.mrf.mxu0  ;;  %v4462_v27 = vadd.f32 %v272_v17, %v4450_v21  ;;  %6604 = vst [vmem:[#allocation9_spill] sm:$0xff] %v4474_v31  ;;  %v6530_v52 = vmax.f32 %v4474_v31, 0.0 }
  0xd3   :  { %v276_v20 = vpop.f32.mrf.mxu1  ;;  %v4453_v22 = vadd.f32 %v187_v19, %v4446_v13  ;;  %6600 = vst [vmem:[#allocation5_spill] sm:$0xff] %v4459_v26  ;;  %v6533_v47 = vmax.f32 %v4459_v26, 0.0 }
  0xd4   :  { %v4456_v23 = vadd.f32 %v276_v20, %v4446_v13  ;;  %v189_v24 = vpop.f32.mrf.mxu0  ;;  %6601 = vst [vmem:[#allocation6_spill] sm:$0xff] %v4462_v27  ;;  %v6531_v48 = vmax.f32 %v4462_v27, 0.0 }
  0xd5   :  { %v278_v25 = vpop.f32.mrf.mxu1  ;;  %v4465_v28 = vadd.f32 %v189_v24, %v4446_v13  ;;  %v6537_v41 = vmax.f32 %v4453_v22, 0.0 }
  0xd6   :  { %v4468_v29 = vadd.f32 %v278_v25, %v4446_v13  ;;  %v4476_v32 = vpop.f32.mrf.mxu0  ;;  %v6536_v42 = vmax.f32 %v4456_v23, 0.0 }
  0xd7   :  { %v4478_v33 = vpop.f32.mrf.mxu1  ;;  %v6535_v37 = vmax.f32 %v4465_v28, 0.0 }
  0xd8   :  { %6602 = vst [vmem:[#allocation7_spill] sm:$0xff] %v4468_v29  ;;  %v6534_v38 = vmax.f32 %v4468_v29, 0.0  ;;  %v4498_v43 = vpop.f32.mrf.mxu0 }
  0xd9   :  { %v4500_v44 = vpop.f32.mrf.mxu1  ;;  %3906 = vmatprep.subr.msk.mxu0 %vm532_vm2, %v6535_v37 }
  0xda   :  { %3912 = vmatprep.subr.msk.mxu1 %vm532_vm2, %v6534_v38  ;;  %v4524_v53 = vpop.f32.mrf.mxu0  ;;  %3907 = vmatpush1.msk.msra.mxu0 %vm532_vm2, %v6537_v41 }
  0xdb   :  { %v4526_v54 = vpop.f32.mrf.mxu1  ;;  %3913 = vmatpush1.msk.msra.mxu1 %vm532_vm2, %v6536_v42  ;;  %583 = vmatprep.subr.mxu0 %v6533_v47 }
  0xdc   :  { %672 = vmatprep.subr.mxu1 %v6531_v48  ;;  %v355_v59 = vpop.f32.mrf.mxu0  ;;  %584 = vmatpush1.msra.mxu0 %v6532_v51 }
  0xdd   :  { %v444_v60 = vpop.f32.mrf.mxu1  ;;  %673 = vmatpush1.msra.mxu1 %v6530_v52  ;;  %585 = vmatprep.subr.mxu0 %v6529_v55 }
  0xde   :  { %674 = vmatprep.subr.mxu1 %v6527_v56  ;;  %v359_v1 = vpop.f32.mrf.mxu0  ;;  %586 = vmatpush1.msra.mxu0 %v6528_v57 }
  0xdf   :  { %v448_v2 = vpop.f32.mrf.mxu1  ;;  %675 = vmatpush1.msra.mxu1 %v6526_v58  ;;  %587 = vmatprep.subr.mxu0 %v6525_v61  ;;  %v4612_v25 = vadd.f32 %v359_v1, %v4450_v21 }
  0xe0   :  { %676 = vmatprep.subr.mxu1 %v6524_v62  ;;  %v361_v4 = vpop.f32.mrf.mxu0  ;;  %588 = vmatpush1.msra.mxu0 %v6523_v63 }
  0xe1   :  { %v450_v5 = vpop.f32.mrf.mxu1  ;;  %677 = vmatpush1.msra.mxu1 %v6521_v0  ;;  %3908 = vmatmul.mubr.msk.f32.vlgmr.msra.gmra.mxu0 %vm519_vm3, %v4561_v3  ;;  %v4599_v17 = vadd.f32 %v361_v4, %v4450_v21  ;;  %6619 = vst [vmem:[#allocation24_spill] sm:$0xff] %v4612_v25  ;;  %v4615_v4 = vadd.f32 %v448_v2, %v4450_v21  ;;  %v6510_v2 = vmax.f32 %v4612_v25, 0.0 }
  0xe2   :  { %3914 = vmatmul.mubr.msk.f32.vlgmr.msra.gmra.mxu1 %vm519_vm3, %v4561_v3  ;;  %v365_v6 = vpop.f32.mrf.mxu0  ;;  %627 = vmatprep.mubr.f32.mxu0 %v6538_v7  ;;  %v4602_v19 = vadd.f32 %v450_v5, %v4450_v21  ;;  %v4637_v21 = vadd.f32 %v4524_v53, %v4448_v18  ;;  %v4655_v53 = vadd.f32 %v4500_v44, %v4480_v34 }
  0xe3   :  { %v454_v8 = vpop.f32.mrf.mxu1  ;;  %716 = vmatprep.mubr.f32.mxu1 %v6538_v7  ;;  %v4583_v10 = vadd.f32 %v365_v6, %v4446_v13  ;;  %6617 = vst [vmem:[#allocation22_spill] sm:$0xff] %v4599_v17  ;;  %6620 = vst [vmem:[#allocation25_spill] sm:$0xff] %v4615_v4  ;;  %v6506_v1 = vmax.f32 %v4599_v17, 0.0  ;;  %v4674_v44 = vadd.f32 %v4478_v33, %v4480_v34 }
  0xe4   :  { %v367_v11 = vpop.f32.mrf.mxu0  ;;  %v4586_v14 = vadd.f32 %v454_v8, %v4446_v13  ;;  %6618 = vst [vmem:[#allocation23_spill] sm:$0xff] %v4602_v19  ;;  %v4622_v8 = vadd.f32 %v355_v59, %v4448_v18  ;;  %6623 = vst [vmem:[#allocation28_spill] sm:$0xff] %v4637_v21  ;;  %v4641_v59 = vadd.f32 %v4526_v54, %v4448_v18  ;;  %v494_v54 = vld [vmem:[%s6499_s3 + $0x18] sm:$0x3f] }
  0xe5   :  { %6613 = vst [vmem:[#allocation18_spill] sm:$0xff] %v4583_v10  ;;  %v456_v12 = vpop.f32.mrf.mxu1  ;;  %v4589_v15 = vadd.f32 %v367_v11, %v4446_v13  ;;  %3909 = vmatmul.mubr.msk.f32.gmra.mxu0 %vm519_vm3, %v4580_v9  ;;  %v6522_v5 = vmax.f32 %v4583_v10, 0.0  ;;  %v4625_v11 = vadd.f32 %v444_v60, %v4448_v18  ;;  %v4651_v60 = vadd.f32 %v4498_v43, %v4480_v34 }
  0xe6   :  { %6614 = vst [vmem:[#allocation19_spill] sm:$0xff] %v4586_v14  ;;  %v4592_v16 = vadd.f32 %v456_v12, %v4446_v13  ;;  %3915 = vmatmul.mubr.msk.f32.gmra.mxu1 %vm519_vm3, %v4580_v9  ;;  %633 = vmatprep.mubr.f32.mxu0 %v6538_v7  ;;  %v493_v13 = vld [vmem:[%s6499_s3 + $0x10] sm:$0xff]  ;;  %v6520_v6 = vmax.f32 %v4586_v14, 0.0  ;;  %6621 = vst [vmem:[#allocation26_spill] sm:$0xff] %v4622_v8  ;;  %v6507_v12 = vmax.f32 %v4602_v19, 0.0  ;;  %v6509_v18 = vmax.f32 %v4615_v4, 0.0 }
  0xe7   :  { %6615 = vst [vmem:[#allocation20_spill] sm:$0xff] %v4589_v15  ;;  %722 = vmatprep.mubr.f32.mxu1 %v6538_v7  ;;  %v6519_v20 = vmax.f32 %v4589_v15, 0.0  ;;  %6622 = vst [vmem:[#allocation27_spill] sm:$0xff] %v4625_v11  ;;  %v4668_v43 = vadd.f32 %v4476_v32, %v4480_v34  ;;  %v6516_v32 = vmax.f32 %v4637_v21, 0.0  ;;  %v6514_v33 = vmax.f32 %v4651_v60, 0.0 }
  0xe8   :  { %6616 = vst [vmem:[#allocation21_spill] sm:$0xff] %v4592_v16  ;;  %v6508_v24 = vmax.f32 %v4592_v16, 0.0  ;;  %6624 = vst [vmem:[#allocation29_spill] sm:$0xff] %v4641_v59  ;;  %v6513_v34 = vmax.f32 %v4655_v53, 0.0 }
  0xe9   :  { %3910 = vmatmul.mubr.msk.f32.gmra.mxu0 %vm519_vm3, %v493_v13  ;;  %3918 = vmatprep.subr.msk.mxu0 %vm532_vm2, %v6519_v20  ;;  %6625 = vst [vmem:[#allocation30_spill] sm:$0xff] %v4651_v60  ;;  %6626 = vst [vmem:[#allocation31_spill] sm:$0xff] %v4655_v53 }
  0xea   :  { %3916 = vmatmul.mubr.msk.f32.gmra.mxu1 %vm519_vm3, %v493_v13  ;;  %3924 = vmatprep.subr.msk.mxu1 %vm532_vm2, %v6508_v24  ;;  %6627 = vst [vmem:[#allocation32_spill] sm:$0xff] %v4668_v43  ;;  %6628 = vst [vmem:[#allocation33_spill] sm:$0xff] %v4674_v44  ;;  %v6515_v24 = vmax.f32 %v4641_v59, 0.0 }
  0xeb   :  { %3919 = vmatpush1.msk.msra.mxu0 %vm532_vm2, %v6522_v5  ;;  %3925 = vmatpush1.msk.msra.mxu1 %vm532_vm2, %v6520_v6 }
  0xec   :  { %761 = vmatprep.subr.mxu0 %v6506_v1  ;;  %850 = vmatprep.subr.mxu1 %v6507_v12  ;;  %v6518_v1 = vmax.f32 %v4622_v8, 0.0  ;;  %v6517_v12 = vmax.f32 %v4625_v11, 0.0 }
  0xed   :  { %639 = vmatprep.mubr.f32.mxu0 %v6538_v7  ;;  %728 = vmatprep.mubr.f32.mxu1 %v6538_v7 }
  0xee   :  { %762 = vmatpush1.msra.mxu0 %v6510_v2  ;;  %851 = vmatpush1.msra.mxu1 %v6509_v18  ;;  %v6512_v18 = vmax.f32 %v4668_v43, 0.0  ;;  %v6511_v2 = vmax.f32 %v4674_v44, 0.0 }
  0xef   :  { %3911 = vmatmul.mubr.msk.f32.gmra.mxu0 %vm519_vm3, %v494_v54  ;;  %3917 = vmatmul.mubr.msk.f32.gmra.mxu1 %vm519_vm3, %v494_v54 }
  0xf0   :  { %763 = vmatprep.subr.mxu0 %v6518_v1  ;;  %852 = vmatprep.subr.mxu1 %v6517_v12  ;;  %v4730_v12 = vpop.permute.xlu1 %506 }
  0xf1   :  { %764 = vmatpush1.msra.mxu0 %v6516_v32  ;;  %853 = vmatpush1.msra.mxu1 %v6515_v24 }
  0xf2   :  { %765 = vmatprep.subr.mxu0 %v6514_v33  ;;  %854 = vmatprep.subr.mxu1 %v6513_v34  ;;  %v4728_v34 = vpop.permute.xlu0 %501 }
  0xf3   :  { %766 = vmatpush1.msra.mxu0 %v6512_v18  ;;  %799 = vmatprep.mubr.f32.mxu0 %v6538_v7 }
  0xf4   :  { %855 = vmatpush1.msra.mxu1 %v6511_v2  ;;  %888 = vmatprep.mubr.f32.mxu1 %v6538_v7  ;;  %v4774_v57 = vpop.permute.xlu1 %516 }
  0xf5   :  { %3920 = vmatmul.mubr.msk.f32.vlgmr.msra.gmra.mxu0 %vm519_vm3, %v4561_v3  ;;  %3926 = vmatmul.mubr.msk.f32.vlgmr.msra.gmra.mxu1 %vm519_vm3, %v4561_v3 }
  0xf6   :  { %805 = vmatprep.mubr.f32.mxu0 %v6538_v7  ;;  %894 = vmatprep.mubr.f32.mxu1 %v6538_v7  ;;  %v4738_v0 = vpop.permute.xlu0 %511 }
  0xf9   :  { %3921 = vmatmul.mubr.msk.f32.gmra.mxu0 %vm519_vm3, %v4580_v9  ;;  %3927 = vmatmul.mubr.msk.f32.gmra.mxu1 %vm519_vm3, %v4580_v9 }
  0xfa   :  { %811 = vmatprep.mubr.f32.mxu0 %v6538_v7  ;;  %900 = vmatprep.mubr.f32.mxu1 %v6538_v7 }
  0xfd   :  { %3922 = vmatmul.mubr.msk.f32.gmra.mxu0 %vm519_vm3, %v493_v13  ;;  %3928 = vmatmul.mubr.msk.f32.gmra.mxu1 %vm519_vm3, %v493_v13 }
  0xfe   :  { %817 = vmatprep.mubr.f32.mxu0 %v6538_v7  ;;  %906 = vmatprep.mubr.f32.mxu1 %v6538_v7 }
 0x101   :  { %3923 = vmatmul.mubr.msk.f32.gmra.mxu0 %vm519_vm3, %v494_v54  ;;  %3929 = vmatmul.mubr.msk.f32.gmra.mxu1 %vm519_vm3, %v494_v54 }
 0x102   :  { %1356 = vmatprep.mubr.f32.mxu0 %v6538_v7  ;;  %1445 = vmatprep.mubr.f32.mxu1 %v6538_v7 }
 0x1a1   :  { %v623_v3 = vpop.f32.mrf.mxu0 }
 0x1a2   :  { %v712_v9 = vpop.f32.mrf.mxu1  ;;  %v4741_v5 = vadd.f32 %v623_v3, %v4728_v34 }
 0x1a3   :  { %v625_v2 = vpop.f32.mrf.mxu0  ;;  %v4744_v63 = vadd.f32 %v712_v9, %v4728_v34 }
 0x1a4   :  { %v714_v18 = vpop.f32.mrf.mxu1  ;;  %v4759_v3 = vadd.f32 %v625_v2, %v4728_v34  ;;  %v913_v2 = vmul.f32 %v4741_v5, %v4741_v5 }
 0x1a5   :  { %v629_v33 = vpop.f32.mrf.mxu0  ;;  %v4762_v9 = vadd.f32 %v714_v18, %v4728_v34  ;;  %v915_v18 = vmul.f32 %v4744_v63, %v4744_v63 }
 0x1a6   :  { %v718_v13 = vpop.f32.mrf.mxu1  ;;  %v4733_v1 = vadd.f32 %v629_v33, %v4730_v12  ;;  %v914_v47 = vmul.f32 %v4759_v3, %v4759_v3 }
 0x1a7   :  { %v631_v24 = vpop.f32.mrf.mxu0  ;;  %v4736_v54 = vadd.f32 %v718_v13, %v4730_v12  ;;  %v916_v38 = vmul.f32 %v4762_v9, %v4762_v9 }
 0x1a8   :  { %v720_v32 = vpop.f32.mrf.mxu1  ;;  %v4747_v62 = vadd.f32 %v631_v24, %v4730_v12  ;;  %v921_v24 = vmul.f32 %v4733_v1, %v4733_v1 }
 0x1a9   :  { %v635_v20 = vpop.f32.mrf.mxu0  ;;  %v4750_v61 = vadd.f32 %v720_v32, %v4730_v12  ;;  %v923_v32 = vmul.f32 %v4736_v54, %v4736_v54 }
 0x1aa   :  { %v724_v6 = vpop.f32.mrf.mxu1  ;;  %v4753_v33 = vadd.f32 %v635_v20, %v4738_v0  ;;  %v922_v55 = vmul.f32 %v4747_v62, %v4747_v62  ;;  %v945_v41 = vadd.f32 %v921_v24, %v913_v2 }
 0x1ab   :  { %v4756_v13 = vadd.f32 %v724_v6, %v4738_v0  ;;  %v637_v58 = vpop.f32.mrf.mxu0  ;;  %v924_v52 = vmul.f32 %v4750_v61, %v4750_v61  ;;  %v965_v7 = vadd.f32 %v923_v32, %v915_v18 }
 0x1ac   :  { %v726_v56 = vpop.f32.mrf.mxu1  ;;  %v4769_v20 = vadd.f32 %v637_v58, %v4738_v0  ;;  %v929_v58 = vmul.f32 %v4753_v33, %v4753_v33  ;;  %v955_v24 = vadd.f32 %v922_v55, %v914_v47 }
 0x1ad   :  { %v4772_v6 = vadd.f32 %v726_v56, %v4738_v0  ;;  %v931_v56 = vmul.f32 %v4756_v13, %v4756_v13  ;;  %v975_v32 = vadd.f32 %v924_v52, %v916_v38 }
 0x1ae   :  { %v930_v44 = vmul.f32 %v4769_v20, %v4769_v20  ;;  %v946_v2 = vadd.f32 %v945_v41, %v929_v58 }
 0x1af   :  { %v641_v48 = vpop.f32.mrf.mxu0  ;;  %v730_v51 = vpop.f32.mrf.mxu1  ;;  %v932_v43 = vmul.f32 %v4772_v6, %v4772_v6  ;;  %v966_v18 = vadd.f32 %v965_v7, %v931_v56 }
 0x1b0   :  { %v4793_v37 = vadd.f32 %v641_v48, %v4774_v57  ;;  %v4796_v42 = vadd.f32 %v730_v51, %v4774_v57  ;;  %v956_v19 = vadd.f32 %v955_v24, %v930_v44 }
 0x1b1   :  { %v643_v53 = vpop.f32.mrf.mxu0  ;;  %v732_v60 = vpop.f32.mrf.mxu1 }
 0x1b2   :  { %v937_v59 = vmul.f32 %v4793_v37, %v4793_v37  ;;  %v939_v48 = vmul.f32 %v4796_v42, %v4796_v42  ;;  %v4807_v21 = vadd.f32 %v643_v53, %v4774_v57  ;;  %v4810_v51 = vadd.f32 %v732_v60, %v4774_v57 }
 0x1b3   :  { %v976_v53 = vadd.f32 %v975_v32, %v932_v43 }
 0x1b4   :  { %v947_v11 = vsel %vm532_vm2, %v937_v59, 0.0  ;;  %v967_v8 = vsel %vm532_vm2, %v939_v48, 0.0  ;;  %v938_v4 = vmul.f32 %v4807_v21, %v4807_v21  ;;  %v940_v25 = vmul.f32 %v4810_v51, %v4810_v51 }
 0x1b5   :  { %v948_v17 = vadd.f32 %v947_v11, %v946_v2  ;;  %v968_v16 = vadd.f32 %v967_v8, %v966_v18  ;;  %v801_v60 = vpop.f32.mrf.mxu0  ;;  %v890_v15 = vpop.f32.mrf.mxu1 }
 0x1b6   :  { %v957_v38 = vsel %vm532_vm2, %v938_v4, 0.0  ;;  %v977_v7 = vsel %vm532_vm2, %v940_v25, 0.0  ;;  %v4821_v41 = vadd.f32 %v801_v60, %v4728_v34  ;;  %v4824_v47 = vadd.f32 %v890_v15, %v4728_v34 }
 0x1b7   :  { %v949_v52 = vrot.slane %v948_v17, 4  ;;  %v969_v55 = vrot.slane %v968_v16, 4  ;;  %v958_v59 = vadd.f32 %v957_v38, %v956_v19  ;;  %v978_v58 = vadd.f32 %v977_v7, %v976_v53  ;;  %v803_v44 = vpop.f32.mrf.mxu0  ;;  %v892_v43 = vpop.f32.mrf.mxu1 }
 0x1b8   :  { %v917_v8 = vmul.f32 %v4821_v41, %v4821_v41  ;;  %v919_v4 = vmul.f32 %v4824_v47, %v4824_v47  ;;  %v4831_v15 = vadd.f32 %v803_v44, %v4728_v34  ;;  %v4834_v19 = vadd.f32 %v892_v43, %v4728_v34 }
 0x1b9   :  { %v950_v11 = vadd.f32 %v949_v52, %v948_v17  ;;  %v970_v25 = vadd.f32 %v969_v55, %v968_v16  ;;  %v959_v56 = vrot.slane %v958_v59, 4  ;;  %v979_v48 = vrot.slane %v978_v58, 4  ;;  %v807_v24 = vpop.f32.mrf.mxu0  ;;  %v896_v32 = vpop.f32.mrf.mxu1 }
 0x1ba   :  { %v4837_v2 = vadd.f32 %v807_v24, %v4730_v12  ;;  %v4840_v18 = vadd.f32 %v896_v32, %v4730_v12 }
 0x1bb   :  { %v951_v53 = vrot.slane %v950_v11, 2  ;;  %v971_v60 = vrot.slane %v970_v25, 2  ;;  %v960_v17 = vadd.f32 %v959_v56, %v958_v59  ;;  %v980_v16 = vadd.f32 %v979_v48, %v978_v58  ;;  %v809_v38 = vpop.f32.mrf.mxu0  ;;  %v898_v7 = vpop.f32.mrf.mxu1 }
 0x1bc   :  { %v925_v52 = vmul.f32 %v4837_v2, %v4837_v2  ;;  %v927_v55 = vmul.f32 %v4840_v18, %v4840_v18  ;;  %v4847_v34 = vadd.f32 %v809_v38, %v4730_v12  ;;  %v4850_v44 = vadd.f32 %v898_v7, %v4730_v12 }
 0x1bd   :  { %v952_v43 = vadd.f32 %v951_v53, %v950_v11  ;;  %v972_v24 = vadd.f32 %v971_v60, %v970_v25  ;;  %v961_v32 = vrot.slane %v960_v17, 2  ;;  %v981_v14 = vrot.slane %v980_v16, 2  ;;  %v813_v59 = vpop.f32.mrf.mxu0  ;;  %v902_v58 = vpop.f32.mrf.mxu1 }
 0x1be   :  { %v918_v56 = vmul.f32 %v4831_v15, %v4831_v15  ;;  %v920_v48 = vmul.f32 %v4834_v19, %v4834_v19  ;;  %v985_v50 = vadd.f32 %v925_v52, %v917_v8  ;;  %v1005_v10 = vadd.f32 %v927_v55, %v919_v4 }
 0x1bf   :  { %v953_v49 = vrot.slane %v952_v43, 1  ;;  %v973_v38 = vrot.slane %v972_v24, 1  ;;  %v962_v46 = vadd.f32 %v961_v32, %v960_v17  ;;  %v982_v45 = vadd.f32 %v981_v14, %v980_v16  ;;  %v815_v12 = vpop.f32.mrf.mxu0  ;;  %v904_v7 = vpop.f32.mrf.mxu1 }
 0x1c0   :  { %v926_v11 = vmul.f32 %v4847_v34, %v4847_v34  ;;  %v928_v25 = vmul.f32 %v4850_v44, %v4850_v44  ;;  %v4861_v53 = vadd.f32 %v813_v59, %v4738_v0  ;;  %v4864_v60 = vadd.f32 %v902_v58, %v4738_v0 }
 0x1c1   :  { %v954_v8 = vadd.f32 %v953_v49, %v952_v43  ;;  %v974_v4 = vadd.f32 %v973_v38, %v972_v24  ;;  %v963_v52 = vrot.slane %v962_v46, 1  ;;  %v983_v55 = vrot.slane %v982_v45, 1  ;;  %v819_v17 = vpop.f32.mrf.mxu0  ;;  %v908_v14 = vpop.f32.mrf.mxu1 }
 0x1c2   :  { %v933_v16 = vmul.f32 %v4861_v53, %v4861_v53  ;;  %v935_v32 = vmul.f32 %v4864_v60, %v4864_v60  ;;  %v4871_v40 = vadd.f32 %v815_v12, %v4738_v0  ;;  %v4874_v59 = vadd.f32 %v904_v7, %v4738_v0 }
 0x1c3   :  { %v1026_v58 = vmul.f32 0.033333335, %v954_v8  ;;  %v1028_v36 = vmul.f32 0.033333335, %v974_v4  ;;  %v964_v49 = vadd.f32 %v963_v52, %v962_v46  ;;  %v984_v43 = vadd.f32 %v983_v55, %v982_v45  ;;  %v821_v31 = vpop.f32.mrf.mxu0  ;;  %v910_v29 = vpop.f32.mrf.mxu1 }
 0x1c4   :  { %v995_v24 = vadd.f32 %v926_v11, %v918_v56  ;;  %v1015_v38 = vadd.f32 %v928_v25, %v920_v48  ;;  %v986_v39 = vadd.f32 %v985_v50, %v933_v16  ;;  %v934_v35 = vmul.f32 %v4871_v40, %v4871_v40 }
 0x1c5   :  { %v1034_v27 = vadd.f32 1e-05, %v1026_v58  ;;  %v1036_v30 = vadd.f32 1e-05, %v1028_v36  ;;  %v1027_v26 = vmul.f32 0.033333335, %v964_v49  ;;  %v4879_v12 = vadd.f32 %v819_v17, %v4774_v57 }
 0x1c6   :  { %v1029_v0 = vmul.f32 0.033333335, %v984_v43  ;;  %v1006_v7 = vadd.f32 %v1005_v10, %v935_v32  ;;  %v936_v46 = vmul.f32 %v4874_v59, %v4874_v59  ;;  %v4884_v45 = vadd.f32 %v908_v14, %v4774_v57 }
 0x1c7   :  { %4077 = vrsqrt.f32 %v1034_v27  ;;  %v1035_v50 = vadd.f32 1e-05, %v1027_v26  ;;  %v941_v56 = vmul.f32 %v4879_v12, %v4879_v12  ;;  %v4889_v36 = vadd.f32 %v821_v31, %v4774_v57 }
 0x1c8   :  { %4079 = vrsqrt.f32 %v1036_v30  ;;  %v1037_v48 = vadd.f32 1e-05, %v1029_v0  ;;  %v943_v11 = vmul.f32 %v4884_v45, %v4884_v45  ;;  %v4894_v10 = vadd.f32 %v910_v29, %v4774_v57 }
 0x1c9   :  { %4081 = vrsqrt.f32 %v1035_v50  ;;  %v996_v25 = vadd.f32 %v995_v24, %v934_v35  ;;  %v987_v8 = vsel %vm532_vm2, %v941_v56, 0.0  ;;  %v942_v26 = vmul.f32 %v4889_v36, %v4889_v36 }
 0x1ca   :  { %4083 = vrsqrt.f32 %v1037_v48  ;;  %v988_v27 = vadd.f32 %v987_v8, %v986_v39  ;;  %v1007_v31 = vsel %vm532_vm2, %v943_v11, 0.0  ;;  %v944_v30 = vmul.f32 %v4894_v10, %v4894_v10  ;;  %v4904_v39 = vpop.permute.xlu0 %1103 }
 0x1cb   :  { %v1016_v4 = vadd.f32 %v1015_v38, %v936_v46  ;;  %v1008_v52 = vadd.f32 %v1007_v31, %v1006_v7  ;;  %v997_v55 = vsel %vm532_vm2, %v942_v26, 0.0  ;;  %v4910_v26 = vpop.permute.xlu1 %1098 }
 0x1cc   :  { %v989_v29 = vrot.slane %v988_v27, 4  ;;  %v998_v57 = vadd.f32 %v997_v55, %v996_v25  ;;  %v1017_v35 = vsel %vm532_vm2, %v944_v30, 0.0 }
 0x1cd   :  { %v1009_v17 = vrot.slane %v1008_v52, 4  ;;  %v1018_v14 = vadd.f32 %v1017_v35, %v1016_v4 }
 0x1ce   :  { %v990_v16 = vadd.f32 %v989_v29, %v988_v27  ;;  %v999_v32 = vrot.slane %v998_v57, 4  ;;  %v4918_v55 = vpop.permute.xlu0 %1159 }
 0x1cf   :  { %v1010_v58 = vadd.f32 %v1009_v17, %v1008_v52  ;;  %v1019_v49 = vrot.slane %v1018_v14, 4 }
 0x1d0   :  { %v991_v43 = vrot.slane %v990_v16, 2  ;;  %v1000_v24 = vadd.f32 %v999_v32, %v998_v57 }
 0x1d1   :  { %v1011_v0 = vrot.slane %v1010_v58, 2  ;;  %v1020_v50 = vadd.f32 %v1019_v49, %v1018_v14 }
 0x1d2   :  { %v992_v38 = vadd.f32 %v991_v43, %v990_v16  ;;  %v1001_v7 = vrot.slane %v1000_v24, 2 }
 0x1d3   :  { %v1012_v46 = vadd.f32 %v1011_v0, %v1010_v58  ;;  %v1021_v56 = vrot.slane %v1020_v50, 2 }
 0x1d4   :  { %v4906_v48 = vpop.eup %4077  ;;  %v993_v11 = vrot.slane %v992_v38, 1  ;;  %v1002_v25 = vadd.f32 %v1001_v7, %v1000_v24 }
 0x1d5   :  { %v4908_v8 = vpop.eup %4079  ;;  %v1074_v27 = vmul.f32 %v4906_v48, %v4793_v37  ;;  %v1013_v31 = vrot.slane %v1012_v46, 1  ;;  %v1022_v30 = vadd.f32 %v1021_v56, %v1020_v50  ;;  %v1066_v4 = vmul.f32 %v4906_v48, %v4753_v33  ;;  %v4936_v56 = vpop.permute.xlu1 %1093 }
 0x1d6   :  { %v4916_v52 = vpop.eup %4081  ;;  %v1076_v29 = vmul.f32 %v4908_v8, %v4796_v42  ;;  %v994_v57 = vadd.f32 %v993_v11, %v992_v38  ;;  %v1003_v35 = vrot.slane %v1002_v25, 1  ;;  %v1068_v17 = vmul.f32 %v4908_v8, %v4756_v13 }
 0x1d7   :  { %v4924_v14 = vpop.eup %4083  ;;  %v1130_v37 = vmul.f32 %v4904_v39, %v1074_v27  ;;  %v1075_v16 = vmul.f32 %v4916_v52, %v4807_v21  ;;  %v1014_v33 = vadd.f32 %v1013_v31, %v1012_v46  ;;  %v1023_v32 = vrot.slane %v1022_v30, 1 }
 0x1d8   :  { %v1132_v58 = vmul.f32 %v4904_v39, %v1076_v29  ;;  %v1077_v49 = vmul.f32 %v4924_v14, %v4810_v51  ;;  %v1030_v42 = vmul.f32 0.033333335, %v994_v57  ;;  %v1004_v43 = vadd.f32 %v1003_v35, %v1002_v25  ;;  %v4939_v25 = vpop.permute.xlu0 %1154 }
 0x1d9   :  { %v1186_v24 = vadd.f32 %v4918_v55, %v1130_v37  ;;  %v1131_v13 = vmul.f32 %v4904_v39, %v1075_v16  ;;  %v1032_v0 = vmul.f32 0.033333335, %v1014_v33  ;;  %v1024_v50 = vadd.f32 %v1023_v32, %v1022_v30 }
 0x1da   :  { %v1188_v38 = vadd.f32 %v4918_v55, %v1132_v58  ;;  %v1133_v7 = vmul.f32 %v4904_v39, %v1077_v49  ;;  %v1038_v21 = vadd.f32 1e-05, %v1030_v42  ;;  %v1031_v46 = vmul.f32 0.033333335, %v1004_v43 }
 0x1db   :  { %v1218_v11 = vmax.f32 %v1186_v24, 0.0  ;;  %v1187_v27 = vadd.f32 %v4918_v55, %v1131_v13  ;;  %v1040_v51 = vadd.f32 1e-05, %v1032_v0  ;;  %v1033_v31 = vmul.f32 0.033333335, %v1024_v50  ;;  %v4958_v24 = vpop.permute.xlu1 %1088 }
 0x1dc   :  { %v1220_v29 = vmax.f32 %v1188_v38, 0.0  ;;  %v1189_v57 = vadd.f32 %v4918_v55, %v1133_v7  ;;  %4085 = vrsqrt.f32 %v1038_v21  ;;  %v1039_v30 = vadd.f32 1e-05, %v1031_v46  ;;  %v4966_v50 = vpop.permute.xlu0 %1149 }
 0x1dd   :  { %v1219_v35 = vmax.f32 %v1187_v27, 0.0  ;;  %4087 = vrsqrt.f32 %v1040_v51  ;;  %v1041_v37 = vadd.f32 1e-05, %v1033_v31  ;;  %v1067_v16 = vmul.f32 %v4916_v52, %v4769_v20 }
 0x1de   :  { %v1221_v33 = vmax.f32 %v1189_v57, 0.0  ;;  %4089 = vrsqrt.f32 %v1039_v30  ;;  %v1069_v32 = vmul.f32 %v4924_v14, %v4772_v6  ;;  %v1122_v58 = vmul.f32 %v4910_v26, %v1066_v4 }
 0x1df   :  { %4091 = vrsqrt.f32 %v1041_v37  ;;  %3938 = vmatprep.subr.msk.mxu0 %vm532_vm2, %v1219_v35  ;;  %v1123_v49 = vmul.f32 %v4910_v26, %v1067_v16  ;;  %v1124_v42 = vmul.f32 %v4910_v26, %v1068_v17  ;;  %v1059_v43 = vmul.f32 %v4916_v52, %v4747_v62 }
 0x1e0   :  { %3944 = vmatprep.subr.msk.mxu1 %vm532_vm2, %v1221_v33  ;;  %3939 = vmatpush1.msk.msra.mxu0 %vm532_vm2, %v1218_v11  ;;  %v1125_v20 = vmul.f32 %v4910_v26, %v1069_v32  ;;  %v1178_v6 = vadd.f32 %v4939_v25, %v1122_v58  ;;  %v1061_v4 = vmul.f32 %v4924_v14, %v4750_v61 }
 0x1e1   :  { %3945 = vmatpush1.msk.msra.mxu1 %vm532_vm2, %v1220_v29  ;;  %v1179_v17 = vadd.f32 %v4939_v25, %v1123_v49  ;;  %v1180_v13 = vadd.f32 %v4939_v25, %v1124_v42  ;;  %v1115_v62 = vmul.f32 %v4936_v56, %v1059_v43  ;;  %v1058_v0 = vmul.f32 %v4906_v48, %v4733_v1 }
 0x1e2   :  { %v1181_v38 = vadd.f32 %v4939_v25, %v1125_v20  ;;  %v1210_v7 = vmax.f32 %v1178_v6, 0.0  ;;  %v1117_v61 = vmul.f32 %v4936_v56, %v1061_v4  ;;  %v1060_v21 = vmul.f32 %v4908_v8, %v4736_v54 }
 0x1e3   :  { %v1211_v46 = vmax.f32 %v1179_v17, 0.0  ;;  %v1212_v11 = vmax.f32 %v1180_v13, 0.0  ;;  %v1171_v27 = vadd.f32 %v4966_v50, %v1115_v62  ;;  %v1114_v51 = vmul.f32 %v4936_v56, %v1058_v0 }
 0x1e4   :  { %v1213_v31 = vmax.f32 %v1181_v38, 0.0  ;;  %v1173_v29 = vadd.f32 %v4966_v50, %v1117_v61  ;;  %v1116_v1 = vmul.f32 %v4936_v56, %v1060_v21  ;;  %v1051_v57 = vmul.f32 %v4916_v52, %v4759_v3  ;;  %v4987_v52 = vpop.permute.xlu1 %1144 }
 0x1e5   :  { %1318 = vmatprep.subr.mxu0 %v1211_v46  ;;  %v1203_v30 = vmax.f32 %v1171_v27, 0.0  ;;  %v1170_v35 = vadd.f32 %v4966_v50, %v1114_v51  ;;  %v1053_v54 = vmul.f32 %v4924_v14, %v4762_v9  ;;  %v1050_v37 = vmul.f32 %v4906_v48, %v4741_v5 }
 0x1e6   :  { %1407 = vmatprep.subr.mxu1 %v1213_v31  ;;  %1319 = vmatpush1.msra.mxu0 %v1210_v7  ;;  %v1205_v16 = vmax.f32 %v1173_v29, 0.0  ;;  %v1172_v33 = vadd.f32 %v4966_v50, %v1116_v1  ;;  %v1107_v32 = vmul.f32 %v4958_v24, %v1051_v57  ;;  %v1052_v3 = vmul.f32 %v4908_v8, %v4744_v63  ;;  %v5009_v7 = vld [vmem:[%s6499_s3 + $0x20] sm:$0xff] }
 0x1e7   :  { %1408 = vmatpush1.msra.mxu1 %v1212_v11  ;;  %1320 = vmatprep.subr.mxu0 %v1203_v30  ;;  %v1202_v58 = vmax.f32 %v1170_v35, 0.0  ;;  %v1109_v9 = vmul.f32 %v4958_v24, %v1053_v54  ;;  %v1106_v14 = vmul.f32 %v4958_v24, %v1050_v37 }
 0x1e8   :  { %1409 = vmatprep.subr.mxu1 %v1205_v16  ;;  %v1204_v5 = vmax.f32 %v1172_v33, 0.0  ;;  %v1163_v48 = vadd.f32 %v4987_v52, %v1107_v32  ;;  %v1108_v49 = vmul.f32 %v4958_v24, %v1052_v3 }
 0x1e9   :  { %v4993_v42 = vpop.eup %4085  ;;  %1321 = vmatpush1.msra.mxu0 %v1202_v58  ;;  %v1165_v63 = vadd.f32 %v4987_v52, %v1109_v9  ;;  %v1162_v8 = vadd.f32 %v4987_v52, %v1106_v14 }
 0x1ea   :  { %v4997_v43 = vpop.eup %4087  ;;  %v1078_v20 = vmul.f32 %v4993_v42, %v4879_v12  ;;  %1410 = vmatpush1.msra.mxu1 %v1204_v5  ;;  %v1195_v6 = vmax.f32 %v1163_v48, 0.0  ;;  %v1164_v4 = vadd.f32 %v4987_v52, %v1108_v49  ;;  %v1070_v17 = vmul.f32 %v4993_v42, %v4861_v53 }
 0x1eb   :  { %v4090_v13 = vpop.eup %4089  ;;  %v1080_v62 = vmul.f32 %v4997_v43, %v4884_v45  ;;  %v1197_v0 = vmax.f32 %v1165_v63, 0.0  ;;  %v1194_v38 = vmax.f32 %v1162_v8, 0.0  ;;  %v1072_v12 = vmul.f32 %v4997_v43, %v4864_v60 }
 0x1ec   :  { %v4092_v61 = vpop.eup %4091  ;;  %v1134_v21 = vmul.f32 %v4904_v39, %v1078_v20  ;;  %v1079_v46 = vmul.f32 %v4090_v13, %v4889_v36  ;;  %1322 = vmatprep.subr.mxu0 %v1195_v6  ;;  %v1196_v53 = vmax.f32 %v1164_v4, 0.0  ;;  %v1071_v11 = vmul.f32 %v4090_v13, %v4871_v40 }
 0x1ed   :  { %v1136_v45 = vmul.f32 %v4904_v39, %v1080_v62  ;;  %v1081_v27 = vmul.f32 %v4092_v61, %v4894_v10  ;;  %1411 = vmatprep.subr.mxu1 %v1197_v0  ;;  %1323 = vmatpush1.msra.mxu0 %v1194_v38  ;;  %v1073_v51 = vmul.f32 %v4092_v61, %v4874_v59  ;;  %v6629_v10 = vmov 0.0   ;;  %v5031_v59 = vld [vmem:[%s6499_s3 + $0x28] sm:$0xff] }
 0x1ee   :  { %v1190_v31 = vadd.f32 %v4918_v55, %v1134_v21  ;;  %v1135_v60 = vmul.f32 %v4904_v39, %v1079_v46  ;;  %1412 = vmatpush1.msra.mxu1 %v1196_v53  ;;  %3940 = vmatmul.mubr.msk.f32.vlgmr.msra.gmra.mxu0 %vm519_vm3, %v5009_v7  ;;  %v1127_v36 = vmul.f32 %v4910_v26, %v1071_v11 }
 0x1ef   :  { %v1137_v40 = vmul.f32 %v4904_v39, %v1081_v27  ;;  %3946 = vmatmul.mubr.msk.f32.vlgmr.msra.gmra.mxu1 %vm519_vm3, %v5009_v7  ;;  %1362 = vmatprep.mubr.f32.mxu0 %v6629_v10  ;;  %v1129_v29 = vmul.f32 %v4910_v26, %v1073_v51  ;;  %v1192_v1 = vadd.f32 %v4918_v55, %v1136_v45 }
 0x1f0   :  { %v1191_v57 = vadd.f32 %v4918_v55, %v1135_v60  ;;  %1451 = vmatprep.mubr.f32.mxu1 %v6629_v10  ;;  %v1126_v39 = vmul.f32 %v4910_v26, %v1070_v17  ;;  %v1183_v35 = vadd.f32 %v4939_v25, %v1127_v36  ;;  %v1128_v54 = vmul.f32 %v4910_v26, %v1072_v12 }
 0x1f1   :  { %v1193_v30 = vadd.f32 %v4918_v55, %v1137_v40  ;;  %v1222_v37 = vmax.f32 %v1190_v31, 0.0  ;;  %v1185_v33 = vadd.f32 %v4939_v25, %v1129_v29  ;;  %v1063_v32 = vmul.f32 %v4090_v13, %v4847_v34  ;;  %v5051_v55 = vld [vmem:[%s6499_s3 + $0x30] sm:$0xff]  ;;  %v5124_v40 = vpop.permute.xlu1 %1243 }
 0x1f2   :  { %v1223_v16 = vmax.f32 %v1191_v57, 0.0  ;;  %3941 = vmatmul.mubr.msk.f32.gmra.mxu0 %vm519_vm3, %v5031_v59  ;;  %v1182_v26 = vadd.f32 %v4939_v25, %v1126_v39  ;;  %v1184_v58 = vadd.f32 %v4939_v25, %v1128_v54  ;;  %v1065_v9 = vmul.f32 %v4092_v61, %v4850_v44 }
 0x1f3   :  { %v1225_v3 = vmax.f32 %v1193_v30, 0.0  ;;  %3947 = vmatmul.mubr.msk.f32.gmra.mxu1 %vm519_vm3, %v5031_v59  ;;  %1368 = vmatprep.mubr.f32.mxu0 %v6629_v10  ;;  %v1224_v14 = vmax.f32 %v1192_v1, 0.0  ;;  %v1119_v34 = vmul.f32 %v4936_v56, %v1063_v32  ;;  %v1062_v5 = vmul.f32 %v4993_v42, %v4837_v2 }
 0x1f4   :  { %1457 = vmatprep.mubr.f32.mxu1 %v6629_v10  ;;  %3950 = vmatprep.subr.msk.mxu0 %vm532_vm2, %v1223_v16  ;;  %v1064_v48 = vmul.f32 %v4997_v43, %v4840_v18  ;;  %v1215_v25 = vmax.f32 %v1183_v35, 0.0  ;;  %v1121_v44 = vmul.f32 %v4936_v56, %v1065_v9  ;;  %v1055_v49 = vmul.f32 %v4090_v13, %v4831_v15  ;;  %v3933_v15 = vld [vmem:[%s6499_s3 + $0x38] sm:$0x3f] }
 0x1f5   :  { %3956 = vmatprep.subr.msk.mxu1 %vm532_vm2, %v1225_v3  ;;  %3951 = vmatpush1.msk.msra.mxu0 %vm532_vm2, %v1222_v37  ;;  %v1057_v63 = vmul.f32 %v4092_v61, %v4834_v19  ;;  %v1217_v2 = vmax.f32 %v1185_v33, 0.0  ;;  %v1175_v8 = vadd.f32 %v4966_v50, %v1119_v34  ;;  %v1118_v18 = vmul.f32 %v4936_v56, %v1062_v5 }
 0x1f6   :  { %3942 = vmatmul.mubr.msk.f32.gmra.mxu0 %vm519_vm3, %v5051_v55  ;;  %3957 = vmatpush1.msk.msra.mxu1 %vm532_vm2, %v1224_v14  ;;  %v1120_v20 = vmul.f32 %v4936_v56, %v1064_v48  ;;  %v1214_v6 = vmax.f32 %v1182_v26, 0.0  ;;  %v1177_v19 = vadd.f32 %v4966_v50, %v1121_v44  ;;  %v1111_v4 = vmul.f32 %v4958_v24, %v1055_v49  ;;  %v5167_v44 = vpop.permute.xlu1 %1253 }
 0x1f7   :  { %3948 = vmatmul.mubr.msk.f32.gmra.mxu1 %vm519_vm3, %v5051_v55  ;;  %1496 = vmatprep.subr.mxu0 %v1215_v25  ;;  %v1113_v17 = vmul.f32 %v4958_v24, %v1057_v63  ;;  %v1216_v13 = vmax.f32 %v1184_v58, 0.0  ;;  %v1174_v56 = vadd.f32 %v4966_v50, %v1118_v18  ;;  %v1054_v0 = vmul.f32 %v4993_v42, %v4821_v41 }
 0x1f8   :  { %1585 = vmatprep.subr.mxu1 %v1217_v2  ;;  %1374 = vmatprep.mubr.f32.mxu0 %v6629_v10  ;;  %v1176_v62 = vadd.f32 %v4966_v50, %v1120_v20  ;;  %v1207_v38 = vmax.f32 %v1175_v8, 0.0  ;;  %v1167_v12 = vadd.f32 %v4987_v52, %v1111_v4  ;;  %v1056_v21 = vmul.f32 %v4997_v43, %v4824_v47 }
 0x1f9   :  { %1463 = vmatprep.mubr.f32.mxu1 %v6629_v10  ;;  %1497 = vmatpush1.msra.mxu0 %v1214_v6  ;;  %v1169_v61 = vadd.f32 %v4987_v52, %v1113_v17  ;;  %v1209_v46 = vmax.f32 %v1177_v19, 0.0  ;;  %v1206_v53 = vmax.f32 %v1174_v56, 0.0  ;;  %v1110_v50 = vmul.f32 %v4958_v24, %v1054_v0 }
 0x1fa   :  { %1586 = vmatpush1.msra.mxu1 %v1216_v13  ;;  %3943 = vmatmul.mubr.msk.f32.gmra.mxu0 %vm519_vm3, %v3933_v15  ;;  %v1208_v41 = vmax.f32 %v1176_v62, 0.0  ;;  %v1199_v42 = vmax.f32 %v1167_v12, 0.0  ;;  %v1112_v11 = vmul.f32 %v4958_v24, %v1056_v21 }
 0x1fb   :  { %3949 = vmatmul.mubr.msk.f32.gmra.mxu1 %vm519_vm3, %v3933_v15  ;;  %1498 = vmatprep.subr.mxu0 %v1207_v38  ;;  %v1201_v45 = vmax.f32 %v1169_v61, 0.0  ;;  %v1166_v27 = vadd.f32 %v4987_v52, %v1110_v50 }
 0x1fc   :  { %1587 = vmatprep.subr.mxu1 %v1209_v46  ;;  %1499 = vmatpush1.msra.mxu0 %v1206_v53  ;;  %v1168_v47 = vadd.f32 %v4987_v52, %v1112_v11 }
 0x1fd   :  { %1588 = vmatpush1.msra.mxu1 %v1208_v41  ;;  %1500 = vmatprep.subr.mxu0 %v1199_v42  ;;  %v1198_v43 = vmax.f32 %v1166_v27, 0.0 }
 0x1fe   :  { %1589 = vmatprep.subr.mxu1 %v1201_v45  ;;  %1534 = vmatprep.mubr.f32.mxu0 %v6629_v10  ;;  %v1200_v51 = vmax.f32 %v1168_v47, 0.0 }
 0x1ff   :  { %1623 = vmatprep.mubr.f32.mxu1 %v6629_v10  ;;  %1501 = vmatpush1.msra.mxu0 %v1198_v43 }
 0x200   :  { %1590 = vmatpush1.msra.mxu1 %v1200_v51  ;;  %3952 = vmatmul.mubr.msk.f32.vlgmr.msra.gmra.mxu0 %vm519_vm3, %v5009_v7 }
 0x201   :  { %3958 = vmatmul.mubr.msk.f32.vlgmr.msra.gmra.mxu1 %vm519_vm3, %v5009_v7  ;;  %1540 = vmatprep.mubr.f32.mxu0 %v6629_v10  ;;  %v5122_v7 = vpop.permute.xlu0 %1238 }
 0x202   :  { %1629 = vmatprep.mubr.f32.mxu1 %v6629_v10 }
 0x204   :  { %3953 = vmatmul.mubr.msk.f32.gmra.mxu0 %vm519_vm3, %v5031_v59 }
 0x205   :  { %3959 = vmatmul.mubr.msk.f32.gmra.mxu1 %vm519_vm3, %v5031_v59  ;;  %1546 = vmatprep.mubr.f32.mxu0 %v6629_v10  ;;  %v5135_v35 = vpop.permute.xlu0 %1248 }
 0x206   :  { %1635 = vmatprep.mubr.f32.mxu1 %v6629_v10 }
 0x208   :  { %3954 = vmatmul.mubr.msk.f32.gmra.mxu0 %vm519_vm3, %v5051_v55 }
 0x209   :  { %3960 = vmatmul.mubr.msk.f32.gmra.mxu1 %vm519_vm3, %v5051_v55  ;;  %1552 = vmatprep.mubr.f32.mxu0 %v6629_v10 }
 0x20a   :  { %1641 = vmatprep.mubr.f32.mxu1 %v6629_v10 }
 0x20c   :  { %3955 = vmatmul.mubr.msk.f32.gmra.mxu0 %vm519_vm3, %v3933_v15 }
 0x20d   :  { %3961 = vmatmul.mubr.msk.f32.gmra.mxu1 %vm519_vm3, %v3933_v15  ;;  %2124 = vmatprep.mubr.f32.mxu0 %v6629_v10 }
 0x20e   :  { %2213 = vmatprep.mubr.f32.mxu1 %v6629_v10 }
 0x2ae   :  { %v1358_v24 = vpop.f32.mrf.mxu0 }
 0x2af   :  { %v1447_v52 = vpop.f32.mrf.mxu1  ;;  %v5130_v57 = vadd.f32 %v1358_v24, %v5122_v7 }
 0x2b0   :  { %v1360_v31 = vpop.f32.mrf.mxu0  ;;  %v5138_v54 = vadd.f32 %v1447_v52, %v5122_v7 }
 0x2b1   :  { %v1449_v60 = vpop.f32.mrf.mxu1  ;;  %v5144_v33 = vadd.f32 %v1360_v31, %v5122_v7  ;;  %v1648_v34 = vmul.f32 %v5130_v57, %v5130_v57 }
 0x2b2   :  { %v1364_v36 = vpop.f32.mrf.mxu0  ;;  %v5153_v26 = vadd.f32 %v1449_v60, %v5122_v7  ;;  %v1650_v49 = vmul.f32 %v5138_v54, %v5138_v54 }
 0x2b3   :  { %v1453_v59 = vpop.f32.mrf.mxu1  ;;  %v5127_v29 = vadd.f32 %v1364_v36, %v5124_v40  ;;  %v1649_v20 = vmul.f32 %v5144_v33, %v5144_v33 }
 0x2b4   :  { %v1366_v1 = vpop.f32.mrf.mxu0  ;;  %v5133_v39 = vadd.f32 %v1453_v59, %v5124_v40  ;;  %v1651_v17 = vmul.f32 %v5153_v26, %v5153_v26 }
 0x2b5   :  { %v1455_v30 = vpop.f32.mrf.mxu1  ;;  %v5141_v37 = vadd.f32 %v1366_v1, %v5124_v40  ;;  %v1656_v58 = vmul.f32 %v5127_v29, %v5127_v29 }
 0x2b6   :  { %v1370_v16 = vpop.f32.mrf.mxu0  ;;  %v5147_v32 = vadd.f32 %v1455_v30, %v5124_v40  ;;  %v1658_v5 = vmul.f32 %v5133_v39, %v5133_v39 }
 0x2b7   :  { %v5150_v3 = vadd.f32 %v1370_v16, %v5135_v35  ;;  %v1459_v55 = vpop.f32.mrf.mxu1  ;;  %v1657_v63 = vmul.f32 %v5141_v37, %v5141_v37  ;;  %v1680_v13 = vadd.f32 %v1656_v58, %v1648_v34 }
 0x2b8   :  { %v5158_v9 = vadd.f32 %v1459_v55, %v5135_v35  ;;  %v1372_v14 = vpop.f32.mrf.mxu0  ;;  %v1659_v6 = vmul.f32 %v5147_v32, %v5147_v32  ;;  %v1700_v38 = vadd.f32 %v1658_v5, %v1650_v49 }
 0x2b9   :  { %v5165_v48 = vadd.f32 %v1372_v14, %v5135_v35  ;;  %v1461_v25 = vpop.f32.mrf.mxu1  ;;  %v1664_v2 = vmul.f32 %v5150_v3, %v5150_v3  ;;  %v1690_v53 = vadd.f32 %v1657_v63, %v1649_v20 }
 0x2ba   :  { %v5176_v8 = vadd.f32 %v1461_v25, %v5135_v35  ;;  %v1376_v18 = vpop.f32.mrf.mxu0  ;;  %v1666_v15 = vmul.f32 %v5158_v9, %v5158_v9  ;;  %v1710_v11 = vadd.f32 %v1659_v6, %v1651_v17 }
 0x2bb   :  { %v5185_v19 = vadd.f32 %v1376_v18, %v5167_v44  ;;  %v1465_v4 = vpop.f32.mrf.mxu1  ;;  %v1665_v56 = vmul.f32 %v5165_v48, %v5165_v48  ;;  %v1681_v50 = vadd.f32 %v1680_v13, %v1664_v2 }
 0x2bc   :  { %v5192_v62 = vadd.f32 %v1465_v4, %v5167_v44  ;;  %v1378_v0 = vpop.f32.mrf.mxu0  ;;  %v1667_v12 = vmul.f32 %v5176_v8, %v5176_v8  ;;  %v1701_v45 = vadd.f32 %v1700_v38, %v1666_v15 }
 0x2bd   :  { %v1672_v61 = vmul.f32 %v5185_v19, %v5185_v19  ;;  %v5199_v21 = vadd.f32 %v1378_v0, %v5167_v44  ;;  %v1467_v46 = vpop.f32.mrf.mxu1  ;;  %v1691_v43 = vadd.f32 %v1690_v53, %v1665_v56 }
 0x2be   :  { %v1674_v41 = vmul.f32 %v5192_v62, %v5192_v62  ;;  %v5204_v42 = vadd.f32 %v1467_v46, %v5167_v44  ;;  %v1711_v31 = vadd.f32 %v1710_v11, %v1667_v12 }
 0x2bf   :  { %v1682_v27 = vsel %vm532_vm2, %v1672_v61, 0.0  ;;  %v1673_v47 = vmul.f32 %v5199_v21, %v5199_v21 }
 0x2c0   :  { %v1683_v51 = vadd.f32 %v1682_v27, %v1681_v50  ;;  %v1702_v24 = vsel %vm532_vm2, %v1674_v41, 0.0  ;;  %v1675_v52 = vmul.f32 %v5204_v42, %v5204_v42  ;;  %v1536_v59 = vpop.f32.mrf.mxu0 }
 0x2c1   :  { %v1703_v60 = vadd.f32 %v1702_v24, %v1701_v45  ;;  %v1692_v36 = vsel %vm532_vm2, %v1673_v47, 0.0  ;;  %v1625_v55 = vpop.f32.mrf.mxu1  ;;  %v5215_v18 = vadd.f32 %v1536_v59, %v5122_v7 }
 0x2c2   :  { %v1684_v1 = vrot.slane %v1683_v51, 4  ;;  %v1693_v30 = vadd.f32 %v1692_v36, %v1691_v43  ;;  %v1712_v16 = vsel %vm532_vm2, %v1675_v52, 0.0  ;;  %v1538_v34 = vpop.f32.mrf.mxu0  ;;  %v5218_v20 = vadd.f32 %v1625_v55, %v5122_v7 }
 0x2c3   :  { %v1704_v58 = vrot.slane %v1703_v60, 4  ;;  %v1713_v14 = vadd.f32 %v1712_v16, %v1711_v31  ;;  %v1627_v49 = vpop.f32.mrf.mxu1  ;;  %v5221_v17 = vadd.f32 %v1538_v34, %v5122_v7  ;;  %v1652_v47 = vmul.f32 %v5215_v18, %v5215_v18 }
 0x2c4   :  { %v1685_v5 = vadd.f32 %v1684_v1, %v1683_v51  ;;  %v1694_v25 = vrot.slane %v1693_v30, 4  ;;  %6630 = vst [vmem:[#allocation34_spill] sm:$0xff] %v5218_v20  ;;  %v1542_v6 = vpop.f32.mrf.mxu0  ;;  %v5227_v12 = vadd.f32 %v1627_v49, %v5122_v7  ;;  %v1654_v43 = vmul.f32 %v5218_v20, %v5218_v20 }
 0x2c5   :  { %v1705_v63 = vadd.f32 %v1704_v58, %v1703_v60  ;;  %v1714_v2 = vrot.slane %v1713_v14, 4  ;;  %v5224_v13 = vadd.f32 %v1542_v6, %v5124_v40  ;;  %v1631_v56 = vpop.f32.mrf.mxu1  ;;  %v1653_v52 = vmul.f32 %v5221_v17, %v5221_v17 }
 0x2c6   :  { %v1686_v15 = vrot.slane %v1685_v5, 2  ;;  %v1695_v4 = vadd.f32 %v1694_v25, %v1693_v30  ;;  %v5230_v61 = vadd.f32 %v1631_v56, %v5124_v40  ;;  %v1544_v46 = vpop.f32.mrf.mxu0  ;;  %v1655_v1 = vmul.f32 %v5227_v12, %v5227_v12 }
 0x2c7   :  { %v1706_v0 = vrot.slane %v1705_v63, 2  ;;  %v1715_v38 = vadd.f32 %v1714_v2, %v1713_v14  ;;  %v5233_v41 = vadd.f32 %v1544_v46, %v5124_v40  ;;  %v1633_v11 = vpop.f32.mrf.mxu1  ;;  %v1660_v31 = vmul.f32 %v5224_v13, %v5224_v13 }
 0x2c8   :  { %v1687_v53 = vadd.f32 %v1686_v15, %v1685_v5  ;;  %v1696_v50 = vrot.slane %v1695_v4, 2  ;;  %v1548_v7 = vpop.f32.mrf.mxu0  ;;  %v1662_v30 = vmul.f32 %v5230_v61, %v5230_v61  ;;  %v5250_v34 = vadd.f32 %v1633_v11, %v5124_v40 }
 0x2c9   :  { %v1707_v45 = vadd.f32 %v1706_v0, %v1705_v63  ;;  %v1716_v27 = vrot.slane %v1715_v38, 2  ;;  %v1637_v60 = vpop.f32.mrf.mxu1  ;;  %v1661_v14 = vmul.f32 %v5233_v41, %v5233_v41  ;;  %v5253_v63 = vadd.f32 %v1548_v7, %v5135_v35 }
 0x2ca   :  { %v1688_v51 = vrot.slane %v1687_v53, 1  ;;  %v1697_v24 = vadd.f32 %v1696_v50, %v1695_v4  ;;  %v1550_v16 = vpop.f32.mrf.mxu0  ;;  %v5256_v2 = vadd.f32 %v1637_v60, %v5135_v35  ;;  %v1720_v56 = vadd.f32 %v1660_v31, %v1652_v47 }
 0x2cb   :  { %v1708_v36 = vrot.slane %v1707_v45, 1  ;;  %v1717_v59 = vadd.f32 %v1716_v27, %v1715_v38  ;;  %v1639_v5 = vpop.f32.mrf.mxu1  ;;  %v5259_v0 = vadd.f32 %v1550_v16, %v5135_v35  ;;  %v1730_v27 = vadd.f32 %v1661_v14, %v1653_v52 }
 0x2cc   :  { %v1689_v55 = vadd.f32 %v1688_v51, %v1687_v53  ;;  %v1698_v58 = vrot.slane %v1697_v24, 1  ;;  %v1554_v6 = vpop.f32.mrf.mxu0  ;;  %v1740_v53 = vadd.f32 %v1662_v30, %v1654_v43  ;;  %v5262_v50 = vadd.f32 %v1639_v5, %v5135_v35 }
 0x2cd   :  { %v1709_v25 = vadd.f32 %v1708_v36, %v1707_v45  ;;  %v1718_v49 = vrot.slane %v1717_v59, 1  ;;  %v1643_v38 = vpop.f32.mrf.mxu1  ;;  %v1663_v7 = vmul.f32 %v5250_v34, %v5250_v34  ;;  %v1668_v47 = vmul.f32 %v5253_v63, %v5253_v63 }
 0x2ce   :  { %v1760_v15 = vmul.f32 0.033333335, %v1689_v55  ;;  %v1699_v4 = vadd.f32 %v1698_v58, %v1697_v24  ;;  %v1670_v24 = vmul.f32 %v5256_v2, %v5256_v2  ;;  %v1556_v31 = vpop.f32.mrf.mxu0  ;;  %v1669_v35 = vmul.f32 %v5259_v0, %v5259_v0 }
 0x2cf   :  { %v1762_v46 = vmul.f32 0.033333335, %v1709_v25  ;;  %v1719_v40 = vadd.f32 %v1718_v49, %v1717_v59  ;;  %v1645_v36 = vpop.f32.mrf.mxu1  ;;  %v5273_v52 = vadd.f32 %v1554_v6, %v5167_v44  ;;  %v1671_v30 = vmul.f32 %v5262_v50, %v5262_v50 }
 0x2d0   :  { %v1768_v11 = vadd.f32 1e-05, %v1760_v15  ;;  %v1761_v45 = vmul.f32 0.033333335, %v1699_v4  ;;  %v5278_v16 = vadd.f32 %v1643_v38, %v5167_v44  ;;  %v5283_v58 = vadd.f32 %v1556_v31, %v5167_v44 }
 0x2d1   :  { %v1770_v51 = vadd.f32 1e-05, %v1762_v46  ;;  %v1763_v60 = vmul.f32 0.033333335, %v1719_v40  ;;  %v1676_v55 = vmul.f32 %v5273_v52, %v5273_v52  ;;  %v5286_v14 = vadd.f32 %v1645_v36, %v5167_v44 }
 0x2d2   :  { %4093 = vrsqrt.f32 %v1768_v11  ;;  %v1769_v43 = vadd.f32 1e-05, %v1761_v45  ;;  %v1750_v5 = vadd.f32 %v1663_v7, %v1655_v1  ;;  %v1721_v25 = vadd.f32 %v1720_v56, %v1668_v47 }
 0x2d3   :  { %4095 = vrsqrt.f32 %v1770_v51  ;;  %v1771_v59 = vadd.f32 1e-05, %v1763_v60  ;;  %v1678_v49 = vmul.f32 %v5278_v16, %v5278_v16  ;;  %v1741_v6 = vadd.f32 %v1740_v53, %v1670_v24 }
 0x2d4   :  { %4097 = vrsqrt.f32 %v1769_v43  ;;  %v1722_v15 = vsel %vm532_vm2, %v1676_v55, 0.0  ;;  %v1677_v4 = vmul.f32 %v5283_v58, %v5283_v58  ;;  %v1679_v38 = vmul.f32 %v5286_v14, %v5286_v14  ;;  %v5298_v43 = vpop.permute.xlu0 %1838 }
 0x2d5   :  { %4099 = vrsqrt.f32 %v1771_v59  ;;  %v1731_v46 = vadd.f32 %v1730_v27, %v1669_v35  ;;  %v1751_v40 = vadd.f32 %v1750_v5, %v1671_v30  ;;  %v1723_v11 = vadd.f32 %v1722_v15, %v1721_v25 }
 0x2d6   :  { %v1742_v44 = vsel %vm532_vm2, %v1678_v49, 0.0  ;;  %v1732_v1 = vsel %vm532_vm2, %v1677_v4, 0.0  ;;  %v1752_v56 = vsel %vm532_vm2, %v1679_v38, 0.0 }
 0x2d7   :  { %v1743_v45 = vadd.f32 %v1742_v44, %v1741_v6  ;;  %v1724_v7 = vrot.slane %v1723_v11, 4  ;;  %v1733_v53 = vadd.f32 %v1732_v1, %v1731_v46  ;;  %v1753_v51 = vadd.f32 %v1752_v56, %v1751_v40 }
 0x2d9   :  { %v1744_v60 = vrot.slane %v1743_v45, 4  ;;  %v1725_v47 = vadd.f32 %v1724_v7, %v1723_v11  ;;  %v1734_v24 = vrot.slane %v1733_v53, 4  ;;  %v1754_v31 = vrot.slane %v1753_v51, 4 }
 0x2db   :  { %v1745_v36 = vadd.f32 %v1744_v60, %v1743_v45  ;;  %v1726_v27 = vrot.slane %v1725_v47, 2  ;;  %v1735_v35 = vadd.f32 %v1734_v24, %v1733_v53  ;;  %v1755_v59 = vadd.f32 %v1754_v31, %v1753_v51  ;;  %v5323_v53 = vpop.permute.xlu1 %1833  ;;  %v5325_v51 = vpop.permute.xlu0 %1895 }
 0x2dd   :  { %v1746_v30 = vrot.slane %v1745_v36, 2  ;;  %v1727_v5 = vadd.f32 %v1726_v27, %v1725_v47  ;;  %v1736_v25 = vrot.slane %v1735_v35, 2  ;;  %v1756_v49 = vrot.slane %v1755_v59, 2 }
 0x2df   :  { %v5300_v55 = vpop.eup %4093  ;;  %v1747_v4 = vadd.f32 %v1746_v30, %v1745_v36  ;;  %v1728_v44 = vrot.slane %v1727_v5, 1  ;;  %v1737_v45 = vadd.f32 %v1736_v25, %v1735_v35  ;;  %v1757_v1 = vadd.f32 %v1756_v49, %v1755_v59 }
 0x2e0   :  { %v5302_v6 = vpop.eup %4095  ;;  %v1808_v15 = vmul.f32 %v5300_v55, %v5185_v19  ;;  %v1800_v38 = vmul.f32 %v5300_v55, %v5150_v3  ;;  %v5310_v46 = vmul.f32 %v5300_v55, %v5127_v29 }
 0x2e1   :  { %v5312_v40 = vpop.eup %4097  ;;  %v1810_v11 = vmul.f32 %v5302_v6, %v5192_v62  ;;  %v1748_v3 = vrot.slane %v1747_v4, 1  ;;  %v1729_v47 = vadd.f32 %v1728_v44, %v1727_v5  ;;  %v1738_v24 = vrot.slane %v1737_v45, 1 }
 0x2e2   :  { %v5316_v56 = vpop.eup %4099  ;;  %v1865_v19 = vmul.f32 %v5298_v43, %v1808_v15  ;;  %v1809_v7 = vmul.f32 %v5312_v40, %v5199_v21  ;;  %v1801_v29 = vmul.f32 %v5312_v40, %v5165_v48  ;;  %v1758_v27 = vrot.slane %v1757_v1, 1 }
 0x2e3   :  { %v1867_v62 = vmul.f32 %v5298_v43, %v1810_v11  ;;  %v1811_v60 = vmul.f32 %v5316_v56, %v5204_v42  ;;  %v1749_v21 = vadd.f32 %v1748_v3, %v1747_v4  ;;  %v1764_v59 = vmul.f32 0.033333335, %v1729_v47 }
 0x2e4   :  { %v1922_v31 = vadd.f32 %v5325_v51, %v1865_v19  ;;  %v1866_v36 = vmul.f32 %v5298_v43, %v1809_v7  ;;  %v1739_v30 = vadd.f32 %v1738_v24, %v1737_v45  ;;  %v1759_v11 = vadd.f32 %v1758_v27, %v1757_v1  ;;  %v5342_v45 = vpop.permute.xlu0 %1890 }
 0x2e5   :  { %v1924_v35 = vadd.f32 %v5325_v51, %v1867_v62  ;;  %v1868_v48 = vmul.f32 %v5298_v43, %v1811_v60  ;;  %v1766_v15 = vmul.f32 0.033333335, %v1749_v21  ;;  %v1772_v44 = vadd.f32 1e-05, %v1764_v59  ;;  %v5340_v60 = vpop.permute.xlu1 %1828 }
 0x2e6   :  { %v1954_v25 = vmax.f32 %v1922_v31, 0.0  ;;  %v1923_v49 = vadd.f32 %v5325_v51, %v1866_v36  ;;  %v1765_v19 = vmul.f32 0.033333335, %v1739_v30  ;;  %v6631_v7 = vmax.f32 %v4453_v22, 0.0 }
 0x2e7   :  { %v1956_v42 = vmax.f32 %v1924_v35, 0.0  ;;  %v1925_v5 = vadd.f32 %v5325_v51, %v1868_v48  ;;  %v1774_v62 = vadd.f32 1e-05, %v1766_v15  ;;  %v1767_v20 = vmul.f32 0.033333335, %v1759_v11  ;;  %v6635_v35 = vld [vmem:[#allocation7_spill] sm:$0xff] }
 0x2e8   :  { %v5338_v4 = vadd.f32 %v1954_v25, %v6631_v7  ;;  %v1955_v3 = vmax.f32 %v1923_v49, 0.0  ;;  %v6632_v47 = vmax.f32 %v4456_v23, 0.0  ;;  %4101 = vrsqrt.f32 %v1772_v44  ;;  %v6638_v7 = vld [vmem:[#allocation5_spill] sm:$0xff] }
 0x2e9   :  { %v1957_v1 = vmax.f32 %v1925_v5, 0.0  ;;  %v1773_v31 = vadd.f32 1e-05, %v1765_v19  ;;  %4103 = vrsqrt.f32 %v1774_v62  ;;  %v1775_v36 = vadd.f32 1e-05, %v1767_v20  ;;  %v5381_v11 = vpop.permute.xlu1 %1823 }
 0x2ea   :  { %v5346_v24 = vadd.f32 %v1956_v42, %v6632_v47  ;;  %v6633_v22 = vmax.f32 %v4465_v28, 0.0  ;;  %v1858_v27 = vmul.f32 %v5323_v53, %v1801_v29  ;;  %v6636_v48 = vmax.f32 %v6635_v35, 0.0  ;;  %v5383_v42 = vpop.permute.xlu0 %1885 }
 0x2eb   :  { %4105 = vrsqrt.f32 %v1773_v31  ;;  %v1803_v23 = vmul.f32 %v5316_v56, %v5176_v8  ;;  %v1857_v30 = vmul.f32 %v5323_v53, %v1800_v38  ;;  %v1802_v20 = vmul.f32 %v5302_v6, %v5158_v9 }
 0x2ec   :  { %v5350_v21 = vadd.f32 %v1955_v3, %v6633_v22  ;;  %v5355_v59 = vadd.f32 %v1957_v1, %v6636_v48  ;;  %4107 = vrsqrt.f32 %v1775_v36  ;;  %v1915_v28 = vadd.f32 %v5342_v45, %v1858_v27  ;;  %v6641_v36 = vld [vmem:[#allocation8_spill] sm:$0xff] }
 0x2ed   :  { %v1793_v29 = vmul.f32 %v5312_v40, %v5141_v37  ;;  %v1860_v8 = vmul.f32 %v5323_v53, %v1803_v23  ;;  %v1914_v38 = vadd.f32 %v5342_v45, %v1857_v30  ;;  %v1795_v25 = vmul.f32 %v5316_v56, %v5147_v32 }
 0x2ee   :  { %6634 = vst [vmem:[#allocation35_spill] sm:$0xff] %v5350_v21  ;;  %6637 = vst [vmem:[#allocation7_spill] sm:$0xff] %v5355_v59  ;;  %3978 = vmatprep.subr.msk.mxu0 %vm532_vm2, %v5350_v21  ;;  %3984 = vmatprep.subr.msk.mxu1 %vm532_vm2, %v5355_v59  ;;  %v1947_v9 = vmax.f32 %v1915_v28, 0.0  ;;  %v1859_v49 = vmul.f32 %v5323_v53, %v1802_v20  ;;  %v1849_v15 = vmul.f32 %v5340_v60, %v5310_v46  ;;  %v6644_v20 = vld [vmem:[#allocation6_spill] sm:$0xff] }
 0x2ef   :  { %3979 = vmatpush1.msk.msra.mxu0 %vm532_vm2, %v5338_v4  ;;  %3985 = vmatpush1.msk.msra.mxu1 %vm532_vm2, %v5346_v24  ;;  %v1850_v37 = vmul.f32 %v5340_v60, %v1793_v29  ;;  %v1917_v5 = vadd.f32 %v5342_v45, %v1860_v8  ;;  %v1946_v44 = vmax.f32 %v1914_v38, 0.0  ;;  %v1852_v32 = vmul.f32 %v5340_v60, %v1795_v25 }
 0x2f0   :  { %v1794_v19 = vmul.f32 %v5302_v6, %v5133_v39  ;;  %v6639_v3 = vmax.f32 %v6638_v7, 0.0  ;;  %v1916_v47 = vadd.f32 %v5342_v45, %v1859_v49  ;;  %v1906_v1 = vadd.f32 %v5383_v42, %v1849_v15  ;;  %v6647_v49 = vld [vmem:[#allocation9_spill] sm:$0xff] }
 0x2f1   :  { %v1907_v46 = vadd.f32 %v5383_v42, %v1850_v37  ;;  %v1949_v31 = vmax.f32 %v1917_v5, 0.0  ;;  %v6642_v22 = vmax.f32 %v6641_v36, 0.0  ;;  %v1909_v35 = vadd.f32 %v5383_v42, %v1852_v32  ;;  %v6650_v5 = vld [vmem:[#allocation10_spill] sm:$0xff] }
 0x2f2   :  { %v5391_v62 = vadd.f32 %v1947_v9, %v6639_v3  ;;  %v1851_v48 = vmul.f32 %v5340_v60, %v1794_v19  ;;  %v1948_v39 = vmax.f32 %v1916_v47, 0.0  ;;  %v1938_v30 = vmax.f32 %v1906_v1, 0.0  ;;  %v5426_v3 = vpop.permute.xlu1 %1880  ;;  %v6656_v47 = vld [vmem:[#allocation11_spill] sm:$0xff] }
 0x2f3   :  { %v5398_v27 = vadd.f32 %v1946_v44, %v6642_v22  ;;  %v1939_v23 = vmax.f32 %v1907_v46, 0.0  ;;  %v1785_v28 = vmul.f32 %v5312_v40, %v5144_v33  ;;  %v6645_v29 = vmax.f32 %v6644_v20, 0.0  ;;  %v6653_v33 = vld [vmem:[#allocation12_spill] sm:$0xff] }
 0x2f4   :  { %6640 = vst [vmem:[#allocation5_spill] sm:$0xff] %v5391_v62  ;;  %2086 = vmatprep.subr.mxu0 %v5391_v62  ;;  %v1941_v38 = vmax.f32 %v1909_v35, 0.0  ;;  %v1908_v25 = vadd.f32 %v5383_v42, %v1851_v48  ;;  %v1787_v9 = vmul.f32 %v5316_v56, %v5153_v26  ;;  %v6648_v37 = vmax.f32 %v6647_v49, 0.0 }
 0x2f5   :  { %6643 = vst [vmem:[#allocation8_spill] sm:$0xff] %v5398_v27  ;;  %v5407_v8 = vadd.f32 %v1949_v31, %v6645_v29  ;;  %2087 = vmatpush1.msra.mxu0 %v5398_v27  ;;  %v6651_v44 = vmax.f32 %v6650_v5, 0.0  ;;  %v6654_v40 = vmax.f32 %v6653_v33, 0.0  ;;  %v1842_v7 = vmul.f32 %v5381_v11, %v1785_v28  ;;  %v5436_v36 = vpop.eup %4101  ;;  %v6662_v5 = vld [vmem:[#allocation14_spill] sm:$0xff] }
 0x2f6   :  { %v5415_v15 = vadd.f32 %v1948_v39, %v6648_v37  ;;  %v6657_v26 = vmax.f32 %v6656_v47, 0.0  ;;  %v1940_v46 = vmax.f32 %v1908_v25, 0.0  ;;  %v1844_v1 = vmul.f32 %v5381_v11, %v1787_v9  ;;  %v5443_v48 = vpop.eup %4103  ;;  %v6665_v47 = vld [vmem:[#allocation15_spill] sm:$0xff] }
 0x2f7   :  { %6646 = vst [vmem:[#allocation6_spill] sm:$0xff] %v5407_v8  ;;  %v5419_v32 = vadd.f32 %v1939_v23, %v6651_v44  ;;  %v5423_v19 = vadd.f32 %v1938_v30, %v6654_v40  ;;  %2175 = vmatprep.subr.mxu1 %v5407_v8  ;;  %v1784_v31 = vmul.f32 %v5300_v55, %v5130_v57  ;;  %v6659_v57 = vld [vmem:[#allocation13_spill] sm:$0xff]  ;;  %v6663_v44 = vmax.f32 %v6662_v5, 0.0 }
 0x2f8   :  { %6649 = vst [vmem:[#allocation9_spill] sm:$0xff] %v5415_v15  ;;  %v5431_v56 = vadd.f32 %v1941_v38, %v6657_v26  ;;  %2176 = vmatpush1.msra.mxu1 %v5415_v15  ;;  %v1899_v22 = vadd.f32 %v5426_v3, %v1842_v7  ;;  %v1786_v35 = vmul.f32 %v5302_v6, %v5138_v54  ;;  %v6660_v55 = vmax.f32 %v6659_v57, 0.0  ;;  %v5454_v28 = vpop.eup %4105 }
 0x2f9   :  { %6652 = vst [vmem:[#allocation10_spill] sm:$0xff] %v5419_v32  ;;  %6655 = vst [vmem:[#allocation12_spill] sm:$0xff] %v5423_v19  ;;  %2088 = vmatprep.subr.mxu0 %v5419_v32  ;;  %v1812_v39 = vmul.f32 %v5436_v36, %v5273_v52  ;;  %v1901_v30 = vadd.f32 %v5426_v3, %v1844_v1  ;;  %v1814_v54 = vmul.f32 %v5443_v48, %v5278_v16  ;;  %v5460_v29 = vpop.eup %4107 }
 0x2fa   :  { %6658 = vst [vmem:[#allocation11_spill] sm:$0xff] %v5431_v56  ;;  %2177 = vmatprep.subr.mxu1 %v5431_v56  ;;  %2089 = vmatpush1.msra.mxu0 %v5423_v19  ;;  %v5451_v23 = vadd.f32 %v1940_v46, %v6660_v55  ;;  %v1931_v6 = vmax.f32 %v1899_v22, 0.0  ;;  %v1841_v20 = vmul.f32 %v5381_v11, %v1784_v31  ;;  %v6666_v26 = vmax.f32 %v6665_v47, 0.0 }
 0x2fb   :  { %v1843_v52 = vmul.f32 %v5381_v11, %v1786_v35  ;;  %v1869_v38 = vmul.f32 %v5298_v43, %v1812_v39  ;;  %v1813_v25 = vmul.f32 %v5454_v28, %v5283_v58  ;;  %v1933_v9 = vmax.f32 %v1901_v30, 0.0 }
 0x2fc   :  { %6661 = vst [vmem:[#allocation13_spill] sm:$0xff] %v5451_v23  ;;  %2178 = vmatpush1.msra.mxu1 %v5451_v23  ;;  %v1805_v49 = vmul.f32 %v5454_v28, %v5259_v0  ;;  %v1871_v16 = vmul.f32 %v5298_v43, %v1814_v54  ;;  %v1815_v37 = vmul.f32 %v5460_v29, %v5286_v14 }
 0x2fd   :  { %v5473_v33 = vadd.f32 %v1931_v6, %v6663_v44  ;;  %v1898_v40 = vadd.f32 %v5426_v3, %v1841_v20  ;;  %v1926_v7 = vadd.f32 %v5325_v51, %v1869_v38  ;;  %v1870_v58 = vmul.f32 %v5298_v43, %v1813_v25  ;;  %v6668_v6 = vld [vmem:[#allocation16_spill] sm:$0xff]  ;;  %v6671_v25 = vld [vmem:[#allocation18_spill] sm:$0xff]  ;;  %v6677_v44 = vld [vmem:[#allocation19_spill] sm:$0xff] }
 0x2fe   :  { %v5480_v46 = vadd.f32 %v1933_v9, %v6666_v26  ;;  %v1900_v0 = vadd.f32 %v5426_v3, %v1843_v52  ;;  %v1928_v1 = vadd.f32 %v5325_v51, %v1871_v16  ;;  %v1872_v14 = vmul.f32 %v5298_v43, %v1815_v37  ;;  %v5499_v52 = vld [vmem:[%s6499_s3 + $0x40] sm:$0xff] }
 0x2ff   :  { %6664 = vst [vmem:[#allocation14_spill] sm:$0xff] %v5473_v33  ;;  %2090 = vmatprep.subr.mxu0 %v5473_v33  ;;  %v1930_v31 = vmax.f32 %v1898_v40, 0.0  ;;  %v1862_v22 = vmul.f32 %v5323_v53, %v1805_v49  ;;  %v1958_v35 = vmax.f32 %v1926_v7, 0.0  ;;  %v1927_v39 = vadd.f32 %v5325_v51, %v1870_v58 }
 0x300   :  { %6667 = vst [vmem:[#allocation15_spill] sm:$0xff] %v5480_v46  ;;  %2179 = vmatprep.subr.mxu1 %v5480_v46  ;;  %v1932_v57 = vmax.f32 %v1900_v0, 0.0  ;;  %v1807_v55 = vmul.f32 %v5460_v29, %v5262_v50  ;;  %v1960_v30 = vmax.f32 %v1928_v1, 0.0  ;;  %v1929_v54 = vadd.f32 %v5325_v51, %v1872_v14  ;;  %v6674_v50 = vld [vmem:[#allocation17_spill] sm:$0xff]  ;;  %v6680_v0 = vld [vmem:[#allocation20_spill] sm:$0xff] }
 0x301   :  { %v6669_v20 = vmax.f32 %v6668_v6, 0.0  ;;  %v1919_v38 = vadd.f32 %v5342_v45, %v1862_v22  ;;  %v6672_v9 = vmax.f32 %v6671_v25, 0.0  ;;  %v1959_v16 = vmax.f32 %v1927_v39, 0.0 }
 0x302   :  { %v6675_v37 = vmax.f32 %v6674_v50, 0.0  ;;  %v1864_v51 = vmul.f32 %v5323_v53, %v1807_v55  ;;  %v6678_v40 = vmax.f32 %v6677_v44, 0.0  ;;  %v1961_v58 = vmax.f32 %v1929_v54, 0.0  ;;  %v6686_v55 = vld [vmem:[#allocation22_spill] sm:$0xff] }
 0x303   :  { %v5494_v43 = vadd.f32 %v1930_v31, %v6669_v20  ;;  %v5504_v49 = vadd.f32 %v1958_v35, %v6672_v9  ;;  %v1951_v47 = vmax.f32 %v1919_v38, 0.0  ;;  %v1804_v26 = vmul.f32 %v5436_v36, %v5253_v63  ;;  %v5534_v63 = vld [vmem:[%s6499_s3 + $0x48] sm:$0xff]  ;;  %v6683_v35 = vld [vmem:[#allocation21_spill] sm:$0xff] }
 0x304   :  { %v5508_v5 = vadd.f32 %v1932_v57, %v6675_v37  ;;  %v5513_v7 = vadd.f32 %v1960_v30, %v6678_v40  ;;  %v6681_v1 = vmax.f32 %v6680_v0, 0.0  ;;  %v1921_v31 = vadd.f32 %v5342_v45, %v1864_v51 }
 0x305   :  { %6670 = vst [vmem:[#allocation16_spill] sm:$0xff] %v5494_v43  ;;  %6673 = vst [vmem:[#allocation18_spill] sm:$0xff] %v5504_v49  ;;  %2091 = vmatpush1.msra.mxu0 %v5494_v43  ;;  %v1806_v22 = vmul.f32 %v5443_v48, %v5256_v2  ;;  %v6684_v39 = vmax.f32 %v6683_v35, 0.0  ;;  %v6687_v30 = vmax.f32 %v6686_v55, 0.0  ;;  %v1861_v2 = vmul.f32 %v5323_v53, %v1804_v26  ;;  %v6695_v55 = vld [vmem:[#allocation25_spill] sm:$0xff] }
 0x306   :  { %6676 = vst [vmem:[#allocation17_spill] sm:$0xff] %v5508_v5  ;;  %6679 = vst [vmem:[#allocation19_spill] sm:$0xff] %v5513_v7  ;;  %2180 = vmatpush1.msra.mxu1 %v5508_v5  ;;  %3980 = vmatmul.mubr.msk.f32.vlgmr.msra.gmra.mxu0 %vm519_vm3, %v5499_v52  ;;  %v5523_v14 = vadd.f32 %v1959_v16, %v6681_v1  ;;  %v1953_v6 = vmax.f32 %v1921_v31, 0.0  ;;  %v1797_v38 = vmul.f32 %v5454_v28, %v5233_v41  ;;  %v6689_v41 = vld [vmem:[#allocation23_spill] sm:$0xff]  ;;  %v6692_v1 = vld [vmem:[#allocation24_spill] sm:$0xff] }
 0x307   :  { %3986 = vmatmul.mubr.msk.f32.vlgmr.msra.gmra.mxu1 %vm519_vm3, %v5499_v52  ;;  %2130 = vmatprep.mubr.f32.mxu0 %v6629_v10  ;;  %v5538_v57 = vadd.f32 %v1961_v58, %v6684_v39  ;;  %v5542_v54 = vadd.f32 %v1951_v47, %v6687_v30  ;;  %v1863_v20 = vmul.f32 %v5323_v53, %v1806_v22  ;;  %v6693_v31 = vmax.f32 %v6692_v1, 0.0 }
 0x308   :  { %6682 = vst [vmem:[#allocation20_spill] sm:$0xff] %v5523_v14  ;;  %2219 = vmatprep.mubr.f32.mxu1 %v6629_v10  ;;  %3990 = vmatprep.subr.msk.mxu0 %vm532_vm2, %v5523_v14  ;;  %v1799_v25 = vmul.f32 %v5460_v29, %v5250_v34  ;;  %v1918_v9 = vadd.f32 %v5342_v45, %v1861_v2  ;;  %v6690_v34 = vmax.f32 %v6689_v41, 0.0 }
 0x309   :  { %6685 = vst [vmem:[#allocation21_spill] sm:$0xff] %v5538_v57  ;;  %6688 = vst [vmem:[#allocation22_spill] sm:$0xff] %v5542_v54  ;;  %3996 = vmatprep.subr.msk.mxu1 %vm532_vm2, %v5538_v57  ;;  %3991 = vmatpush1.msk.msra.mxu0 %vm532_vm2, %v5504_v49  ;;  %v1796_v16 = vmul.f32 %v5436_v36, %v5224_v13  ;;  %v1798_v53 = vmul.f32 %v5443_v48, %v5230_v61  ;;  %v5578_v13 = vld [vmem:[%s6499_s3 + $0x50] sm:$0xff] }
 0x30a   :  { %3981 = vmatmul.mubr.msk.f32.gmra.mxu0 %vm519_vm3, %v5534_v63  ;;  %3997 = vmatpush1.msk.msra.mxu1 %vm532_vm2, %v5513_v7  ;;  %v5568_v50 = vadd.f32 %v1953_v6, %v6690_v34  ;;  %v1920_v37 = vadd.f32 %v5342_v45, %v1863_v20  ;;  %v1854_v51 = vmul.f32 %v5340_v60, %v1797_v38  ;;  %v1950_v61 = vmax.f32 %v1918_v9, 0.0  ;;  %v6701_v34 = vld [vmem:[#allocation27_spill] sm:$0xff] }
 0x30b   :  { %3987 = vmatmul.mubr.msk.f32.gmra.mxu1 %vm519_vm3, %v5534_v63  ;;  %2136 = vmatprep.mubr.f32.mxu0 %v6629_v10  ;;  %v1856_v44 = vmul.f32 %v5340_v60, %v1799_v25  ;;  %v1853_v40 = vmul.f32 %v5340_v60, %v1796_v16  ;;  %v1855_v58 = vmul.f32 %v5340_v60, %v1798_v53  ;;  %v6698_v25 = vld [vmem:[#allocation26_spill] sm:$0xff] }
 0x30c   :  { %6691 = vst [vmem:[#allocation23_spill] sm:$0xff] %v5568_v50  ;;  %2225 = vmatprep.mubr.f32.mxu1 %v6629_v10  ;;  %2264 = vmatprep.subr.mxu0 %v5542_v54  ;;  %v1952_v45 = vmax.f32 %v1920_v37, 0.0  ;;  %v1911_v47 = vadd.f32 %v5383_v42, %v1854_v51  ;;  %v1789_v26 = vmul.f32 %v5454_v28, %v5221_v17  ;;  %v6696_v17 = vmax.f32 %v6695_v55, 0.0  ;;  %v6714_v55 = vld [vmem:[#allocation31_spill] sm:$0xff] }
 0x30d   :  { %v1791_v0 = vmul.f32 %v5460_v29, %v5227_v12  ;;  %2353 = vmatprep.subr.mxu1 %v5568_v50  ;;  %v5593_v22 = vadd.f32 %v1950_v61, %v6693_v31  ;;  %v1913_v60 = vadd.f32 %v5383_v42, %v1856_v44  ;;  %v1910_v35 = vadd.f32 %v5383_v42, %v1853_v40  ;;  %v6704_v61 = vld [vmem:[#allocation28_spill] sm:$0xff]  ;;  %v6707_v40 = vld [vmem:[#allocation29_spill] sm:$0xff] }
 0x30e   :  { %v1912_v39 = vadd.f32 %v5383_v42, %v1855_v58  ;;  %3982 = vmatmul.mubr.msk.f32.gmra.mxu0 %vm519_vm3, %v5578_v13  ;;  %v5602_v28 = vadd.f32 %v1952_v45, %v6696_v17  ;;  %v1943_v12 = vmax.f32 %v1911_v47, 0.0  ;;  %v1846_v29 = vmul.f32 %v5381_v11, %v1789_v26  ;;  %v3973_v42 = vld [vmem:[%s6499_s3 + $0x58] sm:$0x3f] }
 0x30f   :  { %6694 = vst [vmem:[#allocation24_spill] sm:$0xff] %v5593_v22  ;;  %v1848_v30 = vmul.f32 %v5381_v11, %v1791_v0  ;;  %3988 = vmatmul.mubr.msk.f32.gmra.mxu1 %vm519_vm3, %v5578_v13  ;;  %2142 = vmatprep.mubr.f32.mxu0 %v6629_v10  ;;  %v1945_v2 = vmax.f32 %v1913_v60, 0.0  ;;  %v1942_v6 = vmax.f32 %v1910_v35, 0.0  ;;  %v1788_v38 = vmul.f32 %v5436_v36, %v5215_v18  ;;  %v6710_v0 = vld [vmem:[#allocation34_spill] sm:$0xff] }
 0x310   :  { %6697 = vst [vmem:[#allocation25_spill] sm:$0xff] %v5602_v28  ;;  %v1944_v20 = vmax.f32 %v1912_v39, 0.0  ;;  %2231 = vmatprep.mubr.f32.mxu1 %v6629_v10  ;;  %2265 = vmatpush1.msra.mxu0 %v5593_v22  ;;  %v6699_v9 = vmax.f32 %v6698_v25, 0.0  ;;  %v1903_v53 = vadd.f32 %v5426_v3, %v1846_v29  ;;  %v6702_v37 = vmax.f32 %v6701_v34, 0.0  ;;  %v6711_v60 = vld [vmem:[#allocation30_spill] sm:$0xff]  ;;  %v6720_v25 = vld [vmem:[#allocation33_spill] sm:$0xff] }
 0x311   :  { %v1905_v41 = vadd.f32 %v5426_v3, %v1848_v30  ;;  %2354 = vmatpush1.msra.mxu1 %v5602_v28  ;;  %v6705_v18 = vmax.f32 %v6704_v61, 0.0  ;;  %v1845_v44 = vmul.f32 %v5381_v11, %v1788_v38  ;;  %v6708_v58 = vmax.f32 %v6707_v40, 0.0 }
 0x312   :  { %v5618_v16 = vadd.f32 %v1943_v12, %v6699_v9  ;;  %v5625_v51 = vadd.f32 %v1945_v2, %v6702_v37  ;;  %3983 = vmatmul.mubr.msk.f32.gmra.mxu0 %vm519_vm3, %v3973_v42  ;;  %v1935_v47 = vmax.f32 %v1903_v53, 0.0  ;;  %v1790_v1 = vmul.f32 %v5443_v48, %v6710_v0  ;;  %v6717_v2 = vld [vmem:[#allocation32_spill] sm:$0xff]  ;;  %v5693_v37 = vpop.permute.xlu1 %2011 }
 0x313   :  { %v5629_v36 = vadd.f32 %v1942_v6, %v6705_v18  ;;  %v5636_v45 = vadd.f32 %v1944_v20, %v6708_v58  ;;  %v1937_v26 = vmax.f32 %v1905_v41, 0.0  ;;  %3989 = vmatmul.mubr.msk.f32.gmra.mxu1 %vm519_vm3, %v3973_v42  ;;  %v1902_v31 = vadd.f32 %v5426_v3, %v1845_v44  ;;  %2302 = vmatprep.mubr.f32.mxu0 %v6629_v10 }
 0x314   :  { %6700 = vst [vmem:[#allocation26_spill] sm:$0xff] %v5618_v16  ;;  %6703 = vst [vmem:[#allocation27_spill] sm:$0xff] %v5625_v51  ;;  %2266 = vmatprep.subr.mxu0 %v5618_v16  ;;  %2355 = vmatprep.subr.mxu1 %v5625_v51  ;;  %v6712_v35 = vmax.f32 %v6711_v60, 0.0  ;;  %v6715_v17 = vmax.f32 %v6714_v55, 0.0  ;;  %v1847_v48 = vmul.f32 %v5381_v11, %v1790_v1  ;;  %v6718_v6 = vmax.f32 %v6717_v2, 0.0 }
 0x315   :  { %6706 = vst [vmem:[#allocation28_spill] sm:$0xff] %v5629_v36  ;;  %6709 = vst [vmem:[#allocation29_spill] sm:$0xff] %v5636_v45  ;;  %2267 = vmatpush1.msra.mxu0 %v5629_v36  ;;  %2356 = vmatpush1.msra.mxu1 %v5636_v45  ;;  %v1934_v29 = vmax.f32 %v1902_v31, 0.0  ;;  %v6721_v11 = vmax.f32 %v6720_v25, 0.0 }
 0x316   :  { %v5647_v39 = vadd.f32 %v1935_v47, %v6712_v35  ;;  %v5651_v12 = vadd.f32 %v1937_v26, %v6715_v17  ;;  %2391 = vmatprep.mubr.f32.mxu1 %v6629_v10  ;;  %v1904_v30 = vadd.f32 %v5426_v3, %v1847_v48  ;;  %v5736_v25 = vpop.permute.xlu1 %2021 }
 0x317   :  { %v5661_v20 = vadd.f32 %v1934_v29, %v6718_v6 }
 0x318   :  { %6713 = vst [vmem:[#allocation34_spill] sm:$0xff] %v5647_v39  ;;  %6716 = vst [vmem:[#allocation30_spill] sm:$0xff] %v5651_v12  ;;  %2268 = vmatprep.subr.mxu0 %v5647_v39  ;;  %2357 = vmatprep.subr.mxu1 %v5651_v12  ;;  %v1936_v38 = vmax.f32 %v1904_v30, 0.0 }
 0x319   :  { %6719 = vst [vmem:[#allocation31_spill] sm:$0xff] %v5661_v20  ;;  %2269 = vmatpush1.msra.mxu0 %v5661_v20 }
 0x31a   :  { %v5666_v9 = vadd.f32 %v1936_v38, %v6721_v11  ;;  %3992 = vmatmul.mubr.msk.f32.vlgmr.msra.gmra.mxu0 %vm519_vm3, %v5499_v52 }
 0x31b   :  { %2308 = vmatprep.mubr.f32.mxu0 %v6629_v10 }
 0x31c   :  { %6722 = vst [vmem:[#allocation32_spill] sm:$0xff] %v5666_v9  ;;  %2358 = vmatpush1.msra.mxu1 %v5666_v9 }
 0x31d   :  { %3998 = vmatmul.mubr.msk.f32.vlgmr.msra.gmra.mxu1 %vm519_vm3, %v5499_v52 }
 0x31e   :  { %2397 = vmatprep.mubr.f32.mxu1 %v6629_v10  ;;  %3993 = vmatmul.mubr.msk.f32.gmra.mxu0 %vm519_vm3, %v5534_v63 }
 0x31f   :  { %2314 = vmatprep.mubr.f32.mxu0 %v6629_v10 }
 0x321   :  { %3999 = vmatmul.mubr.msk.f32.gmra.mxu1 %vm519_vm3, %v5534_v63  ;;  %v5691_v63 = vpop.permute.xlu0 %2006 }
 0x322   :  { %2403 = vmatprep.mubr.f32.mxu1 %v6629_v10  ;;  %3994 = vmatmul.mubr.msk.f32.gmra.mxu0 %vm519_vm3, %v5578_v13 }
 0x323   :  { %2320 = vmatprep.mubr.f32.mxu0 %v6629_v10 }
 0x325   :  { %4000 = vmatmul.mubr.msk.f32.gmra.mxu1 %vm519_vm3, %v5578_v13  ;;  %v5704_v58 = vpop.permute.xlu0 %2016 }
 0x326   :  { %2409 = vmatprep.mubr.f32.mxu1 %v6629_v10  ;;  %3995 = vmatmul.mubr.msk.f32.gmra.mxu0 %vm519_vm3, %v3973_v42 }
 0x327   :  { %2860 = vmatprep.mubr.f32.mxu0 %v6629_v10 }
 0x329   :  { %4001 = vmatmul.mubr.msk.f32.gmra.mxu1 %vm519_vm3, %v3973_v42  ;;  %v5867_v62 = vpop.permute.xlu0 %2606 }
 0x32a   :  { %2949 = vmatprep.mubr.f32.mxu1 %v6629_v10 }
 0x3c6   :  { %v2126_v3 = vpop.f32.mrf.mxu0 }
 0x3c7   :  { %v2215_v52 = vpop.f32.mrf.mxu1  ;;  %v5699_v44 = vadd.f32 %v2126_v3, %v5691_v63 }
 0x3c8   :  { %v2128_v53 = vpop.f32.mrf.mxu0  ;;  %v5707_v47 = vadd.f32 %v2215_v52, %v5691_v63 }
 0x3c9   :  { %v2217_v41 = vpop.f32.mrf.mxu1  ;;  %v5713_v1 = vadd.f32 %v2128_v53, %v5691_v63  ;;  %v2416_v30 = vmul.f32 %v5699_v44, %v5699_v44 }
 0x3ca   :  { %v2132_v34 = vpop.f32.mrf.mxu0  ;;  %v5722_v55 = vadd.f32 %v2217_v41, %v5691_v63  ;;  %v2418_v11 = vmul.f32 %v5707_v47, %v5707_v47 }
 0x3cb   :  { %v2221_v13 = vpop.f32.mrf.mxu1  ;;  %v5696_v61 = vadd.f32 %v2132_v34, %v5693_v37  ;;  %v2417_v34 = vmul.f32 %v5713_v1, %v5713_v1 }
 0x3cc   :  { %v2134_v18 = vpop.f32.mrf.mxu0  ;;  %v5702_v42 = vadd.f32 %v2221_v13, %v5693_v37 }
 0x3cd   :  { %v2223_v40 = vpop.f32.mrf.mxu1  ;;  %v5710_v26 = vadd.f32 %v2134_v18, %v5693_v37  ;;  %v2424_v17 = vmul.f32 %v5696_v61, %v5696_v61 }
 0x3ce   :  { %v2138_v0 = vpop.f32.mrf.mxu0  ;;  %v5716_v31 = vadd.f32 %v2223_v40, %v5693_v37  ;;  %v2426_v2 = vmul.f32 %v5702_v42, %v5702_v42 }
 0x3cf   :  { %v5719_v60 = vadd.f32 %v2138_v0, %v5704_v58  ;;  %v2227_v35 = vpop.f32.mrf.mxu1  ;;  %v2425_v3 = vmul.f32 %v5710_v26, %v5710_v26 }
 0x3d0   :  { %v5727_v48 = vadd.f32 %v2227_v35, %v5704_v58  ;;  %v2140_v29 = vpop.f32.mrf.mxu0  ;;  %v2427_v13 = vmul.f32 %v5716_v31, %v5716_v31  ;;  %v2419_v35 = vmul.f32 %v5722_v55, %v5722_v55  ;;  %v2468_v12 = vadd.f32 %v2426_v2, %v2418_v11 }
 0x3d1   :  { %v5734_v6 = vadd.f32 %v2140_v29, %v5704_v58  ;;  %v2229_v38 = vpop.f32.mrf.mxu1  ;;  %v2432_v52 = vmul.f32 %v5719_v60, %v5719_v60  ;;  %v2448_v29 = vadd.f32 %v2424_v17, %v2416_v30  ;;  %v2458_v51 = vadd.f32 %v2425_v3, %v2417_v34 }
 0x3d2   :  { %v5745_v53 = vadd.f32 %v2229_v38, %v5704_v58  ;;  %v2144_v41 = vpop.f32.mrf.mxu0  ;;  %v2434_v18 = vmul.f32 %v5727_v48, %v5727_v48  ;;  %v2478_v16 = vadd.f32 %v2427_v13, %v2419_v35 }
 0x3d3   :  { %v5754_v40 = vadd.f32 %v2144_v41, %v5736_v25  ;;  %v2233_v0 = vpop.f32.mrf.mxu1  ;;  %v2433_v38 = vmul.f32 %v5734_v6, %v5734_v6  ;;  %v2449_v17 = vadd.f32 %v2448_v29, %v2432_v52 }
 0x3d4   :  { %v5761_v9 = vadd.f32 %v2233_v0, %v5736_v25  ;;  %v2146_v20 = vpop.f32.mrf.mxu0  ;;  %v2435_v39 = vmul.f32 %v5745_v53, %v5745_v53  ;;  %v2469_v2 = vadd.f32 %v2468_v12, %v2434_v18 }
 0x3d5   :  { %v2440_v41 = vmul.f32 %v5754_v40, %v5754_v40  ;;  %v5768_v45 = vadd.f32 %v2146_v20, %v5736_v25  ;;  %v2235_v36 = vpop.f32.mrf.mxu1  ;;  %v2459_v22 = vadd.f32 %v2458_v51, %v2433_v38 }
 0x3d6   :  { %v2442_v30 = vmul.f32 %v5761_v9, %v5761_v9  ;;  %v5773_v0 = vadd.f32 %v2235_v36, %v5736_v25  ;;  %v2479_v52 = vadd.f32 %v2478_v16, %v2435_v39 }
 0x3d7   :  { %v2450_v11 = vsel %vm532_vm2, %v2440_v41, 0.0  ;;  %v2441_v28 = vmul.f32 %v5768_v45, %v5768_v45 }
 0x3d8   :  { %v2451_v50 = vadd.f32 %v2450_v11, %v2449_v17  ;;  %v2470_v20 = vsel %vm532_vm2, %v2442_v30, 0.0  ;;  %v2443_v3 = vmul.f32 %v5773_v0, %v5773_v0 }
 0x3d9   :  { %v2471_v34 = vadd.f32 %v2470_v20, %v2469_v2  ;;  %v2460_v29 = vsel %vm532_vm2, %v2441_v28, 0.0 }
 0x3da   :  { %v2452_v36 = vrot.slane %v2451_v50, 4  ;;  %v2461_v54 = vadd.f32 %v2460_v29, %v2459_v22  ;;  %v2480_v12 = vsel %vm532_vm2, %v2443_v3, 0.0  ;;  %v2304_v13 = vpop.f32.mrf.mxu0 }
 0x3db   :  { %v2472_v18 = vrot.slane %v2471_v34, 4  ;;  %v2481_v35 = vadd.f32 %v2480_v12, %v2479_v52  ;;  %v5784_v30 = vadd.f32 %v2304_v13, %v5691_v63 }
 0x3dc   :  { %v2453_v41 = vadd.f32 %v2452_v36, %v2451_v50  ;;  %v2462_v57 = vrot.slane %v2461_v54, 4  ;;  %v2306_v51 = vpop.f32.mrf.mxu0 }
 0x3dd   :  { %v2473_v38 = vadd.f32 %v2472_v18, %v2471_v34  ;;  %v2482_v17 = vrot.slane %v2481_v35, 4  ;;  %v2393_v11 = vpop.f32.mrf.mxu1  ;;  %v5787_v22 = vadd.f32 %v2306_v51, %v5691_v63 }
 0x3de   :  { %v2454_v16 = vrot.slane %v2453_v41, 2  ;;  %v2463_v39 = vadd.f32 %v2462_v57, %v2461_v54  ;;  %v2310_v2 = vpop.f32.mrf.mxu0  ;;  %v5793_v34 = vadd.f32 %v2393_v11, %v5691_v63  ;;  %v2420_v57 = vmul.f32 %v5784_v30, %v5784_v30 }
 0x3df   :  { %v2474_v28 = vrot.slane %v2473_v38, 2  ;;  %v2483_v20 = vadd.f32 %v2482_v17, %v2481_v35  ;;  %v2395_v3 = vpop.f32.mrf.mxu1  ;;  %v5790_v52 = vadd.f32 %v2310_v2, %v5693_v37  ;;  %v2421_v11 = vmul.f32 %v5787_v22, %v5787_v22 }
 0x3e0   :  { %v2455_v50 = vadd.f32 %v2454_v16, %v2453_v41  ;;  %v2464_v29 = vrot.slane %v2463_v39, 2  ;;  %v2312_v36 = vpop.f32.mrf.mxu0  ;;  %v5798_v51 = vadd.f32 %v2395_v3, %v5691_v63 }
 0x3e1   :  { %v2475_v12 = vadd.f32 %v2474_v28, %v2473_v38  ;;  %v2484_v13 = vrot.slane %v2483_v20, 2  ;;  %v2399_v54 = vpop.f32.mrf.mxu1  ;;  %v2428_v38 = vmul.f32 %v5790_v52, %v5790_v52  ;;  %v5810_v63 = vadd.f32 %v2312_v36, %v5693_v37 }
 0x3e2   :  { %v2456_v18 = vrot.slane %v2455_v50, 1  ;;  %v2465_v35 = vadd.f32 %v2464_v29, %v2463_v39  ;;  %v5801_v17 = vadd.f32 %v2399_v54, %v5693_v37  ;;  %v2316_v41 = vpop.f32.mrf.mxu0  ;;  %v2422_v39 = vmul.f32 %v5793_v34, %v5793_v34 }
 0x3e3   :  { %v2476_v16 = vrot.slane %v2475_v12, 1  ;;  %v2485_v2 = vadd.f32 %v2484_v13, %v2483_v20  ;;  %v2401_v28 = vpop.f32.mrf.mxu1 }
 0x3e4   :  { %v2457_v14 = vadd.f32 %v2456_v18, %v2455_v50  ;;  %v2466_v7 = vrot.slane %v2465_v35, 1  ;;  %v2318_v3 = vpop.f32.mrf.mxu0  ;;  %v2430_v20 = vmul.f32 %v5801_v17, %v5801_v17  ;;  %v5815_v13 = vadd.f32 %v2401_v28, %v5693_v37 }
 0x3e5   :  { %v2477_v29 = vadd.f32 %v2476_v16, %v2475_v12  ;;  %v2486_v54 = vrot.slane %v2485_v2, 1  ;;  %v2405_v5 = vpop.f32.mrf.mxu1  ;;  %v2423_v50 = vmul.f32 %v5798_v51, %v5798_v51  ;;  %v5820_v18 = vadd.f32 %v2316_v41, %v5704_v58 }
 0x3e6   :  { %v2528_v49 = vmul.f32 0.033333335, %v2457_v14  ;;  %v2467_v43 = vadd.f32 %v2466_v7, %v2465_v35  ;;  %v2322_v36 = vpop.f32.mrf.mxu0  ;;  %v2488_v12 = vadd.f32 %v2428_v38, %v2420_v57  ;;  %v5823_v16 = vadd.f32 %v2405_v5, %v5704_v58 }
 0x3e7   :  { %v2530_v46 = vmul.f32 0.033333335, %v2477_v29  ;;  %v2487_v33 = vadd.f32 %v2486_v54, %v2485_v2  ;;  %v2407_v23 = vpop.f32.mrf.mxu1  ;;  %v2429_v14 = vmul.f32 %v5810_v63, %v5810_v63  ;;  %v5828_v7 = vadd.f32 %v2318_v3, %v5704_v58 }
 0x3e8   :  { %v2536_v19 = vadd.f32 1e-05, %v2528_v49  ;;  %v2529_v37 = vmul.f32 0.033333335, %v2467_v43  ;;  %v2508_v41 = vadd.f32 %v2430_v20, %v2422_v39  ;;  %v2431_v29 = vmul.f32 %v5815_v13, %v5815_v13  ;;  %v2324_v49 = vpop.f32.mrf.mxu0 }
 0x3e9   :  { %v2538_v35 = vadd.f32 1e-05, %v2530_v46  ;;  %v2531_v28 = vmul.f32 0.033333335, %v2487_v33  ;;  %v2411_v2 = vpop.f32.mrf.mxu1  ;;  %v2436_v5 = vmul.f32 %v5820_v18, %v5820_v18  ;;  %v5835_v43 = vadd.f32 %v2407_v23, %v5704_v58 }
 0x3ea   :  { %4109 = vrsqrt.f32 %v2536_v19  ;;  %v2537_v57 = vadd.f32 1e-05, %v2529_v37  ;;  %v2438_v46 = vmul.f32 %v5823_v16, %v5823_v16  ;;  %v5840_v33 = vadd.f32 %v2322_v36, %v5736_v25 }
 0x3eb   :  { %4111 = vrsqrt.f32 %v2538_v35  ;;  %v2539_v38 = vadd.f32 1e-05, %v2531_v28  ;;  %v2413_v39 = vpop.f32.mrf.mxu1  ;;  %v2437_v19 = vmul.f32 %v5828_v7, %v5828_v7  ;;  %v2439_v3 = vmul.f32 %v5835_v43, %v5835_v43 }
 0x3ec   :  { %4113 = vrsqrt.f32 %v2537_v57  ;;  %v5847_v23 = vadd.f32 %v2411_v2, %v5736_v25  ;;  %v2444_v58 = vmul.f32 %v5840_v33, %v5840_v33  ;;  %v5852_v54 = vadd.f32 %v2324_v49, %v5736_v25 }
 0x3ed   :  { %4115 = vrsqrt.f32 %v2539_v38  ;;  %v5855_v20 = vadd.f32 %v2413_v39, %v5736_v25  ;;  %v2498_v36 = vadd.f32 %v2429_v14, %v2421_v11  ;;  %v2518_v37 = vadd.f32 %v2431_v29, %v2423_v50 }
 0x3ee   :  { %v2489_v35 = vadd.f32 %v2488_v12, %v2436_v5  ;;  %v2446_v28 = vmul.f32 %v5847_v23, %v5847_v23  ;;  %v2509_v57 = vadd.f32 %v2508_v41, %v2438_v46  ;;  %v2490_v2 = vsel %vm532_vm2, %v2444_v58, 0.0 }
 0x3ef   :  { %v2445_v38 = vmul.f32 %v5852_v54, %v5852_v54  ;;  %v2447_v56 = vmul.f32 %v5855_v20, %v5855_v20  ;;  %v2499_v49 = vadd.f32 %v2498_v36, %v2437_v19  ;;  %v2519_v32 = vadd.f32 %v2518_v37, %v2439_v3 }
 0x3f0   :  { %v2491_v8 = vadd.f32 %v2490_v2, %v2489_v35  ;;  %v2510_v25 = vsel %vm532_vm2, %v2446_v28, 0.0 }
 0x3f1   :  { %v2511_v11 = vadd.f32 %v2510_v25, %v2509_v57  ;;  %v2500_v50 = vsel %vm532_vm2, %v2445_v38, 0.0  ;;  %v2520_v12 = vsel %vm532_vm2, %v2447_v56, 0.0  ;;  %v5877_v38 = vpop.permute.xlu1 %2601 }
 0x3f2   :  { %v2492_v14 = vrot.slane %v2491_v8, 4  ;;  %v2501_v41 = vadd.f32 %v2500_v50, %v2499_v49  ;;  %v2521_v29 = vadd.f32 %v2520_v12, %v2519_v32 }
 0x3f3   :  { %v2512_v5 = vrot.slane %v2511_v11, 4 }
 0x3f4   :  { %v2493_v46 = vadd.f32 %v2492_v14, %v2491_v8  ;;  %v2502_v39 = vrot.slane %v2501_v41, 4  ;;  %v2522_v58 = vrot.slane %v2521_v29, 4 }
 0x3f5   :  { %v2513_v15 = vadd.f32 %v2512_v5, %v2511_v11  ;;  %v5890_v5 = vpop.permute.xlu0 %2663 }
 0x3f6   :  { %v2494_v19 = vrot.slane %v2493_v46, 2  ;;  %v2503_v3 = vadd.f32 %v2502_v39, %v2501_v41  ;;  %v2523_v36 = vadd.f32 %v2522_v58, %v2521_v29 }
 0x3f7   :  { %v5869_v37 = vpop.eup %4109  ;;  %v2514_v35 = vrot.slane %v2513_v15, 2 }
 0x3f8   :  { %v5871_v28 = vpop.eup %4111  ;;  %v2576_v56 = vmul.f32 %v5869_v37, %v5754_v40  ;;  %v2495_v57 = vadd.f32 %v2494_v19, %v2493_v46  ;;  %v2504_v32 = vrot.slane %v2503_v3, 2  ;;  %v2524_v2 = vrot.slane %v2523_v36, 2 }
 0x3f9   :  { %v5875_v8 = vpop.eup %4113  ;;  %v2578_v49 = vmul.f32 %v5871_v28, %v5761_v9  ;;  %v2515_v25 = vadd.f32 %v2514_v35, %v2513_v15  ;;  %v2568_v11 = vmul.f32 %v5869_v37, %v5719_v60  ;;  %v2570_v50 = vmul.f32 %v5871_v28, %v5727_v48 }
 0x3fa   :  { %v5885_v12 = vpop.eup %4115  ;;  %v2633_v40 = vmul.f32 %v5867_v62, %v2576_v56  ;;  %v2577_v14 = vmul.f32 %v5875_v8, %v5768_v45  ;;  %v2496_v41 = vrot.slane %v2495_v57, 1  ;;  %v2505_v29 = vadd.f32 %v2504_v32, %v2503_v3 }
 0x3fb   :  { %v2635_v9 = vmul.f32 %v5867_v62, %v2578_v49  ;;  %v2579_v15 = vmul.f32 %v5885_v12, %v5773_v0  ;;  %v2516_v60 = vrot.slane %v2515_v25, 1  ;;  %v2525_v46 = vadd.f32 %v2524_v2, %v2523_v36  ;;  %v5900_v0 = vpop.permute.xlu1 %2596 }
 0x3fc   :  { %v2690_v48 = vadd.f32 %v5890_v5, %v2633_v40  ;;  %v2634_v39 = vmul.f32 %v5867_v62, %v2577_v14  ;;  %v2497_v58 = vadd.f32 %v2496_v41, %v2495_v57  ;;  %v2506_v19 = vrot.slane %v2505_v29, 1 }
 0x3fd   :  { %v2692_v35 = vadd.f32 %v5890_v5, %v2635_v9  ;;  %v2636_v45 = vmul.f32 %v5867_v62, %v2579_v15  ;;  %v2517_v3 = vadd.f32 %v2516_v60, %v2515_v25  ;;  %v2526_v56 = vrot.slane %v2525_v46, 1  ;;  %v5905_v25 = vpop.permute.xlu0 %2658 }
 0x3fe   :  { %v2722_v32 = vmax.f32 %v2690_v48, 0.0  ;;  %v2691_v49 = vadd.f32 %v5890_v5, %v2634_v39  ;;  %v2532_v27 = vmul.f32 0.033333335, %v2497_v58  ;;  %v2507_v59 = vadd.f32 %v2506_v19, %v2505_v29 }
 0x3ff   :  { %v2724_v36 = vmax.f32 %v2692_v35, 0.0  ;;  %v2693_v2 = vadd.f32 %v5890_v5, %v2636_v45  ;;  %v2534_v40 = vmul.f32 0.033333335, %v2517_v3  ;;  %v2527_v14 = vadd.f32 %v2526_v56, %v2525_v46  ;;  %v5921_v19 = vpop.permute.xlu1 %2591 }
 0x400   :  { %v2723_v57 = vmax.f32 %v2691_v49, 0.0  ;;  %v2540_v41 = vadd.f32 1e-05, %v2532_v27  ;;  %v2533_v21 = vmul.f32 0.033333335, %v2507_v59  ;;  %v2569_v9 = vmul.f32 %v5875_v8, %v5734_v6 }
 0x401   :  { %v2725_v15 = vmax.f32 %v2693_v2, 0.0  ;;  %v2542_v60 = vadd.f32 1e-05, %v2534_v40  ;;  %v2535_v48 = vmul.f32 0.033333335, %v2527_v14  ;;  %v2571_v29 = vmul.f32 %v5885_v12, %v5745_v53 }
 0x402   :  { %4117 = vrsqrt.f32 %v2540_v41  ;;  %v2541_v39 = vadd.f32 1e-05, %v2533_v21  ;;  %4018 = vmatprep.subr.msk.mxu0 %vm532_vm2, %v2723_v57  ;;  %v2626_v46 = vmul.f32 %v5877_v38, %v2569_v9  ;;  %v2625_v27 = vmul.f32 %v5877_v38, %v2568_v11 }
 0x403   :  { %4119 = vrsqrt.f32 %v2542_v60  ;;  %v2543_v59 = vadd.f32 1e-05, %v2535_v48  ;;  %4024 = vmatprep.subr.msk.mxu1 %vm532_vm2, %v2725_v15  ;;  %4019 = vmatpush1.msk.msra.mxu0 %vm532_vm2, %v2722_v32  ;;  %v2628_v6 = vmul.f32 %v5877_v38, %v2571_v29  ;;  %v2627_v58 = vmul.f32 %v5877_v38, %v2570_v50 }
 0x404   :  { %4121 = vrsqrt.f32 %v2541_v39  ;;  %4025 = vmatpush1.msk.msra.mxu1 %vm532_vm2, %v2724_v36  ;;  %v2683_v21 = vadd.f32 %v5905_v25, %v2626_v46  ;;  %v2682_v53 = vadd.f32 %v5905_v25, %v2625_v27  ;;  %v2561_v11 = vmul.f32 %v5875_v8, %v5710_v26  ;;  %v5930_v36 = vpop.permute.xlu0 %2653 }
 0x405   :  { %4123 = vrsqrt.f32 %v2543_v59  ;;  %v2685_v35 = vadd.f32 %v5905_v25, %v2628_v6  ;;  %v2684_v45 = vadd.f32 %v5905_v25, %v2627_v58  ;;  %v2563_v50 = vmul.f32 %v5885_v12, %v5716_v31 }
 0x406   :  { %v2715_v3 = vmax.f32 %v2683_v21, 0.0  ;;  %v2714_v56 = vmax.f32 %v2682_v53, 0.0  ;;  %v2618_v32 = vmul.f32 %v5900_v0, %v2561_v11  ;;  %v2560_v49 = vmul.f32 %v5869_v37, %v5696_v61 }
 0x407   :  { %v2717_v26 = vmax.f32 %v2685_v35, 0.0  ;;  %v2716_v2 = vmax.f32 %v2684_v45, 0.0  ;;  %v2620_v40 = vmul.f32 %v5900_v0, %v2563_v50  ;;  %v2562_v14 = vmul.f32 %v5871_v28, %v5702_v42 }
 0x408   :  { %2822 = vmatprep.subr.mxu0 %v2715_v3  ;;  %v2675_v57 = vadd.f32 %v5930_v36, %v2618_v32  ;;  %v2617_v31 = vmul.f32 %v5900_v0, %v2560_v49  ;;  %v2553_v41 = vmul.f32 %v5875_v8, %v5713_v1  ;;  %v2555_v61 = vmul.f32 %v5885_v12, %v5722_v55  ;;  %v5948_v8 = vpop.permute.xlu1 %2648 }
 0x409   :  { %2911 = vmatprep.subr.mxu1 %v2717_v26  ;;  %2823 = vmatpush1.msra.mxu0 %v2714_v56  ;;  %v2677_v9 = vadd.f32 %v5930_v36, %v2620_v40  ;;  %v2619_v15 = vmul.f32 %v5900_v0, %v2562_v14  ;;  %v2552_v42 = vmul.f32 %v5869_v37, %v5699_v44 }
 0x40a   :  { %2912 = vmatpush1.msra.mxu1 %v2716_v2  ;;  %v2707_v60 = vmax.f32 %v2675_v57, 0.0  ;;  %v2674_v48 = vadd.f32 %v5930_v36, %v2617_v31  ;;  %v2610_v29 = vmul.f32 %v5921_v19, %v2553_v41  ;;  %v2612_v1 = vmul.f32 %v5921_v19, %v2555_v61 }
 0x40b   :  { %v2709_v55 = vmax.f32 %v2677_v9, 0.0  ;;  %v2676_v12 = vadd.f32 %v5930_v36, %v2619_v15  ;;  %v2609_v39 = vmul.f32 %v5921_v19, %v2552_v42  ;;  %v2554_v46 = vmul.f32 %v5871_v28, %v5707_v47  ;;  %v5964_v28 = vld [vmem:[%s6499_s3 + $0x60] sm:$0xff] }
 0x40c   :  { %2824 = vmatprep.subr.mxu0 %v2707_v60  ;;  %v2706_v44 = vmax.f32 %v2674_v48, 0.0  ;;  %v2667_v37 = vadd.f32 %v5948_v8, %v2610_v29  ;;  %v2669_v27 = vadd.f32 %v5948_v8, %v2612_v1 }
 0x40d   :  { %2913 = vmatprep.subr.mxu1 %v2709_v55  ;;  %v2708_v59 = vmax.f32 %v2676_v12, 0.0  ;;  %v2666_v6 = vadd.f32 %v5948_v8, %v2609_v39  ;;  %v2611_v58 = vmul.f32 %v5921_v19, %v2554_v46 }
 0x40e   :  { %2825 = vmatpush1.msra.mxu0 %v2706_v44  ;;  %v2699_v21 = vmax.f32 %v2667_v37, 0.0  ;;  %v2701_v53 = vmax.f32 %v2669_v27, 0.0 }
 0x40f   :  { %v5958_v11 = vpop.eup %4117  ;;  %2914 = vmatpush1.msra.mxu1 %v2708_v59  ;;  %v2698_v35 = vmax.f32 %v2666_v6, 0.0  ;;  %v2668_v47 = vadd.f32 %v5948_v8, %v2611_v58 }
 0x410   :  { %v5966_v45 = vpop.eup %4119  ;;  %v2580_v50 = vmul.f32 %v5958_v11, %v5840_v33  ;;  %2826 = vmatprep.subr.mxu0 %v2699_v21  ;;  %2915 = vmatprep.subr.mxu1 %v2701_v53  ;;  %v2572_v3 = vmul.f32 %v5958_v11, %v5820_v18 }
 0x411   :  { %v4122_v56 = vpop.eup %4121  ;;  %v2582_v32 = vmul.f32 %v5966_v45, %v5847_v23  ;;  %2827 = vmatpush1.msra.mxu0 %v2698_v35  ;;  %v2700_v49 = vmax.f32 %v2668_v47, 0.0  ;;  %v2574_v26 = vmul.f32 %v5966_v45, %v5823_v16  ;;  %v5988_v16 = vld [vmem:[%s6499_s3 + $0x68] sm:$0xff] }
 0x412   :  { %v4124_v2 = vpop.eup %4123  ;;  %v2637_v40 = vmul.f32 %v5867_v62, %v2580_v50  ;;  %v2581_v14 = vmul.f32 %v4122_v56, %v5852_v54  ;;  %4020 = vmatmul.mubr.msk.f32.vlgmr.msra.gmra.mxu0 %vm519_vm3, %v5964_v28  ;;  %v2573_v33 = vmul.f32 %v4122_v56, %v5828_v7  ;;  %v2629_v18 = vmul.f32 %v5877_v38, %v2572_v3 }
 0x413   :  { %v2639_v57 = vmul.f32 %v5867_v62, %v2582_v32  ;;  %v2583_v23 = vmul.f32 %v4124_v2, %v5855_v20  ;;  %2916 = vmatpush1.msra.mxu1 %v2700_v49  ;;  %2866 = vmatprep.mubr.f32.mxu0 %v6629_v10  ;;  %v2575_v54 = vmul.f32 %v4124_v2, %v5835_v43 }
 0x414   :  { %v2694_v31 = vadd.f32 %v5890_v5, %v2637_v40  ;;  %v2638_v7 = vmul.f32 %v5867_v62, %v2581_v14  ;;  %4026 = vmatmul.mubr.msk.f32.vlgmr.msra.gmra.mxu1 %vm519_vm3, %v5964_v28  ;;  %v2630_v41 = vmul.f32 %v5877_v38, %v2573_v33  ;;  %v2564_v20 = vmul.f32 %v5958_v11, %v5790_v52 }
 0x415   :  { %v2640_v61 = vmul.f32 %v5867_v62, %v2583_v23  ;;  %2955 = vmatprep.mubr.f32.mxu1 %v6629_v10  ;;  %v2632_v9 = vmul.f32 %v5877_v38, %v2575_v54  ;;  %v2686_v43 = vadd.f32 %v5905_v25, %v2629_v18  ;;  %v2631_v15 = vmul.f32 %v5877_v38, %v2574_v26  ;;  %v6015_v38 = vld [vmem:[%s6499_s3 + $0x70] sm:$0xff]  ;;  %v6085_v23 = vpop.permute.xlu0 %2742 }
 0x416   :  { %v2695_v42 = vadd.f32 %v5890_v5, %v2638_v7  ;;  %4021 = vmatmul.mubr.msk.f32.gmra.mxu0 %vm519_vm3, %v5988_v16  ;;  %v2687_v60 = vadd.f32 %v5905_v25, %v2630_v41  ;;  %v2566_v52 = vmul.f32 %v5966_v45, %v5801_v17  ;;  %v2726_v48 = vmax.f32 %v2694_v31, 0.0  ;;  %v6087_v41 = vpop.permute.xlu1 %2747 }
 0x417   :  { %v2696_v62 = vadd.f32 %v5890_v5, %v2639_v57  ;;  %v2697_v29 = vadd.f32 %v5890_v5, %v2640_v61  ;;  %2872 = vmatprep.mubr.f32.mxu0 %v6629_v10  ;;  %v2689_v55 = vadd.f32 %v5905_v25, %v2632_v9  ;;  %v2565_v17 = vmul.f32 %v4122_v56, %v5810_v63 }
 0x418   :  { %v2727_v1 = vmax.f32 %v2695_v42, 0.0  ;;  %4027 = vmatmul.mubr.msk.f32.gmra.mxu1 %vm519_vm3, %v5988_v16  ;;  %v2567_v12 = vmul.f32 %v4124_v2, %v5815_v13  ;;  %v2718_v5 = vmax.f32 %v2686_v43, 0.0  ;;  %v2688_v46 = vadd.f32 %v5905_v25, %v2631_v15 }
 0x419   :  { %v2729_v39 = vmax.f32 %v2697_v29, 0.0  ;;  %2961 = vmatprep.mubr.f32.mxu1 %v6629_v10  ;;  %v2621_v44 = vmul.f32 %v5900_v0, %v2564_v20  ;;  %v2719_v37 = vmax.f32 %v2687_v60, 0.0  ;;  %v2622_v27 = vmul.f32 %v5900_v0, %v2565_v17  ;;  %v6095_v15 = vpop.permute.xlu0 %2752 }
 0x41a   :  { %4022 = vmatmul.mubr.msk.f32.gmra.mxu0 %vm519_vm3, %v6015_v38  ;;  %4030 = vmatprep.subr.msk.mxu0 %vm532_vm2, %v2727_v1  ;;  %v2624_v63 = vmul.f32 %v5900_v0, %v2567_v12  ;;  %v2623_v13 = vmul.f32 %v5900_v0, %v2566_v52  ;;  %v2728_v59 = vmax.f32 %v2696_v62, 0.0  ;;  %v2557_v6 = vmul.f32 %v4122_v56, %v5787_v22  ;;  %v4013_v22 = vld [vmem:[%s6499_s3 + $0x78] sm:$0x3f] }
 0x41b   :  { %4036 = vmatprep.subr.msk.mxu1 %vm532_vm2, %v2729_v39  ;;  %4031 = vmatpush1.msk.msra.mxu0 %vm532_vm2, %v2726_v48  ;;  %v2678_v25 = vadd.f32 %v5930_v36, %v2621_v44  ;;  %v2559_v58 = vmul.f32 %v4124_v2, %v5798_v51  ;;  %v2721_v21 = vmax.f32 %v2689_v55, 0.0  ;;  %v2679_v53 = vadd.f32 %v5930_v36, %v2622_v27  ;;  %v6128_v44 = vpop.permute.xlu1 %2757 }
 0x41c   :  { %4028 = vmatmul.mubr.msk.f32.gmra.mxu1 %vm519_vm3, %v6015_v38  ;;  %3000 = vmatprep.subr.mxu0 %v2719_v37  ;;  %v2681_v0 = vadd.f32 %v5930_v36, %v2624_v63  ;;  %v2680_v35 = vadd.f32 %v5930_v36, %v2623_v13  ;;  %v2720_v47 = vmax.f32 %v2688_v46, 0.0  ;;  %v2614_v51 = vmul.f32 %v5921_v19, %v2557_v6 }
 0x41d   :  { %4037 = vmatpush1.msk.msra.mxu1 %vm532_vm2, %v2728_v59  ;;  %2878 = vmatprep.mubr.f32.mxu0 %v6629_v10  ;;  %v2616_v50 = vmul.f32 %v5921_v19, %v2559_v58  ;;  %v2556_v3 = vmul.f32 %v5958_v11, %v5784_v30  ;;  %v2711_v36 = vmax.f32 %v2679_v53, 0.0  ;;  %v2558_v56 = vmul.f32 %v5966_v45, %v5793_v34 }
 0x41e   :  { %3089 = vmatprep.subr.mxu1 %v2721_v21  ;;  %2967 = vmatprep.mubr.f32.mxu1 %v6629_v10  ;;  %v2713_v32 = vmax.f32 %v2681_v0, 0.0  ;;  %v2671_v49 = vadd.f32 %v5948_v8, %v2614_v51  ;;  %v2710_v30 = vmax.f32 %v2678_v25, 0.0  ;;  %v2712_v11 = vmax.f32 %v2680_v35, 0.0 }
 0x41f   :  { %3001 = vmatpush1.msra.mxu0 %v2718_v5  ;;  %3090 = vmatpush1.msra.mxu1 %v2720_v47  ;;  %v2673_v26 = vadd.f32 %v5948_v8, %v2616_v50  ;;  %v2613_v2 = vmul.f32 %v5921_v19, %v2556_v3  ;;  %v2615_v40 = vmul.f32 %v5921_v19, %v2558_v56 }
 0x420   :  { %4023 = vmatmul.mubr.msk.f32.gmra.mxu0 %vm519_vm3, %v4013_v22  ;;  %4029 = vmatmul.mubr.msk.f32.gmra.mxu1 %vm519_vm3, %v4013_v22  ;;  %v2703_v34 = vmax.f32 %v2671_v49, 0.0 }
 0x421   :  { %3002 = vmatprep.subr.mxu0 %v2711_v36  ;;  %3091 = vmatprep.subr.mxu1 %v2713_v32  ;;  %v2705_v45 = vmax.f32 %v2673_v26, 0.0  ;;  %v2670_v14 = vadd.f32 %v5948_v8, %v2613_v2  ;;  %v2672_v33 = vadd.f32 %v5948_v8, %v2615_v40 }
 0x422   :  { %3003 = vmatpush1.msra.mxu0 %v2710_v30  ;;  %3092 = vmatpush1.msra.mxu1 %v2712_v11 }
 0x423   :  { %3004 = vmatprep.subr.mxu0 %v2703_v34  ;;  %3093 = vmatprep.subr.mxu1 %v2705_v45  ;;  %v2702_v18 = vmax.f32 %v2670_v14, 0.0  ;;  %v2704_v57 = vmax.f32 %v2672_v33, 0.0 }
 0x424   :  { %3038 = vmatprep.mubr.f32.mxu0 %v6629_v10  ;;  %3127 = vmatprep.mubr.f32.mxu1 %v6629_v10 }
 0x425   :  { %3005 = vmatpush1.msra.mxu0 %v2702_v18  ;;  %3094 = vmatpush1.msra.mxu1 %v2704_v57 }
 0x426   :  { %4032 = vmatmul.mubr.msk.f32.vlgmr.msra.gmra.mxu0 %vm519_vm3, %v5964_v28  ;;  %4038 = vmatmul.mubr.msk.f32.vlgmr.msra.gmra.mxu1 %vm519_vm3, %v5964_v28 }
 0x427   :  { %3044 = vmatprep.mubr.f32.mxu0 %v6629_v10  ;;  %3133 = vmatprep.mubr.f32.mxu1 %v6629_v10 }
 0x42a   :  { %4033 = vmatmul.mubr.msk.f32.gmra.mxu0 %vm519_vm3, %v5988_v16  ;;  %4039 = vmatmul.mubr.msk.f32.gmra.mxu1 %vm519_vm3, %v5988_v16 }
 0x42b   :  { %3050 = vmatprep.mubr.f32.mxu0 %v6629_v10  ;;  %3139 = vmatprep.mubr.f32.mxu1 %v6629_v10 }
 0x42e   :  { %4034 = vmatmul.mubr.msk.f32.gmra.mxu0 %vm519_vm3, %v6015_v38  ;;  %4040 = vmatmul.mubr.msk.f32.gmra.mxu1 %vm519_vm3, %v6015_v38 }
 0x42f   :  { %3056 = vmatprep.mubr.f32.mxu0 %v6629_v10  ;;  %3145 = vmatprep.mubr.f32.mxu1 %v6629_v10 }
 0x432   :  { %4035 = vmatmul.mubr.msk.f32.gmra.mxu0 %vm519_vm3, %v4013_v22  ;;  %4041 = vmatmul.mubr.msk.f32.gmra.mxu1 %vm519_vm3, %v4013_v22 }
 0x433   :  { %3606 = vmatprep.mubr.f32.mxu0 %v6629_v10  ;;  %3683 = vmatprep.mubr.f32.mxu1 %v6629_v10 }
 0x4d2   :  { %v2862_v19 = vpop.f32.mrf.mxu0 }
 0x4d3   :  { %v6098_v42 = vadd.f32 %v2862_v19, %v6085_v23 }
 0x4d4   :  { %v2951_v8 = vpop.f32.mrf.mxu1  ;;  %v2864_v28 = vpop.f32.mrf.mxu0 }
 0x4d5   :  { %v6101_v60 = vadd.f32 %v2951_v8, %v6085_v23  ;;  %v6110_v38 = vadd.f32 %v2864_v28, %v6085_v23  ;;  %v3152_v37 = vmul.f32 %v6098_v42, %v6098_v42 }
 0x4d6   :  { %v2953_v16 = vpop.f32.mrf.mxu1  ;;  %v2868_v54 = vpop.f32.mrf.mxu0 }
 0x4d7   :  { %v6090_v20 = vadd.f32 %v2868_v54, %v6087_v41  ;;  %v6119_v17 = vadd.f32 %v2953_v16, %v6085_v23  ;;  %v3154_v63 = vmul.f32 %v6101_v60, %v6101_v60  ;;  %v3153_v21 = vmul.f32 %v6110_v38, %v6110_v38 }
 0x4d8   :  { %v2957_v31 = vpop.f32.mrf.mxu1  ;;  %v2870_v7 = vpop.f32.mrf.mxu0 }
 0x4d9   :  { %v6093_v61 = vadd.f32 %v2957_v31, %v6087_v41  ;;  %v6104_v52 = vadd.f32 %v2870_v7, %v6087_v41  ;;  %v3160_v12 = vmul.f32 %v6090_v20, %v6090_v20  ;;  %v3155_v47 = vmul.f32 %v6119_v17, %v6119_v17 }
 0x4da   :  { %v2959_v9 = vpop.f32.mrf.mxu1  ;;  %v2874_v43 = vpop.f32.mrf.mxu0 }
 0x4db   :  { %v6107_v48 = vadd.f32 %v2874_v43, %v6095_v15  ;;  %v6113_v1 = vadd.f32 %v2959_v9, %v6087_v41  ;;  %v3162_v39 = vmul.f32 %v6093_v61, %v6093_v61  ;;  %v3161_v13 = vmul.f32 %v6104_v52, %v6104_v52 }
 0x4dc   :  { %v2963_v62 = vpop.f32.mrf.mxu1  ;;  %v2876_v29 = vpop.f32.mrf.mxu0  ;;  %v3184_v22 = vadd.f32 %v3160_v12, %v3152_v37 }
 0x4dd   :  { %v6116_v55 = vadd.f32 %v2963_v62, %v6095_v15  ;;  %v6126_v5 = vadd.f32 %v2876_v29, %v6095_v15  ;;  %v3168_v59 = vmul.f32 %v6107_v48, %v6107_v48  ;;  %v3163_v53 = vmul.f32 %v6113_v1, %v6113_v1 }
 0x4de   :  { %v2965_v46 = vpop.f32.mrf.mxu1  ;;  %v3204_v51 = vadd.f32 %v3162_v39, %v3154_v63  ;;  %v3194_v2 = vadd.f32 %v3161_v13, %v3153_v21 }
 0x4df   :  { %v6133_v27 = vadd.f32 %v2965_v46, %v6095_v15  ;;  %v3170_v25 = vmul.f32 %v6116_v55, %v6116_v55  ;;  %v3169_v50 = vmul.f32 %v6126_v5, %v6126_v5  ;;  %v3185_v30 = vadd.f32 %v3184_v22, %v3168_v59 }
 0x4e0   :  { %v2880_v6 = vpop.f32.mrf.mxu0  ;;  %v2969_v58 = vpop.f32.mrf.mxu1  ;;  %v3214_v34 = vadd.f32 %v3163_v53, %v3155_v47 }
 0x4e1   :  { %v6148_v0 = vadd.f32 %v2880_v6, %v6128_v44  ;;  %v6151_v35 = vadd.f32 %v2969_v58, %v6128_v44  ;;  %v3171_v56 = vmul.f32 %v6133_v27, %v6133_v27  ;;  %v3205_v11 = vadd.f32 %v3204_v51, %v3170_v25 }
 0x4e2   :  { %v2882_v3 = vpop.f32.mrf.mxu0  ;;  %v2971_v36 = vpop.f32.mrf.mxu1  ;;  %v3195_v18 = vadd.f32 %v3194_v2, %v3169_v50 }
 0x4e3   :  { %v3176_v32 = vmul.f32 %v6148_v0, %v6148_v0  ;;  %v3178_v49 = vmul.f32 %v6151_v35, %v6151_v35  ;;  %v6164_v26 = vadd.f32 %v2882_v3, %v6128_v44  ;;  %v6167_v40 = vadd.f32 %v2971_v36, %v6128_v44 }
 0x4e4   :  { %v3215_v16 = vadd.f32 %v3214_v34, %v3171_v56 }
 0x4e5   :  { %v3186_v45 = vsel %vm532_vm2, %v3176_v32, 0.0  ;;  %v3206_v14 = vsel %vm532_vm2, %v3178_v49, 0.0  ;;  %v3177_v33 = vmul.f32 %v6164_v26, %v6164_v26  ;;  %v3179_v8 = vmul.f32 %v6167_v40, %v6167_v40 }
 0x4e6   :  { %v3187_v57 = vadd.f32 %v3186_v45, %v3185_v30  ;;  %v3207_v19 = vadd.f32 %v3206_v14, %v3205_v11  ;;  %v3040_v28 = vpop.f32.mrf.mxu0  ;;  %v3129_v31 = vpop.f32.mrf.mxu1 }
 0x4e7   :  { %v3196_v54 = vsel %vm532_vm2, %v3177_v33, 0.0  ;;  %v3216_v62 = vsel %vm532_vm2, %v3179_v8, 0.0  ;;  %v6178_v39 = vadd.f32 %v3040_v28, %v6085_v23  ;;  %v6181_v6 = vadd.f32 %v3129_v31, %v6085_v23 }
 0x4e8   :  { %v3188_v7 = vrot.slane %v3187_v57, 4  ;;  %v3208_v9 = vrot.slane %v3207_v19, 4  ;;  %v3197_v43 = vadd.f32 %v3196_v54, %v3195_v18  ;;  %v3042_v29 = vpop.f32.mrf.mxu0  ;;  %v3217_v12 = vadd.f32 %v3216_v62, %v3215_v16  ;;  %v3131_v46 = vpop.f32.mrf.mxu1 }
 0x4e9   :  { %v6184_v58 = vadd.f32 %v3042_v29, %v6085_v23  ;;  %v6190_v50 = vadd.f32 %v3131_v46, %v6085_v23  ;;  %v3156_v56 = vmul.f32 %v6178_v39, %v6178_v39  ;;  %v3158_v33 = vmul.f32 %v6181_v6, %v6181_v6 }
 0x4ea   :  { %v3189_v37 = vadd.f32 %v3188_v7, %v3187_v57  ;;  %v3209_v63 = vadd.f32 %v3208_v9, %v3207_v19  ;;  %v3198_v13 = vrot.slane %v3197_v43, 4  ;;  %v3046_v59 = vpop.f32.mrf.mxu0  ;;  %v3218_v25 = vrot.slane %v3217_v12, 4  ;;  %v3135_v53 = vpop.f32.mrf.mxu1 }
 0x4eb   :  { %v6187_v21 = vadd.f32 %v3046_v59, %v6087_v41  ;;  %v6195_v32 = vadd.f32 %v3135_v53, %v6087_v41  ;;  %v3157_v18 = vmul.f32 %v6184_v58, %v6184_v58  ;;  %v3159_v54 = vmul.f32 %v6190_v50, %v6190_v50 }
 0x4ec   :  { %v3190_v47 = vrot.slane %v3189_v37, 2  ;;  %v3210_v22 = vrot.slane %v3209_v63, 2  ;;  %v3199_v51 = vadd.f32 %v3198_v13, %v3197_v43  ;;  %v3048_v3 = vpop.f32.mrf.mxu0  ;;  %v3219_v36 = vadd.f32 %v3218_v25, %v3217_v12  ;;  %v3137_v2 = vpop.f32.mrf.mxu1 }
 0x4ed   :  { %v6198_v49 = vadd.f32 %v3048_v3, %v6087_v41  ;;  %v6201_v45 = vadd.f32 %v3137_v2, %v6087_v41  ;;  %v3164_v57 = vmul.f32 %v6187_v21, %v6187_v21  ;;  %v3166_v7 = vmul.f32 %v6195_v32, %v6195_v32 }
 0x4ee   :  { %v3191_v30 = vadd.f32 %v3190_v47, %v3189_v37  ;;  %v3211_v11 = vadd.f32 %v3210_v22, %v3209_v63  ;;  %v3200_v34 = vrot.slane %v3199_v51, 2  ;;  %v3052_v23 = vpop.f32.mrf.mxu0  ;;  %v3220_v14 = vrot.slane %v3219_v36, 2  ;;  %v3141_v19 = vpop.f32.mrf.mxu1 }
 0x4ef   :  { %v3165_v9 = vmul.f32 %v6198_v49, %v6198_v49  ;;  %v3167_v43 = vmul.f32 %v6201_v45, %v6201_v45  ;;  %v6218_v37 = vadd.f32 %v3052_v23, %v6095_v15  ;;  %v3224_v59 = vadd.f32 %v3164_v57, %v3156_v56 }
 0x4f0   :  { %v3192_v8 = vrot.slane %v3191_v30, 1  ;;  %v3212_v28 = vrot.slane %v3211_v11, 1  ;;  %v3201_v16 = vadd.f32 %v3200_v34, %v3199_v51  ;;  %v3054_v41 = vpop.f32.mrf.mxu0  ;;  %v3221_v31 = vadd.f32 %v3220_v14, %v3219_v36  ;;  %v3143_v62 = vpop.f32.mrf.mxu1 }
 0x4f1   :  { %v6221_v25 = vadd.f32 %v3141_v19, %v6095_v15  ;;  %v6224_v53 = vadd.f32 %v3054_v41, %v6095_v15  ;;  %v6227_v36 = vadd.f32 %v3143_v62, %v6095_v15  ;;  %v3254_v34 = vadd.f32 %v3167_v43, %v3159_v54 }
 0x4f2   :  { %v3193_v29 = vadd.f32 %v3192_v8, %v3191_v30  ;;  %v3213_v12 = vadd.f32 %v3212_v28, %v3211_v11  ;;  %v3202_v46 = vrot.slane %v3201_v16, 1  ;;  %v3058_v63 = vpop.f32.mrf.mxu0  ;;  %v3222_v13 = vrot.slane %v3221_v31, 1  ;;  %v3147_v47 = vpop.f32.mrf.mxu1 }
 0x4f3   :  { %v3244_v30 = vadd.f32 %v3166_v7, %v3158_v33  ;;  %v3234_v11 = vadd.f32 %v3165_v9, %v3157_v18  ;;  %v3172_v57 = vmul.f32 %v6218_v37, %v6218_v37  ;;  %v3174_v28 = vmul.f32 %v6221_v25, %v6221_v25 }
 0x4f4   :  { %v3264_v22 = vmul.f32 0.033333335, %v3193_v29  ;;  %v3266_v51 = vmul.f32 0.033333335, %v3213_v12  ;;  %v3203_v3 = vadd.f32 %v3202_v46, %v3201_v16  ;;  %v3223_v2 = vadd.f32 %v3222_v13, %v3221_v31  ;;  %v3060_v19 = vpop.f32.mrf.mxu0  ;;  %v3149_v33 = vpop.f32.mrf.mxu1 }
 0x4f5   :  { %v3173_v16 = vmul.f32 %v6224_v53, %v6224_v53  ;;  %v6236_v15 = vadd.f32 %v3058_v63, %v6128_v44  ;;  %v3175_v54 = vmul.f32 %v6227_v36, %v6227_v36  ;;  %v6241_v41 = vadd.f32 %v3147_v47, %v6128_v44 }
 0x4f6   :  { %v3272_v23 = vadd.f32 1e-05, %v3264_v22  ;;  %v3274_v14 = vadd.f32 1e-05, %v3266_v51  ;;  %v3265_v56 = vmul.f32 0.033333335, %v3203_v3  ;;  %v6246_v9 = vadd.f32 %v3060_v19, %v6128_v44 }
 0x4f7   :  { %v3267_v8 = vmul.f32 0.033333335, %v3223_v2  ;;  %v3180_v7 = vmul.f32 %v6236_v15, %v6236_v15  ;;  %v3225_v43 = vadd.f32 %v3224_v59, %v3172_v57  ;;  %v3182_v62 = vmul.f32 %v6241_v41, %v6241_v41 }
 0x4f8   :  { %4125 = vrsqrt.f32 %v3272_v23  ;;  %v3273_v18 = vadd.f32 1e-05, %v3265_v56  ;;  %v6251_v29 = vadd.f32 %v3149_v33, %v6128_v44  ;;  %v3245_v12 = vadd.f32 %v3244_v30, %v3174_v28  ;;  %v6261_v33 = vpop.permute.xlu0 %3342 }
 0x4f9   :  { %4127 = vrsqrt.f32 %v3274_v14  ;;  %v3275_v31 = vadd.f32 1e-05, %v3267_v8  ;;  %v3226_v46 = vsel %vm532_vm2, %v3180_v7, 0.0  ;;  %v3181_v63 = vmul.f32 %v6246_v9, %v6246_v9 }
 0x4fa   :  { %4129 = vrsqrt.f32 %v3273_v18  ;;  %v3235_v13 = vadd.f32 %v3234_v11, %v3173_v16  ;;  %v3227_v47 = vadd.f32 %v3226_v46, %v3225_v43  ;;  %v3246_v22 = vsel %vm532_vm2, %v3182_v62, 0.0 }
 0x4fb   :  { %4131 = vrsqrt.f32 %v3275_v31  ;;  %v3183_v59 = vmul.f32 %v6251_v29, %v6251_v29  ;;  %v3255_v51 = vadd.f32 %v3254_v34, %v3175_v54  ;;  %v3247_v3 = vadd.f32 %v3246_v22, %v3245_v12 }
 0x4fc   :  { %v3236_v2 = vsel %vm532_vm2, %v3181_v63, 0.0  ;;  %v3228_v44 = vrot.slane %v3227_v47, 4 }
 0x4fd   :  { %v3237_v23 = vadd.f32 %v3236_v2, %v3235_v13  ;;  %v3256_v30 = vsel %vm532_vm2, %v3183_v59, 0.0  ;;  %v3248_v14 = vrot.slane %v3247_v3, 4 }
 0x4fe   :  { %v3257_v56 = vadd.f32 %v3256_v30, %v3255_v51  ;;  %v3229_v57 = vadd.f32 %v3228_v44, %v3227_v47 }
 0x4ff   :  { %v3238_v19 = vrot.slane %v3237_v23, 4  ;;  %v3249_v8 = vadd.f32 %v3248_v14, %v3247_v3 }
 0x500   :  { %v3258_v11 = vrot.slane %v3257_v56, 4  ;;  %v3230_v28 = vrot.slane %v3229_v57, 2 }
 0x501   :  { %v3239_v16 = vadd.f32 %v3238_v19, %v3237_v23  ;;  %v3250_v18 = vrot.slane %v3249_v8, 2 }
 0x502   :  { %v3259_v31 = vadd.f32 %v3258_v11, %v3257_v56  ;;  %v3231_v34 = vadd.f32 %v3230_v28, %v3229_v57 }
 0x503   :  { %v3240_v54 = vrot.slane %v3239_v16, 2  ;;  %v3251_v43 = vadd.f32 %v3250_v18, %v3249_v8  ;;  %v6287_v8 = vpop.permute.xlu1 %3337 }
 0x504   :  { %v3260_v62 = vrot.slane %v3259_v31, 2  ;;  %v3232_v63 = vrot.slane %v3231_v34, 1 }
 0x505   :  { %v6263_v7 = vpop.eup %4125  ;;  %v3241_v13 = vadd.f32 %v3240_v54, %v3239_v16  ;;  %v3252_v51 = vrot.slane %v3251_v43, 1 }
 0x506   :  { %v6265_v12 = vpop.eup %4127  ;;  %v3312_v46 = vmul.f32 %v6263_v7, %v6148_v0  ;;  %v3304_v47 = vmul.f32 %v6263_v7, %v6107_v48  ;;  %v3261_v3 = vadd.f32 %v3260_v62, %v3259_v31  ;;  %v3233_v30 = vadd.f32 %v3232_v63, %v3231_v34  ;;  %v6282_v48 = vpop.permute.xlu0 %3399 }
 0x507   :  { %v6271_v22 = vpop.eup %4129  ;;  %v3314_v59 = vmul.f32 %v6265_v12, %v6151_v35  ;;  %v3306_v2 = vmul.f32 %v6265_v12, %v6116_v55  ;;  %v3242_v14 = vrot.slane %v3241_v13, 1  ;;  %v3253_v57 = vadd.f32 %v3252_v51, %v3251_v43 }
 0x508   :  { %v6277_v44 = vpop.eup %4131  ;;  %v3369_v23 = vmul.f32 %v6261_v33, %v3312_v46  ;;  %v3313_v0 = vmul.f32 %v6271_v22, %v6164_v26  ;;  %v3262_v19 = vrot.slane %v3261_v3, 1  ;;  %v3268_v28 = vmul.f32 0.033333335, %v3233_v30 }
 0x509   :  { %v3371_v56 = vmul.f32 %v6261_v33, %v3314_v59  ;;  %v3315_v35 = vmul.f32 %v6277_v44, %v6167_v40  ;;  %v3243_v16 = vadd.f32 %v3242_v14, %v3241_v13  ;;  %v3270_v31 = vmul.f32 0.033333335, %v3253_v57  ;;  %v6723_v57 = vld [vmem:[#allocation35_spill] sm:$0xff] }
 0x50a   :  { %v3426_v55 = vadd.f32 %v6282_v48, %v3369_v23  ;;  %v3370_v11 = vmul.f32 %v6261_v33, %v3313_v0  ;;  %v3263_v34 = vadd.f32 %v3262_v19, %v3261_v3  ;;  %v3276_v40 = vadd.f32 1e-05, %v3268_v28  ;;  %v6296_v30 = vpop.permute.xlu0 %3394 }
 0x50b   :  { %v3428_v26 = vadd.f32 %v6282_v48, %v3371_v56  ;;  %v3372_v18 = vmul.f32 %v6261_v33, %v3315_v35  ;;  %v3269_v43 = vmul.f32 0.033333335, %v3243_v16  ;;  %v3278_v59 = vadd.f32 1e-05, %v3270_v31  ;;  %v6299_v35 = vpop.permute.xlu1 %3332 }
 0x50c   :  { %v3458_v54 = vmax.f32 %v3426_v55, 0.0  ;;  %v3427_v62 = vadd.f32 %v6282_v48, %v3370_v11  ;;  %v3271_v51 = vmul.f32 0.033333335, %v3263_v34  ;;  %4133 = vrsqrt.f32 %v3276_v40  ;;  %v6724_v11 = vld [vmem:[#allocation7_spill] sm:$0xff] }
 0x50d   :  { %v3460_v46 = vmax.f32 %v3428_v26, 0.0  ;;  %v3429_v63 = vadd.f32 %v6282_v48, %v3372_v18  ;;  %v3277_v13 = vadd.f32 1e-05, %v3269_v43  ;;  %4135 = vrsqrt.f32 %v3278_v59 }
 0x50e   :  { %v3490_v23 = vadd.f32 %v3458_v54, %v5338_v4  ;;  %v3459_v0 = vmax.f32 %v3427_v62, 0.0  ;;  %v3279_v56 = vadd.f32 1e-05, %v3271_v51  ;;  %v3305_v55 = vmul.f32 %v6271_v22, %v6126_v5  ;;  %v6327_v62 = vpop.permute.xlu0 %3389 }
 0x50f   :  { %v3492_v14 = vadd.f32 %v3460_v46, %v5346_v24  ;;  %v3461_v3 = vmax.f32 %v3429_v63, 0.0  ;;  %4137 = vrsqrt.f32 %v3277_v13  ;;  %v3307_v4 = vmul.f32 %v6277_v44, %v6133_v27  ;;  %v6725_v13 = vld [vmem:[#allocation8_spill] sm:$0xff] }
 0x510   :  { %v3491_v19 = vadd.f32 %v3459_v0, %v6723_v57  ;;  %4139 = vrsqrt.f32 %v3279_v56  ;;  %v3361_v16 = vmul.f32 %v6287_v8, %v3304_v47  ;;  %v3363_v24 = vmul.f32 %v6287_v8, %v3306_v2 }
 0x511   :  { %v3493_v28 = vadd.f32 %v3461_v3, %v6724_v11  ;;  %v3362_v26 = vmul.f32 %v6287_v8, %v3305_v55  ;;  %v3364_v18 = vmul.f32 %v6287_v8, %v3307_v4  ;;  %v3297_v31 = vmul.f32 %v6271_v22, %v6104_v52  ;;  %v6726_v3 = vld [vmem:[#allocation9_spill] sm:$0xff]  ;;  %v6728_v11 = vld [vmem:[#allocation6_spill] sm:$0xff] }
 0x512   :  { %4050 = vmatprep.subr.msk.mxu0 %vm532_vm2, %v3491_v19  ;;  %v3299_v5 = vmul.f32 %v6277_v44, %v6113_v1  ;;  %v3418_v27 = vadd.f32 %v6296_v30, %v3361_v16  ;;  %v3420_v47 = vadd.f32 %v6296_v30, %v3363_v24  ;;  %v3296_v2 = vmul.f32 %v6263_v7, %v6090_v20  ;;  %v6332_v20 = vpop.permute.xlu1 %3327  ;;  %v6727_v55 = vld [vmem:[#allocation5_spill] sm:$0xff] }
 0x513   :  { %4054 = vmatprep.subr.msk.mxu1 %vm532_vm2, %v3493_v28  ;;  %4051 = vmatpush1.msk.msra.mxu0 %vm532_vm2, %v3490_v23  ;;  %v3419_v34 = vadd.f32 %v6296_v30, %v3362_v26  ;;  %v3421_v52 = vadd.f32 %v6296_v30, %v3364_v18  ;;  %v3354_v54 = vmul.f32 %v6299_v35, %v3297_v31 }
 0x514   :  { %4055 = vmatpush1.msk.msra.mxu1 %vm532_vm2, %v3492_v14  ;;  %v3356_v1 = vmul.f32 %v6299_v35, %v3299_v5  ;;  %v3450_v40 = vmax.f32 %v3418_v27, 0.0  ;;  %v3452_v43 = vmax.f32 %v3420_v47, 0.0  ;;  %v3353_v46 = vmul.f32 %v6299_v35, %v3296_v2  ;;  %v6729_v5 = vld [vmem:[#allocation10_spill] sm:$0xff]  ;;  %v6730_v47 = vld [vmem:[#allocation11_spill] sm:$0xff] }
 0x515   :  { %v3298_v63 = vmul.f32 %v6265_v12, %v6093_v61  ;;  %v3451_v59 = vmax.f32 %v3419_v34, 0.0  ;;  %v3453_v51 = vmax.f32 %v3421_v52, 0.0  ;;  %v3411_v23 = vadd.f32 %v6327_v62, %v3354_v54  ;;  %v6731_v54 = vld [vmem:[#allocation12_spill] sm:$0xff] }
 0x516   :  { %v3413_v0 = vadd.f32 %v6327_v62, %v3356_v1  ;;  %v3482_v14 = vadd.f32 %v3450_v40, %v6725_v13  ;;  %v3484_v56 = vadd.f32 %v3452_v43, %v6726_v3  ;;  %v3410_v57 = vadd.f32 %v6327_v62, %v3353_v46 }
 0x517   :  { %v3355_v19 = vmul.f32 %v6299_v35, %v3298_v63  ;;  %v3483_v4 = vadd.f32 %v3451_v59, %v6727_v55  ;;  %v3485_v61 = vadd.f32 %v3453_v51, %v6728_v11  ;;  %v3443_v28 = vmax.f32 %v3411_v23, 0.0  ;;  %v6732_v59 = vld [vmem:[#allocation13_spill] sm:$0xff] }
 0x518   :  { %v3445_v16 = vmax.f32 %v3413_v0, 0.0  ;;  %v3442_v24 = vmax.f32 %v3410_v57, 0.0  ;;  %v3289_v18 = vmul.f32 %v6271_v22, %v6110_v38  ;;  %v3291_v31 = vmul.f32 %v6277_v44, %v6119_v17  ;;  %v6358_v44 = vpop.permute.xlu1 %3384 }
 0x519   :  { %v3412_v26 = vadd.f32 %v6327_v62, %v3355_v19  ;;  %3568 = vmatprep.subr.mxu0 %v3483_v4  ;;  %3645 = vmatprep.subr.mxu1 %v3485_v61  ;;  %v3475_v27 = vadd.f32 %v3443_v28, %v6729_v5  ;;  %v3288_v34 = vmul.f32 %v6263_v7, %v6098_v42  ;;  %v6351_v52 = vpop.eup %4133  ;;  %v6733_v28 = vld [vmem:[#allocation14_spill] sm:$0xff] }
 0x51a   :  { %v3477_v2 = vadd.f32 %v3445_v16, %v6730_v47  ;;  %3569 = vmatpush1.msra.mxu0 %v3482_v14  ;;  %3646 = vmatpush1.msra.mxu1 %v3484_v56  ;;  %v3474_v1 = vadd.f32 %v3442_v24, %v6731_v54  ;;  %v3346_v38 = vmul.f32 %v6332_v20, %v3289_v18  ;;  %v6356_v22 = vpop.eup %4135  ;;  %v6734_v24 = vld [vmem:[#allocation15_spill] sm:$0xff]  ;;  %v6394_v47 = vld [vmem:[%s6503_s7] sm:$0xff] }
 0x51b   :  { %v3444_v40 = vmax.f32 %v3412_v26, 0.0  ;;  %v3348_v17 = vmul.f32 %v6332_v20, %v3291_v31  ;;  %v3316_v43 = vmul.f32 %v6351_v52, %v6236_v15  ;;  %3570 = vmatprep.subr.mxu0 %v3475_v27  ;;  %v3345_v42 = vmul.f32 %v6332_v20, %v3288_v34  ;;  %v6735_v31 = vld [vmem:[#allocation16_spill] sm:$0xff] }
 0x51c   :  { %3647 = vmatprep.subr.mxu1 %v3477_v2  ;;  %v3290_v7 = vmul.f32 %v6265_v12, %v6101_v60  ;;  %v6365_v46 = vpop.eup %4137  ;;  %v3318_v63 = vmul.f32 %v6356_v22, %v6241_v41  ;;  %3571 = vmatpush1.msra.mxu0 %v3474_v1  ;;  %v3403_v23 = vadd.f32 %v6358_v44, %v3346_v38  ;;  %v6736_v1 = vld [vmem:[#allocation18_spill] sm:$0xff] }
 0x51d   :  { %v3476_v51 = vadd.f32 %v3444_v40, %v6732_v59  ;;  %v3405_v0 = vadd.f32 %v6358_v44, %v3348_v17  ;;  %v6372_v15 = vpop.eup %4139  ;;  %v3373_v13 = vmul.f32 %v6261_v33, %v3316_v43  ;;  %v3317_v14 = vmul.f32 %v6365_v46, %v6246_v9  ;;  %v6737_v17 = vld [vmem:[#allocation17_spill] sm:$0xff] }
 0x51e   :  { %v3402_v60 = vadd.f32 %v6358_v44, %v3345_v42  ;;  %v3347_v12 = vmul.f32 %v6332_v20, %v3290_v7  ;;  %v3375_v41 = vmul.f32 %v6261_v33, %v3318_v63  ;;  %v3319_v3 = vmul.f32 %v6372_v15, %v6251_v29  ;;  %v6738_v7 = vld [vmem:[#allocation19_spill] sm:$0xff] }
 0x51f   :  { %3648 = vmatpush1.msra.mxu1 %v3476_v51  ;;  %v3435_v56 = vmax.f32 %v3403_v23, 0.0  ;;  %v3437_v57 = vmax.f32 %v3405_v0, 0.0  ;;  %v3430_v19 = vadd.f32 %v6282_v48, %v3373_v13  ;;  %v3374_v55 = vmul.f32 %v6261_v33, %v3317_v14  ;;  %v6739_v51 = vld [vmem:[#allocation20_spill] sm:$0xff]  ;;  %v6740_v13 = vld [vmem:[#allocation21_spill] sm:$0xff] }
 0x520   :  { %v3434_v4 = vmax.f32 %v3402_v60, 0.0  ;;  %v3404_v11 = vadd.f32 %v6358_v44, %v3347_v12  ;;  %v3432_v9 = vadd.f32 %v6282_v48, %v3375_v41  ;;  %v3376_v61 = vmul.f32 %v6261_v33, %v3319_v3 }
 0x521   :  { %v3467_v16 = vadd.f32 %v3435_v56, %v6733_v28  ;;  %v3469_v26 = vadd.f32 %v3437_v57, %v6734_v24  ;;  %v3462_v18 = vmax.f32 %v3430_v19, 0.0  ;;  %v3431_v29 = vadd.f32 %v6282_v48, %v3374_v55  ;;  %v6742_v28 = vld [vmem:[#allocation23_spill] sm:$0xff] }
 0x522   :  { %v3466_v5 = vadd.f32 %v3434_v4, %v6735_v31  ;;  %v3436_v27 = vmax.f32 %v3404_v11, 0.0  ;;  %v3464_v2 = vmax.f32 %v3432_v9, 0.0  ;;  %v3433_v34 = vadd.f32 %v6282_v48, %v3376_v61  ;;  %v6741_v9 = vld [vmem:[#allocation22_spill] sm:$0xff] }
 0x523   :  { %3572 = vmatprep.subr.mxu0 %v3467_v16  ;;  %3649 = vmatprep.subr.mxu1 %v3469_v26  ;;  %v3309_v33 = vmul.f32 %v6365_v46, %v6224_v53  ;;  %v3311_v54 = vmul.f32 %v6372_v15, %v6227_v36  ;;  %v3494_v40 = vadd.f32 %v3462_v18, %v6736_v1  ;;  %v3463_v38 = vmax.f32 %v3431_v29, 0.0  ;;  %v6414_v36 = vld [vmem:[%s6503_s7 + $0x8] sm:$0x7f]  ;;  %v6743_v26 = vld [vmem:[#allocation24_spill] sm:$0xff]  ;;  %s4165_s7 = smov [#allocation2]  }
 0x524   :  { %3573 = vmatpush1.msra.mxu0 %v3466_v5  ;;  %v3468_v43 = vadd.f32 %v3436_v27, %v6737_v17  ;;  %v3308_v42 = vmul.f32 %v6351_v52, %v6218_v37  ;;  %v3496_v63 = vadd.f32 %v3464_v2, %v6738_v7  ;;  %v3465_v48 = vmax.f32 %v3433_v34, 0.0  ;;  %v6744_v34 = vld [vmem:[#allocation25_spill] sm:$0xff]  ;;  %s3871_s17 = sshll.u32 %s4165_s7, 4  ;;  %s3872_s17 = int_to_ptr.vmem [resolvable:$true] %s3871_s17 }
 0x525   :  { %4052 = vmatmul.mubr.msk.f32.vlgmr.msra.gmra.mxu0 %vm519_vm3, %v6394_v47  ;;  %v3366_v53 = vmul.f32 %v6287_v8, %v3309_v33  ;;  %v3368_v59 = vmul.f32 %v6287_v8, %v3311_v54  ;;  %v3495_v37 = vadd.f32 %v3463_v38, %v6739_v51  ;;  %v3310_v0 = vmul.f32 %v6356_v22, %v6221_v25  ;;  %s4141_s18 = scalar_lea.vmem %s3872_s17, 2048  ;;  %p4146_p1 = scmp.lt.s32.totalorder %s3872_s17, %s3872_s17 }
 0x526   :  { %3650 = vmatpush1.msra.mxu1 %v3468_v43  ;;  %3612 = vmatprep.mubr.f32.mxu0 %v6629_v10  ;;  %v3365_v23 = vmul.f32 %v6287_v8, %v3308_v42  ;;  %v3497_v14 = vadd.f32 %v3465_v48, %v6740_v13  ;;  %v3301_v41 = vmul.f32 %v6365_v46, %v6198_v49  ;;  %v6748_v48 = vld [vmem:[#allocation29_spill] sm:$0xff]  ;;  %p4142_p0 = scmp.ne.s32.totalorder %s3872_s17, %s4141_s18  ;;  %p4147_p2 = scmp.lt.s32.totalorder %s4141_s18, %s4141_s18 }
 0x527   :  { %4056 = vmatmul.mubr.msk.f32.vlgmr.msra.gmra.mxu1 %vm519_vm3, %v6394_v47  ;;  %v3423_v60 = vadd.f32 %v6296_v30, %v3366_v53  ;;  %v3425_v12 = vadd.f32 %v6296_v30, %v3368_v59  ;;  %4058 = vmatprep.subr.msk.mxu0 %vm532_vm2, %v3495_v37  ;;  %v3367_v25 = vmul.f32 %v6287_v8, %v3310_v0 }
 0x528   :  { %3689 = vmatprep.mubr.f32.mxu1 %v6629_v10  ;;  %v3422_v3 = vadd.f32 %v6296_v30, %v3365_v23  ;;  %v3303_v56 = vmul.f32 %v6372_v15, %v6201_v45  ;;  %4062 = vmatprep.subr.msk.mxu1 %vm532_vm2, %v3497_v14  ;;  %v3358_v49 = vmul.f32 %v6299_v35, %v3301_v41  ;;  %v6750_v14 = vld [vmem:[#allocation30_spill] sm:$0xff]  ;;  %p4148_p3 = por %p4147_p2, %p4146_p1 }
 0x529   :  { %4053 = vmatmul.mubr.msk.f32.gmra.mxu0 %vm519_vm3, %v6414_v36  ;;  %v3455_v57 = vmax.f32 %v3423_v60, 0.0  ;;  %v3457_v19 = vmax.f32 %v3425_v12, 0.0  ;;  %v3300_v55 = vmul.f32 %v6351_v52, %v6187_v21  ;;  %4063 = vmatpush1.msk.msra.mxu1 %vm532_vm2, %v3496_v63  ;;  %v3424_v4 = vadd.f32 %v6296_v30, %v3367_v25  ;;  %v6751_v12 = vld [vmem:[#allocation31_spill] sm:$0xff]  ;;  %v6752_v25 = vld [vmem:[#allocation32_spill] sm:$0xff] }
 0x52a   :  { %4059 = vmatpush1.msk.msra.mxu0 %vm532_vm2, %v3494_v40  ;;  %v3454_v8 = vmax.f32 %v3422_v3, 0.0  ;;  %v3360_v45 = vmul.f32 %v6299_v35, %v3303_v56  ;;  %v3302_v11 = vmul.f32 %v6356_v22, %v6195_v32  ;;  %v3415_v21 = vadd.f32 %v6327_v62, %v3358_v49  ;;  %3760 = vmatprep.mubr.f32.mxu0 %v6629_v10  ;;  %v6745_v40 = vld [vmem:[#allocation26_spill] sm:$0xff]  ;;  %p4149_p4 = pnand %p4148_p3, %p4142_p0 }
 0x52b   :  { %4057 = vmatmul.mubr.msk.f32.gmra.mxu1 %vm519_vm3, %v6414_v36  ;;  %v3487_v61 = vadd.f32 %v3455_v57, %v6741_v9  ;;  %v3489_v16 = vadd.f32 %v3457_v19, %v6742_v28  ;;  %v3357_v24 = vmul.f32 %v6299_v35, %v3300_v55  ;;  %v3456_v29 = vmax.f32 %v3424_v4, 0.0  ;;  %v3510_v55 = vpop.permute.xlu1 %3509 }
 0x52c   :  { %v3486_v18 = vadd.f32 %v3454_v8, %v6743_v26  ;;  %v3417_v30 = vadd.f32 %v6327_v62, %v3360_v45  ;;  %v3359_v31 = vmul.f32 %v6299_v35, %v3302_v11  ;;  %3837 = vmatprep.mubr.f32.mxu1 %v6629_v10  ;;  %v3447_v32 = vmax.f32 %v3415_v21, 0.0 }
 0x52d   :  { %3722 = vmatprep.subr.mxu0 %v3487_v61  ;;  %3799 = vmatprep.subr.mxu1 %v3489_v16  ;;  %v3414_v5 = vadd.f32 %v6327_v62, %v3357_v24  ;;  %v3293_v27 = vmul.f32 %v6365_v46, %v6184_v58  ;;  %v3295_v2 = vmul.f32 %v6372_v15, %v6190_v50  ;;  %v6746_v58 = vld [vmem:[#allocation27_spill] sm:$0xff] }
 0x52e   :  { %3723 = vmatpush1.msra.mxu0 %v3486_v18  ;;  %v3488_v33 = vadd.f32 %v3456_v29, %v6744_v34  ;;  %v3449_v54 = vmax.f32 %v3417_v30, 0.0  ;;  %v3416_v35 = vadd.f32 %v6327_v62, %v3359_v31  ;;  %v3292_v1 = vmul.f32 %v6351_v52, %v6178_v39  ;;  %v6747_v62 = vld [vmem:[#allocation28_spill] sm:$0xff] }
 0x52f   :  { %v3479_v38 = vadd.f32 %v3447_v32, %v6745_v40  ;;  %v3446_v17 = vmax.f32 %v3414_v5, 0.0  ;;  %v3350_v43 = vmul.f32 %v6332_v20, %v3293_v27  ;;  %v3352_v42 = vmul.f32 %v6332_v20, %v3295_v2 }
 0x530   :  { %3800 = vmatpush1.msra.mxu1 %v3488_v33  ;;  %v3481_v46 = vadd.f32 %v3449_v54, %v6746_v58  ;;  %v3448_v50 = vmax.f32 %v3416_v35, 0.0  ;;  %v3349_v15 = vmul.f32 %v6332_v20, %v3292_v1  ;;  %v3294_v7 = vmul.f32 %v6356_v22, %v6181_v6  ;;  %v6749_v22 = vld [vmem:[#allocation34_spill] sm:$0xff] }
 0x531   :  { %3724 = vmatprep.subr.mxu0 %v3479_v38  ;;  %v3478_v63 = vadd.f32 %v3446_v17, %v6747_v62  ;;  %v3407_v39 = vadd.f32 %v6358_v44, %v3350_v43  ;;  %v3409_v52 = vadd.f32 %v6358_v44, %v3352_v42 }
 0x532   :  { %3801 = vmatprep.subr.mxu1 %v3481_v46  ;;  %v3480_v53 = vadd.f32 %v3448_v50, %v6748_v48  ;;  %v3406_v59 = vadd.f32 %v6358_v44, %v3349_v15  ;;  %v3351_v51 = vmul.f32 %v6332_v20, %v3294_v7  ;;  %v3505_v20 = vpop.permute.xlu0 %3504 }
 0x533   :  { %3725 = vmatpush1.msra.mxu0 %v3478_v63  ;;  %v3439_v37 = vmax.f32 %v3407_v39, 0.0  ;;  %v3441_v23 = vmax.f32 %v3409_v52, 0.0 }
 0x534   :  { %3802 = vmatpush1.msra.mxu1 %v3480_v53  ;;  %v3438_v0 = vmax.f32 %v3406_v59, 0.0  ;;  %v3408_v6 = vadd.f32 %v6358_v44, %v3351_v51 }
 0x535   :  { %v3471_v13 = vadd.f32 %v3439_v37, %v6749_v22  ;;  %v3473_v60 = vadd.f32 %v3441_v23, %v6750_v14 }
 0x536   :  { %v3470_v41 = vadd.f32 %v3438_v0, %v6751_v12  ;;  %v3440_v3 = vmax.f32 %v3408_v6, 0.0 }
 0x537   :  { %3726 = vmatprep.subr.mxu0 %v3471_v13  ;;  %3803 = vmatprep.subr.mxu1 %v3473_v60 }
 0x538   :  { %3727 = vmatpush1.msra.mxu0 %v3470_v41  ;;  %v3472_v56 = vadd.f32 %v3440_v3, %v6752_v25 }
 0x539   :  { %4060 = vmatmul.mubr.msk.f32.vlgmr.msra.gmra.mxu0 %vm519_vm3, %v6394_v47 }
 0x53a   :  { %3804 = vmatpush1.msra.mxu1 %v3472_v56  ;;  %3766 = vmatprep.mubr.f32.mxu0 %v6629_v10 }
 0x53b   :  { %4064 = vmatmul.mubr.msk.f32.vlgmr.msra.gmra.mxu1 %vm519_vm3, %v6394_v47 }
 0x53c   :  { %3843 = vmatprep.mubr.f32.mxu1 %v6629_v10 }
 0x53d   :  { %4061 = vmatmul.mubr.msk.f32.gmra.mxu0 %vm519_vm3, %v6414_v36 }
 0x53f   :  { %4065 = vmatmul.mubr.msk.f32.gmra.mxu1 %vm519_vm3, %v6414_v36 }
 0x5e5   :  { %v3608_v44 = vpop.f32.mrf.mxu0 }
 0x5e6   :  { %v3609_v57 = vadd.f32 %v3608_v44, %v3505_v20 }
 0x5e7   :  { %v3685_v19 = vpop.f32.mrf.mxu1  ;;  %v3610_v49 = vpop.f32.mrf.mxu0 }
 0x5e8   :  { %3850 = vst [vmem:[#allocation2] sm:$0xff] %v3609_v57  ;;  %v3686_v8 = vadd.f32 %v3685_v19, %v3505_v20  ;;  %v3611_v4 = vadd.f32 %v3610_v49, %v3505_v20 }
 0x5e9   :  { %v3687_v45 = vpop.f32.mrf.mxu1  ;;  %v3614_v11 = vpop.f32.mrf.mxu0 }
 0x5ea   :  { %3852 = vst [vmem:[#allocation2 + $0x10] sm:$0xff] %v3686_v8  ;;  %3851 = vst [vmem:[#allocation2 + $0x8] sm:$0xff] %v3611_v4  ;;  %v3688_v10 = vadd.f32 %v3687_v45, %v3505_v20  ;;  %v3615_v47 = vadd.f32 %v3614_v11, %v3510_v55 }
 0x5eb   :  { %v3691_v9 = vpop.f32.mrf.mxu1  ;;  %v3616_v61 = vpop.f32.mrf.mxu0 }
 0x5ec   :  { %3853 = vst [vmem:[#allocation2 + $0x18] sm:$0xff] %v3688_v10  ;;  %3858 = vst [vmem:[#allocation2 + $0x40] sm:$0x7f] %v3615_v47  ;;  %v3692_v36 = vadd.f32 %v3691_v9, %v3510_v55  ;;  %v3617_v28 = vadd.f32 %v3616_v61, %v3510_v55 }
 0x5ed   :  { %v3693_v16 = vpop.f32.mrf.mxu1 }
 0x5ee   :  { %3860 = vst [vmem:[#allocation2 + $0x50] sm:$0x7f] %v3692_v36  ;;  %3859 = vst [vmem:[#allocation2 + $0x48] sm:$0x7f] %v3617_v28  ;;  %v3694_v21 = vadd.f32 %v3693_v16, %v3510_v55 }
 0x5f0   :  { %3861 = vst [vmem:[#allocation2 + $0x58] sm:$0x7f] %v3694_v21 }
 0x5f9   :  { %v3762_v24 = vpop.f32.mrf.mxu0 }
 0x5fa   :  { %v3763_v26 = vadd.f32 %v3762_v24, %v3505_v20 }
 0x5fb   :  { %v3839_v18 = vpop.f32.mrf.mxu1  ;;  %v3764_v29 = vpop.f32.mrf.mxu0 }
 0x5fc   :  { %3854 = vst [vmem:[#allocation2 + $0x20] sm:$0xff] %v3763_v26  ;;  %v3840_v30 = vadd.f32 %v3839_v18, %v3505_v20  ;;  %v3765_v31 = vadd.f32 %v3764_v29, %v3505_v20 }
 0x5fd   :  { %v3841_v32 = vpop.f32.mrf.mxu1  ;;  %v3768_v5 = vpop.f32.mrf.mxu0 }
 0x5fe   :  { %3856 = vst [vmem:[#allocation2 + $0x30] sm:$0xff] %v3840_v30  ;;  %3855 = vst [vmem:[#allocation2 + $0x28] sm:$0xff] %v3765_v31  ;;  %v3842_v27 = vadd.f32 %v3841_v32, %v3505_v20  ;;  %v3769_v2 = vadd.f32 %v3768_v5, %v3510_v55 }
 0x5ff   :  { %v3845_v34 = vpop.f32.mrf.mxu1  ;;  %v3770_v33 = vpop.f32.mrf.mxu0 }
 0x600   :  { %3857 = vst [vmem:[#allocation2 + $0x38] sm:$0xff] %v3842_v27  ;;  %3862 = vst [vmem:[#allocation2 + $0x60] sm:$0x7f] %v3769_v2  ;;  %v3846_v54 = vadd.f32 %v3845_v34, %v3510_v55  ;;  %v3771_v35 = vadd.f32 %v3770_v33, %v3510_v55 }
 0x601   :  { %v3847_v1 = vpop.f32.mrf.mxu1 }
 0x602   :  { %3864 = vst [vmem:[#allocation2 + $0x70] sm:$0x7f] %v3846_v54  ;;  %3863 = vst [vmem:[#allocation2 + $0x68] sm:$0x7f] %v3771_v35  ;;  %v3848_v40 = vadd.f32 %v3847_v1, %v3510_v55 }
 0x604   :  { %3865 = vst [vmem:[#allocation2 + $0x78] sm:$0x7f] %v3848_v40 }
 0x605   :  { %4152 = shalt.err (!%p4149_p4)
}
 0x606   :  { %s4166_s19 = smov 1024   ;;  %s4167_s20 = smov 64  }
 0x607   :  { %3877 = dma.vmem_to_hbm [thread:$0]  %s3872_s17, 2048, %s6505_s9, [#allocation3], %s4166_s19, %s4166_s19, %s4167_s20  }
 0x608   :  { %4161 = dma.done.wait [#allocation3], 2048  }
 0x609   :  { %4162 = vsyncadd [#allocation3], 4294965248 }
 0x60a   :  { %3881 = vsyncpa [#allocation3], 1 }

</bundles_post_ra>
